<compile_context>
chip_gen: v7x
topology: tpu7x:2x2x1
jax: 0.10.0
libtpu: 0.0.40
codegen_flags: <defaults>
</compile_context>

<pallas_src>
import functools

import numpy as np

import jax
import jax.numpy as jnp
from jax.experimental import pallas as pl
from jax.experimental.pallas import tpu as pltpu


# Spatial size (H == W) of the input of each conv layer, and its channels.
_SPATIAL = [32, 16, 8, 4]
_CHANS = [(1, 16), (16, 32), (32, 64), (64, 128)]


# -----------------------------------------------------------------------------
# Weight packing (done once, outside the forward pass).
# -----------------------------------------------------------------------------
def _build_conv_mats(weight, w_in, dtype=jnp.bfloat16):
    """Pack a PyTorch-layout conv weight (Cout, Cin, 3, 3) into 3 banded
    matrices M[di] of shape (w_in*Cin, Wo*Cout) such that

        out_row(ho)[b, wo*Cout + co] = sum_di  in_row(2*ho+di-1)[b, :] @ M[di]

    reproduces Conv2d(kernel=3, stride=2, padding=1) exactly (padding taps read
    zeros and are elided)."""
    w = np.asarray(jax.device_get(weight), dtype=np.float32)  # (Cout, Cin, 3, 3)
    cout, cin = w.shape[0], w.shape[1]
    wo_n = w_in // 2
    m = np.zeros((3, w_in, cin, wo_n, cout), np.float32)
    for di in range(3):
        for dj in range(3):
            for wo in range(wo_n):
                col = 2 * wo + dj - 1           # original (unpadded) column
                if col < 0:                     # left padding column -> zero
                    continue
                m[di, col, :, wo, :] = w[:, :, di, dj].T   # (Cin, Cout)
    return jnp.asarray(m.reshape(3, w_in * cin, wo_n * cout), dtype=dtype)


def prepare_params(params):
    """Pack PyTorch-layout params into kernel-ready layout (called once)."""
    prep = {}
    for li, ((w, b), w_in) in enumerate(zip(params["conv"], _SPATIAL), start=1):
        wo_n = w_in // 2
        cout = w.shape[0]
        prep[f"m{li}"] = _build_conv_mats(w, w_in, dtype=jnp.bfloat16)
        # bias_row[wo*Cout + co] = b[co]
        prep[f"b{li}"] = jnp.tile(b, wo_n).reshape(1, wo_n * cout).astype(jnp.float32)
    # PyTorch flatten order of the (B, 128, 2, 2) conv output is (c, h, w);
    # in-kernel layout is row h, column w*128 + c -> permute FC weight once.
    fcw = params["fc_w"].reshape(128, 2, 2)                       # (c, h, w)
    prep["fcw"] = jnp.transpose(fcw, (1, 2, 0)).reshape(2, 256).astype(jnp.float32)
    prep["fcb"] = params["fc_b"].reshape(1, 1).astype(jnp.float32)
    return prep


# -----------------------------------------------------------------------------
# Fused Pallas kernel: all conv blocks + FC, activations in VMEM scratch.
# -----------------------------------------------------------------------------
@functools.partial(jax.jit, static_argnames=("block_batch",))
def discriminator_forward(prep, x, block_batch=128):
    """x: (B, 1, 32, 32) float32 -> (B, 1) float32.  Requires B % 16 == 0."""
    batch = x.shape[0]
    bt = min(batch, block_batch)          # batch tile per grid step
    assert batch % bt == 0 and bt % 16 == 0, (
        "batch must be a multiple of 16 (bf16 sublane-aligned batch tiles)")

    # NCHW -> (H, B, W) image rows, cast to bf16 once (bf16 activations).
    xin = jnp.transpose(x[:, 0, :, :], (1, 0, 2)).astype(jnp.bfloat16)  # (32,B,32)

    def kernel(x_ref, m1, b1, m2, b2, m3, b3, m4, b4, fcw_ref, fcb_ref,
               out_ref, xe, xo, e1, o1, e2, o2, e3, o3, a4):

        def conv_block(e_in, o_in, m_ref, b_ref, ho_n,
                       e_out=None, o_out=None, full_out=None):
            # e_in : (ho_n*bt, K)      even input rows   (spatial row 2*ho)
            # o_in : ((ho_n+1)*bt, K)  zero pad + odd input rows (row 2*ho+1)
            # Three row-batched matmuls, one per vertical tap (M = ho_n*bt).
            rows = ho_n * bt
            lhs_top = o_in[0:rows, :]            # input row 2*ho - 1
            lhs_mid = e_in[0:rows, :]            # input row 2*ho
            lhs_bot = o_in[bt:rows + bt, :]      # input row 2*ho + 1
            acc = jnp.dot(lhs_mid, m_ref[1], preferred_element_type=jnp.float32)
            acc = acc + jnp.dot(lhs_top, m_ref[0],
                                preferred_element_type=jnp.float32)
            acc = acc + jnp.dot(lhs_bot, m_ref[2],
                                preferred_element_type=jnp.float32)
            acc = acc + b_ref[...]               # bias: one broadcast per layer
            acc = jnp.maximum(acc, 0.2 * acc)    # LeakyReLU(0.2), f32 epilogue
            out = acc.astype(jnp.bfloat16)
            if full_out is not None:
                full_out[...] = out
            else:
                # De-interleave output rows for the next stride-2 layer:
                # even rows -> e_out, odd rows -> o_out (after a zero-pad row
                # block), so the next layer reads only contiguous slabs.
                o_out[0:bt, :] = jnp.zeros((bt, o_out.shape[1]), jnp.bfloat16)
                for q in range(ho_n // 2):
                    e_out[q * bt:(q + 1) * bt, :] = \
                        out[(2 * q) * bt:(2 * q + 1) * bt, :]
                    o_out[(q + 1) * bt:(q + 2) * bt, :] = \
                        out[(2 * q + 1) * bt:(2 * q + 2) * bt, :]

        # Stage the 32 image rows as de-interleaved 2-D slabs (even / pad+odd).
        xo[0:bt, :] = jnp.zeros((bt, 32), jnp.bfloat16)
        for h in range(16):
            xe[h * bt:(h + 1) * bt, :] = x_ref[2 * h]
            xo[(h + 1) * bt:(h + 2) * bt, :] = x_ref[2 * h + 1]

        conv_block(xe, xo, m1, b1, 16, e_out=e1, o_out=o1)   # 32x32x1 -> 16 rows
        conv_block(e1, o1, m2, b2, 8, e_out=e2, o_out=o2)    # -> 8 rows
        conv_block(e2, o2, m3, b3, 4, e_out=e3, o_out=o3)    # -> 4 rows
        conv_block(e3, o3, m4, b4, 2, full_out=a4)           # -> 2 rows of 256

        # Linear(512, 1): elementwise multiply + lane reduction.
        fcw = fcw_ref[...]                                   # (2, 256) f32
        prod = (a4[0:bt, :].astype(jnp.float32) * fcw[0:1, :]
                + a4[bt:2 * bt, :].astype(jnp.float32) * fcw[1:2, :])
        out_ref[...] = (jnp.sum(prod, axis=-1, keepdims=True)
                        + fcb_ref[...]).astype(out_ref.dtype)

    bmap = lambda i: (0, i, 0)       # tile the batch (middle) axis
    wmap3 = lambda i: (0, 0, 0)      # weights: single resident block
    wmap2 = lambda i: (0, 0)

    return pl.pallas_call(
        kernel,
        out_shape=jax.ShapeDtypeStruct((batch, 1), jnp.float32),
        grid=(batch // bt,),
        in_specs=[
            pl.BlockSpec((32, bt, 32), bmap),                 # image rows
            pl.BlockSpec((3, 32, 256), wmap3),                # m1
            pl.BlockSpec((1, 256), wmap2),                    # b1
            pl.BlockSpec((3, 256, 256), wmap3),               # m2
            pl.BlockSpec((1, 256), wmap2),                    # b2
            pl.BlockSpec((3, 256, 256), wmap3),               # m3
            pl.BlockSpec((1, 256), wmap2),                    # b3
            pl.BlockSpec((3, 256, 256), wmap3),               # m4
            pl.BlockSpec((1, 256), wmap2),                    # b4
            pl.BlockSpec((2, 256), wmap2),                    # fc weight
            pl.BlockSpec((1, 1), wmap2),                      # fc bias
        ],
        out_specs=pl.BlockSpec((bt, 1), lambda i: (i, 0)),
        scratch_shapes=[
            pltpu.VMEM((16 * bt, 32), jnp.bfloat16),          # xe (even rows)
            pltpu.VMEM((17 * bt, 32), jnp.bfloat16),          # xo (pad + odd)
            pltpu.VMEM((8 * bt, 256), jnp.bfloat16),          # e1
            pltpu.VMEM((9 * bt, 256), jnp.bfloat16),          # o1
            pltpu.VMEM((4 * bt, 256), jnp.bfloat16),          # e2
            pltpu.VMEM((5 * bt, 256), jnp.bfloat16),          # o2
            pltpu.VMEM((2 * bt, 256), jnp.bfloat16),          # e3
            pltpu.VMEM((3 * bt, 256), jnp.bfloat16),          # o3
            pltpu.VMEM((2 * bt, 256), jnp.bfloat16),          # conv4 output
        ],
        compiler_params=pltpu.CompilerParams(
            dimension_semantics=("parallel",)),
    )(xin, prep["m1"], prep["b1"], prep["m2"], prep["b2"],
      prep["m3"], prep["b3"], prep["m4"], prep["b4"],
      prep["fcw"], prep["fcb"])


# -----------------------------------------------------------------------------
# Parameters (PyTorch layout) and pure-JAX reference for self-check.
# -----------------------------------------------------------------------------
def init_params(key):
    params = {"conv": []}
    for (cin, cout) in _CHANS:
        key, kw, kb = jax.random.split(key, 3)
        bound = 1.0 / float(np.sqrt(cin * 9))
        w = jax.random.uniform(kw, (cout, cin, 3, 3), jnp.float32, -bound, bound)
        b = jax.random.uniform(kb, (cout,), jnp.float32, -bound, bound)
        params["conv"].append((w, b))
    key, kw, kb = jax.random.split(key, 3)
    bound = 1.0 / float(np.sqrt(512.0))
    params["fc_w"] = jax.random.uniform(kw, (1, 512), jnp.float32, -bound, bound)
    params["fc_b"] = jax.random.uniform(kb, (1,), jnp.float32, -bound, bound)
    return params


def _reference_forward(params, x):
    out = x
    for (w, b) in params["conv"]:
        out = jax.lax.conv_general_dilated(
            out, w, window_strides=(2, 2), padding=((1, 1), (1, 1)),
            dimension_numbers=("NCHW", "OIHW", "NCHW"))
        out = out + b.reshape(1, -1, 1, 1)
        out = jnp.where(out >= 0, out, 0.2 * out)
    flat = out.reshape(out.shape[0], -1)
    return flat @ params["fc_w"].T + params["fc_b"]


if __name__ == "__main__":
    key = jax.random.PRNGKey(0)
    key, kparam, kx = jax.random.split(key, 3)
    params = init_params(kparam)
    prep = prepare_params(params)          # pack weights once, outside forward

    batch = 32                             # small test batch (production: 512)
    x = jax.random.normal(kx, (batch, 1, 32, 32), jnp.float32)

    # block_batch=16 -> grid=(2,), exercising the parallel batch-tiled path.
    y = discriminator_forward(prep, x, block_batch=16)
    y = jax.block_until_ready(y)
    assert y.shape == (batch, 1), y.shape

    y_ref = _reference_forward(params, x)
    err = float(jnp.max(jnp.abs(y - y_ref)))
    assert err < 5e-2, f"mismatch vs reference: max abs err = {err}"
    print("KERNEL_OK")
</pallas_src>

<mosaic_0001>
module attributes {stable_mosaic.version = 11 : i64} {
  func.func @kernel(%arg0: i32, %arg1: memref<32x16x32xbf16, #tpu.memory_space<vmem>>, %arg2: memref<3x32x256xbf16, #tpu.memory_space<vmem>>, %arg3: memref<1x256xf32, #tpu.memory_space<vmem>>, %arg4: memref<3x256x256xbf16, #tpu.memory_space<vmem>>, %arg5: memref<1x256xf32, #tpu.memory_space<vmem>>, %arg6: memref<3x256x256xbf16, #tpu.memory_space<vmem>>, %arg7: memref<1x256xf32, #tpu.memory_space<vmem>>, %arg8: memref<3x256x256xbf16, #tpu.memory_space<vmem>>, %arg9: memref<1x256xf32, #tpu.memory_space<vmem>>, %arg10: memref<2x256xf32, #tpu.memory_space<vmem>>, %arg11: memref<1x1xf32, #tpu.memory_space<vmem>>, %arg12: memref<16x1xf32, #tpu.memory_space<vmem>>, %arg13: memref<256x32xbf16, #tpu.memory_space<vmem>>, %arg14: memref<272x32xbf16, #tpu.memory_space<vmem>>, %arg15: memref<128x256xbf16, #tpu.memory_space<vmem>>, %arg16: memref<144x256xbf16, #tpu.memory_space<vmem>>, %arg17: memref<64x256xbf16, #tpu.memory_space<vmem>>, %arg18: memref<80x256xbf16, #tpu.memory_space<vmem>>, %arg19: memref<32x256xbf16, #tpu.memory_space<vmem>>, %arg20: memref<48x256xbf16, #tpu.memory_space<vmem>>, %arg21: memref<32x256xbf16, #tpu.memory_space<vmem>>) attributes {dimension_semantics = [#tpu.dimension_semantics<parallel>], iteration_bounds = array<i64: 2>, scalar_prefetch = 0 : i64, scratch_operands = 9 : i64, tpu.core_type = #tpu.core_type<tc>, window_params = [{transform_indices = @transform_0, window_bounds = array<i64: 32, 16, 32>}, {pipeline_mode = #tpu.pipeline_mode<synchronous>, transform_indices = @transform_1, window_bounds = array<i64: 3, 32, 256>}, {pipeline_mode = #tpu.pipeline_mode<synchronous>, transform_indices = @transform_2, window_bounds = array<i64: 1, 256>}, {pipeline_mode = #tpu.pipeline_mode<synchronous>, transform_indices = @transform_3, window_bounds = array<i64: 3, 256, 256>}, {pipeline_mode = #tpu.pipeline_mode<synchronous>, transform_indices = @transform_4, window_bounds = array<i64: 1, 256>}, {pipeline_mode = #tpu.pipeline_mode<synchronous>, transform_indices = @transform_5, window_bounds = array<i64: 3, 256, 256>}, {pipeline_mode = #tpu.pipeline_mode<synchronous>, transform_indices = @transform_6, window_bounds = array<i64: 1, 256>}, {pipeline_mode = #tpu.pipeline_mode<synchronous>, transform_indices = @transform_7, window_bounds = array<i64: 3, 256, 256>}, {pipeline_mode = #tpu.pipeline_mode<synchronous>, transform_indices = @transform_8, window_bounds = array<i64: 1, 256>}, {pipeline_mode = #tpu.pipeline_mode<synchronous>, transform_indices = @transform_9, window_bounds = array<i64: 2, 256>}, {pipeline_mode = #tpu.pipeline_mode<synchronous>, transform_indices = @transform_10, window_bounds = array<i64: 1, 1>}, {transform_indices = @transform_11, window_bounds = array<i64: 16, 1>}]} {
    %cst = arith.constant 0.000000e+00 : bf16
    %0 = vector.broadcast %cst : bf16 to vector<16x32xbf16>
    %c0 = arith.constant 0 : index
    %c0_0 = arith.constant 0 : index
    %1 = vector.load %arg14[%c0, %c0_0] : memref<272x32xbf16, #tpu.memory_space<vmem>>, vector<16x32xbf16>
    tpu.vector_store %arg14[%c0, %c0_0], %0 {strides = array<i32>} : memref<272x32xbf16, #tpu.memory_space<vmem>>, vector<16x32xbf16>,
    %c0_1 = arith.constant 0 : index
    %c0_2 = arith.constant 0 : index
    %c0_3 = arith.constant 0 : index
    %2 = vector.load %arg1[%c0_1, %c0_2, %c0_3] : memref<32x16x32xbf16, #tpu.memory_space<vmem>>, vector<1x16x32xbf16>
    %3 = vector.shape_cast %2 : vector<1x16x32xbf16> to vector<16x32xbf16>
    %c0_4 = arith.constant 0 : index
    %c0_5 = arith.constant 0 : index
    %4 = vector.load %arg13[%c0_4, %c0_5] : memref<256x32xbf16, #tpu.memory_space<vmem>>, vector<16x32xbf16>
    tpu.vector_store %arg13[%c0_4, %c0_5], %3 {strides = array<i32>} : memref<256x32xbf16, #tpu.memory_space<vmem>>, vector<16x32xbf16>,
    %c1 = arith.constant 1 : index
    %c0_6 = arith.constant 0 : index
    %c0_7 = arith.constant 0 : index
    %5 = vector.load %arg1[%c1, %c0_6, %c0_7] : memref<32x16x32xbf16, #tpu.memory_space<vmem>>, vector<1x16x32xbf16>
    %6 = vector.shape_cast %5 : vector<1x16x32xbf16> to vector<16x32xbf16>
    %c16 = arith.constant 16 : index
    %c0_8 = arith.constant 0 : index
    %7 = vector.load %arg14[%c16, %c0_8] : memref<272x32xbf16, #tpu.memory_space<vmem>>, vector<16x32xbf16>
    tpu.vector_store %arg14[%c16, %c0_8], %6 {strides = array<i32>} : memref<272x32xbf16, #tpu.memory_space<vmem>>, vector<16x32xbf16>,
    %c2 = arith.constant 2 : index
    %c0_9 = arith.constant 0 : index
    %c0_10 = arith.constant 0 : index
    %8 = vector.load %arg1[%c2, %c0_9, %c0_10] : memref<32x16x32xbf16, #tpu.memory_space<vmem>>, vector<1x16x32xbf16>
    %9 = vector.shape_cast %8 : vector<1x16x32xbf16> to vector<16x32xbf16>
    %c16_11 = arith.constant 16 : index
    %c0_12 = arith.constant 0 : index
    %10 = vector.load %arg13[%c16_11, %c0_12] : memref<256x32xbf16, #tpu.memory_space<vmem>>, vector<16x32xbf16>
    tpu.vector_store %arg13[%c16_11, %c0_12], %9 {strides = array<i32>} : memref<256x32xbf16, #tpu.memory_space<vmem>>, vector<16x32xbf16>,
    %c3 = arith.constant 3 : index
    %c0_13 = arith.constant 0 : index
    %c0_14 = arith.constant 0 : index
    %11 = vector.load %arg1[%c3, %c0_13, %c0_14] : memref<32x16x32xbf16, #tpu.memory_space<vmem>>, vector<1x16x32xbf16>
    %12 = vector.shape_cast %11 : vector<1x16x32xbf16> to vector<16x32xbf16>
    %c32 = arith.constant 32 : index
    %c0_15 = arith.constant 0 : index
    %13 = vector.load %arg14[%c32, %c0_15] : memref<272x32xbf16, #tpu.memory_space<vmem>>, vector<16x32xbf16>
    tpu.vector_store %arg14[%c32, %c0_15], %12 {strides = array<i32>} : memref<272x32xbf16, #tpu.memory_space<vmem>>, vector<16x32xbf16>,
    %c4 = arith.constant 4 : index
    %c0_16 = arith.constant 0 : index
    %c0_17 = arith.constant 0 : index
    %14 = vector.load %arg1[%c4, %c0_16, %c0_17] : memref<32x16x32xbf16, #tpu.memory_space<vmem>>, vector<1x16x32xbf16>
    %15 = vector.shape_cast %14 : vector<1x16x32xbf16> to vector<16x32xbf16>
    %c32_18 = arith.constant 32 : index
    %c0_19 = arith.constant 0 : index
    %16 = vector.load %arg13[%c32_18, %c0_19] : memref<256x32xbf16, #tpu.memory_space<vmem>>, vector<16x32xbf16>
    tpu.vector_store %arg13[%c32_18, %c0_19], %15 {strides = array<i32>} : memref<256x32xbf16, #tpu.memory_space<vmem>>, vector<16x32xbf16>,
    %c5 = arith.constant 5 : index
    %c0_20 = arith.constant 0 : index
    %c0_21 = arith.constant 0 : index
    %17 = vector.load %arg1[%c5, %c0_20, %c0_21] : memref<32x16x32xbf16, #tpu.memory_space<vmem>>, vector<1x16x32xbf16>
    %18 = vector.shape_cast %17 : vector<1x16x32xbf16> to vector<16x32xbf16>
    %c48 = arith.constant 48 : index
    %c0_22 = arith.constant 0 : index
    %19 = vector.load %arg14[%c48, %c0_22] : memref<272x32xbf16, #tpu.memory_space<vmem>>, vector<16x32xbf16>
    tpu.vector_store %arg14[%c48, %c0_22], %18 {strides = array<i32>} : memref<272x32xbf16, #tpu.memory_space<vmem>>, vector<16x32xbf16>,
    %c6 = arith.constant 6 : index
    %c0_23 = arith.constant 0 : index
    %c0_24 = arith.constant 0 : index
    %20 = vector.load %arg1[%c6, %c0_23, %c0_24] : memref<32x16x32xbf16, #tpu.memory_space<vmem>>, vector<1x16x32xbf16>
    %21 = vector.shape_cast %20 : vector<1x16x32xbf16> to vector<16x32xbf16>
    %c48_25 = arith.constant 48 : index
    %c0_26 = arith.constant 0 : index
    %22 = vector.load %arg13[%c48_25, %c0_26] : memref<256x32xbf16, #tpu.memory_space<vmem>>, vector<16x32xbf16>
    tpu.vector_store %arg13[%c48_25, %c0_26], %21 {strides = array<i32>} : memref<256x32xbf16, #tpu.memory_space<vmem>>, vector<16x32xbf16>,
    %c7 = arith.constant 7 : index
    %c0_27 = arith.constant 0 : index
    %c0_28 = arith.constant 0 : index
    %23 = vector.load %arg1[%c7, %c0_27, %c0_28] : memref<32x16x32xbf16, #tpu.memory_space<vmem>>, vector<1x16x32xbf16>
    %24 = vector.shape_cast %23 : vector<1x16x32xbf16> to vector<16x32xbf16>
    %c64 = arith.constant 64 : index
    %c0_29 = arith.constant 0 : index
    %25 = vector.load %arg14[%c64, %c0_29] : memref<272x32xbf16, #tpu.memory_space<vmem>>, vector<16x32xbf16>
    tpu.vector_store %arg14[%c64, %c0_29], %24 {strides = array<i32>} : memref<272x32xbf16, #tpu.memory_space<vmem>>, vector<16x32xbf16>,
    %c8 = arith.constant 8 : index
    %c0_30 = arith.constant 0 : index
    %c0_31 = arith.constant 0 : index
    %26 = vector.load %arg1[%c8, %c0_30, %c0_31] : memref<32x16x32xbf16, #tpu.memory_space<vmem>>, vector<1x16x32xbf16>
    %27 = vector.shape_cast %26 : vector<1x16x32xbf16> to vector<16x32xbf16>
    %c64_32 = arith.constant 64 : index
    %c0_33 = arith.constant 0 : index
    %28 = vector.load %arg13[%c64_32, %c0_33] : memref<256x32xbf16, #tpu.memory_space<vmem>>, vector<16x32xbf16>
    tpu.vector_store %arg13[%c64_32, %c0_33], %27 {strides = array<i32>} : memref<256x32xbf16, #tpu.memory_space<vmem>>, vector<16x32xbf16>,
    %c9 = arith.constant 9 : index
    %c0_34 = arith.constant 0 : index
    %c0_35 = arith.constant 0 : index
    %29 = vector.load %arg1[%c9, %c0_34, %c0_35] : memref<32x16x32xbf16, #tpu.memory_space<vmem>>, vector<1x16x32xbf16>
    %30 = vector.shape_cast %29 : vector<1x16x32xbf16> to vector<16x32xbf16>
    %c80 = arith.constant 80 : index
    %c0_36 = arith.constant 0 : index
    %31 = vector.load %arg14[%c80, %c0_36] : memref<272x32xbf16, #tpu.memory_space<vmem>>, vector<16x32xbf16>
    tpu.vector_store %arg14[%c80, %c0_36], %30 {strides = array<i32>} : memref<272x32xbf16, #tpu.memory_space<vmem>>, vector<16x32xbf16>,
    %c10 = arith.constant 10 : index
    %c0_37 = arith.constant 0 : index
    %c0_38 = arith.constant 0 : index
    %32 = vector.load %arg1[%c10, %c0_37, %c0_38] : memref<32x16x32xbf16, #tpu.memory_space<vmem>>, vector<1x16x32xbf16>
    %33 = vector.shape_cast %32 : vector<1x16x32xbf16> to vector<16x32xbf16>
    %c80_39 = arith.constant 80 : index
    %c0_40 = arith.constant 0 : index
    %34 = vector.load %arg13[%c80_39, %c0_40] : memref<256x32xbf16, #tpu.memory_space<vmem>>, vector<16x32xbf16>
    tpu.vector_store %arg13[%c80_39, %c0_40], %33 {strides = array<i32>} : memref<256x32xbf16, #tpu.memory_space<vmem>>, vector<16x32xbf16>,
    %c11 = arith.constant 11 : index
    %c0_41 = arith.constant 0 : index
    %c0_42 = arith.constant 0 : index
    %35 = vector.load %arg1[%c11, %c0_41, %c0_42] : memref<32x16x32xbf16, #tpu.memory_space<vmem>>, vector<1x16x32xbf16>
    %36 = vector.shape_cast %35 : vector<1x16x32xbf16> to vector<16x32xbf16>
    %c96 = arith.constant 96 : index
    %c0_43 = arith.constant 0 : index
    %37 = vector.load %arg14[%c96, %c0_43] : memref<272x32xbf16, #tpu.memory_space<vmem>>, vector<16x32xbf16>
    tpu.vector_store %arg14[%c96, %c0_43], %36 {strides = array<i32>} : memref<272x32xbf16, #tpu.memory_space<vmem>>, vector<16x32xbf16>,
    %c12 = arith.constant 12 : index
    %c0_44 = arith.constant 0 : index
    %c0_45 = arith.constant 0 : index
    %38 = vector.load %arg1[%c12, %c0_44, %c0_45] : memref<32x16x32xbf16, #tpu.memory_space<vmem>>, vector<1x16x32xbf16>
    %39 = vector.shape_cast %38 : vector<1x16x32xbf16> to vector<16x32xbf16>
    %c96_46 = arith.constant 96 : index
    %c0_47 = arith.constant 0 : index
    %40 = vector.load %arg13[%c96_46, %c0_47] : memref<256x32xbf16, #tpu.memory_space<vmem>>, vector<16x32xbf16>
    tpu.vector_store %arg13[%c96_46, %c0_47], %39 {strides = array<i32>} : memref<256x32xbf16, #tpu.memory_space<vmem>>, vector<16x32xbf16>,
    %c13 = arith.constant 13 : index
    %c0_48 = arith.constant 0 : index
    %c0_49 = arith.constant 0 : index
    %41 = vector.load %arg1[%c13, %c0_48, %c0_49] : memref<32x16x32xbf16, #tpu.memory_space<vmem>>, vector<1x16x32xbf16>
    %42 = vector.shape_cast %41 : vector<1x16x32xbf16> to vector<16x32xbf16>
    %c112 = arith.constant 112 : index
    %c0_50 = arith.constant 0 : index
    %43 = vector.load %arg14[%c112, %c0_50] : memref<272x32xbf16, #tpu.memory_space<vmem>>, vector<16x32xbf16>
    tpu.vector_store %arg14[%c112, %c0_50], %42 {strides = array<i32>} : memref<272x32xbf16, #tpu.memory_space<vmem>>, vector<16x32xbf16>,
    %c14 = arith.constant 14 : index
    %c0_51 = arith.constant 0 : index
    %c0_52 = arith.constant 0 : index
    %44 = vector.load %arg1[%c14, %c0_51, %c0_52] : memref<32x16x32xbf16, #tpu.memory_space<vmem>>, vector<1x16x32xbf16>
    %45 = vector.shape_cast %44 : vector<1x16x32xbf16> to vector<16x32xbf16>
    %c112_53 = arith.constant 112 : index
    %c0_54 = arith.constant 0 : index
    %46 = vector.load %arg13[%c112_53, %c0_54] : memref<256x32xbf16, #tpu.memory_space<vmem>>, vector<16x32xbf16>
    tpu.vector_store %arg13[%c112_53, %c0_54], %45 {strides = array<i32>} : memref<256x32xbf16, #tpu.memory_space<vmem>>, vector<16x32xbf16>,
    %c15 = arith.constant 15 : index
    %c0_55 = arith.constant 0 : index
    %c0_56 = arith.constant 0 : index
    %47 = vector.load %arg1[%c15, %c0_55, %c0_56] : memref<32x16x32xbf16, #tpu.memory_space<vmem>>, vector<1x16x32xbf16>
    %48 = vector.shape_cast %47 : vector<1x16x32xbf16> to vector<16x32xbf16>
    %c128 = arith.constant 128 : index
    %c0_57 = arith.constant 0 : index
    %49 = vector.load %arg14[%c128, %c0_57] : memref<272x32xbf16, #tpu.memory_space<vmem>>, vector<16x32xbf16>
    tpu.vector_store %arg14[%c128, %c0_57], %48 {strides = array<i32>} : memref<272x32xbf16, #tpu.memory_space<vmem>>, vector<16x32xbf16>,
    %c16_58 = arith.constant 16 : index
    %c0_59 = arith.constant 0 : index
    %c0_60 = arith.constant 0 : index
    %50 = vector.load %arg1[%c16_58, %c0_59, %c0_60] : memref<32x16x32xbf16, #tpu.memory_space<vmem>>, vector<1x16x32xbf16>
    %51 = vector.shape_cast %50 : vector<1x16x32xbf16> to vector<16x32xbf16>
    %c128_61 = arith.constant 128 : index
    %c0_62 = arith.constant 0 : index
    %52 = vector.load %arg13[%c128_61, %c0_62] : memref<256x32xbf16, #tpu.memory_space<vmem>>, vector<16x32xbf16>
    tpu.vector_store %arg13[%c128_61, %c0_62], %51 {strides = array<i32>} : memref<256x32xbf16, #tpu.memory_space<vmem>>, vector<16x32xbf16>,
    %c17 = arith.constant 17 : index
    %c0_63 = arith.constant 0 : index
    %c0_64 = arith.constant 0 : index
    %53 = vector.load %arg1[%c17, %c0_63, %c0_64] : memref<32x16x32xbf16, #tpu.memory_space<vmem>>, vector<1x16x32xbf16>
    %54 = vector.shape_cast %53 : vector<1x16x32xbf16> to vector<16x32xbf16>
    %c144 = arith.constant 144 : index
    %c0_65 = arith.constant 0 : index
    %55 = vector.load %arg14[%c144, %c0_65] : memref<272x32xbf16, #tpu.memory_space<vmem>>, vector<16x32xbf16>
    tpu.vector_store %arg14[%c144, %c0_65], %54 {strides = array<i32>} : memref<272x32xbf16, #tpu.memory_space<vmem>>, vector<16x32xbf16>,
    %c18 = arith.constant 18 : index
    %c0_66 = arith.constant 0 : index
    %c0_67 = arith.constant 0 : index
    %56 = vector.load %arg1[%c18, %c0_66, %c0_67] : memref<32x16x32xbf16, #tpu.memory_space<vmem>>, vector<1x16x32xbf16>
    %57 = vector.shape_cast %56 : vector<1x16x32xbf16> to vector<16x32xbf16>
    %c144_68 = arith.constant 144 : index
    %c0_69 = arith.constant 0 : index
    %58 = vector.load %arg13[%c144_68, %c0_69] : memref<256x32xbf16, #tpu.memory_space<vmem>>, vector<16x32xbf16>
    tpu.vector_store %arg13[%c144_68, %c0_69], %57 {strides = array<i32>} : memref<256x32xbf16, #tpu.memory_space<vmem>>, vector<16x32xbf16>,
    %c19 = arith.constant 19 : index
    %c0_70 = arith.constant 0 : index
    %c0_71 = arith.constant 0 : index
    %59 = vector.load %arg1[%c19, %c0_70, %c0_71] : memref<32x16x32xbf16, #tpu.memory_space<vmem>>, vector<1x16x32xbf16>
    %60 = vector.shape_cast %59 : vector<1x16x32xbf16> to vector<16x32xbf16>
    %c160 = arith.constant 160 : index
    %c0_72 = arith.constant 0 : index
    %61 = vector.load %arg14[%c160, %c0_72] : memref<272x32xbf16, #tpu.memory_space<vmem>>, vector<16x32xbf16>
    tpu.vector_store %arg14[%c160, %c0_72], %60 {strides = array<i32>} : memref<272x32xbf16, #tpu.memory_space<vmem>>, vector<16x32xbf16>,
    %c20 = arith.constant 20 : index
    %c0_73 = arith.constant 0 : index
    %c0_74 = arith.constant 0 : index
    %62 = vector.load %arg1[%c20, %c0_73, %c0_74] : memref<32x16x32xbf16, #tpu.memory_space<vmem>>, vector<1x16x32xbf16>
    %63 = vector.shape_cast %62 : vector<1x16x32xbf16> to vector<16x32xbf16>
    %c160_75 = arith.constant 160 : index
    %c0_76 = arith.constant 0 : index
    %64 = vector.load %arg13[%c160_75, %c0_76] : memref<256x32xbf16, #tpu.memory_space<vmem>>, vector<16x32xbf16>
    tpu.vector_store %arg13[%c160_75, %c0_76], %63 {strides = array<i32>} : memref<256x32xbf16, #tpu.memory_space<vmem>>, vector<16x32xbf16>,
    %c21 = arith.constant 21 : index
    %c0_77 = arith.constant 0 : index
    %c0_78 = arith.constant 0 : index
    %65 = vector.load %arg1[%c21, %c0_77, %c0_78] : memref<32x16x32xbf16, #tpu.memory_space<vmem>>, vector<1x16x32xbf16>
    %66 = vector.shape_cast %65 : vector<1x16x32xbf16> to vector<16x32xbf16>
    %c176 = arith.constant 176 : index
    %c0_79 = arith.constant 0 : index
    %67 = vector.load %arg14[%c176, %c0_79] : memref<272x32xbf16, #tpu.memory_space<vmem>>, vector<16x32xbf16>
    tpu.vector_store %arg14[%c176, %c0_79], %66 {strides = array<i32>} : memref<272x32xbf16, #tpu.memory_space<vmem>>, vector<16x32xbf16>,
    %c22 = arith.constant 22 : index
    %c0_80 = arith.constant 0 : index
    %c0_81 = arith.constant 0 : index
    %68 = vector.load %arg1[%c22, %c0_80, %c0_81] : memref<32x16x32xbf16, #tpu.memory_space<vmem>>, vector<1x16x32xbf16>
    %69 = vector.shape_cast %68 : vector<1x16x32xbf16> to vector<16x32xbf16>
    %c176_82 = arith.constant 176 : index
    %c0_83 = arith.constant 0 : index
    %70 = vector.load %arg13[%c176_82, %c0_83] : memref<256x32xbf16, #tpu.memory_space<vmem>>, vector<16x32xbf16>
    tpu.vector_store %arg13[%c176_82, %c0_83], %69 {strides = array<i32>} : memref<256x32xbf16, #tpu.memory_space<vmem>>, vector<16x32xbf16>,
    %c23 = arith.constant 23 : index
    %c0_84 = arith.constant 0 : index
    %c0_85 = arith.constant 0 : index
    %71 = vector.load %arg1[%c23, %c0_84, %c0_85] : memref<32x16x32xbf16, #tpu.memory_space<vmem>>, vector<1x16x32xbf16>
    %72 = vector.shape_cast %71 : vector<1x16x32xbf16> to vector<16x32xbf16>
    %c192 = arith.constant 192 : index
    %c0_86 = arith.constant 0 : index
    %73 = vector.load %arg14[%c192, %c0_86] : memref<272x32xbf16, #tpu.memory_space<vmem>>, vector<16x32xbf16>
    tpu.vector_store %arg14[%c192, %c0_86], %72 {strides = array<i32>} : memref<272x32xbf16, #tpu.memory_space<vmem>>, vector<16x32xbf16>,
    %c24 = arith.constant 24 : index
    %c0_87 = arith.constant 0 : index
    %c0_88 = arith.constant 0 : index
    %74 = vector.load %arg1[%c24, %c0_87, %c0_88] : memref<32x16x32xbf16, #tpu.memory_space<vmem>>, vector<1x16x32xbf16>
    %75 = vector.shape_cast %74 : vector<1x16x32xbf16> to vector<16x32xbf16>
    %c192_89 = arith.constant 192 : index
    %c0_90 = arith.constant 0 : index
    %76 = vector.load %arg13[%c192_89, %c0_90] : memref<256x32xbf16, #tpu.memory_space<vmem>>, vector<16x32xbf16>
    tpu.vector_store %arg13[%c192_89, %c0_90], %75 {strides = array<i32>} : memref<256x32xbf16, #tpu.memory_space<vmem>>, vector<16x32xbf16>,
    %c25 = arith.constant 25 : index
    %c0_91 = arith.constant 0 : index
    %c0_92 = arith.constant 0 : index
    %77 = vector.load %arg1[%c25, %c0_91, %c0_92] : memref<32x16x32xbf16, #tpu.memory_space<vmem>>, vector<1x16x32xbf16>
    %78 = vector.shape_cast %77 : vector<1x16x32xbf16> to vector<16x32xbf16>
    %c208 = arith.constant 208 : index
    %c0_93 = arith.constant 0 : index
    %79 = vector.load %arg14[%c208, %c0_93] : memref<272x32xbf16, #tpu.memory_space<vmem>>, vector<16x32xbf16>
    tpu.vector_store %arg14[%c208, %c0_93], %78 {strides = array<i32>} : memref<272x32xbf16, #tpu.memory_space<vmem>>, vector<16x32xbf16>,
    %c26 = arith.constant 26 : index
    %c0_94 = arith.constant 0 : index
    %c0_95 = arith.constant 0 : index
    %80 = vector.load %arg1[%c26, %c0_94, %c0_95] : memref<32x16x32xbf16, #tpu.memory_space<vmem>>, vector<1x16x32xbf16>
    %81 = vector.shape_cast %80 : vector<1x16x32xbf16> to vector<16x32xbf16>
    %c208_96 = arith.constant 208 : index
    %c0_97 = arith.constant 0 : index
    %82 = vector.load %arg13[%c208_96, %c0_97] : memref<256x32xbf16, #tpu.memory_space<vmem>>, vector<16x32xbf16>
    tpu.vector_store %arg13[%c208_96, %c0_97], %81 {strides = array<i32>} : memref<256x32xbf16, #tpu.memory_space<vmem>>, vector<16x32xbf16>,
    %c27 = arith.constant 27 : index
    %c0_98 = arith.constant 0 : index
    %c0_99 = arith.constant 0 : index
    %83 = vector.load %arg1[%c27, %c0_98, %c0_99] : memref<32x16x32xbf16, #tpu.memory_space<vmem>>, vector<1x16x32xbf16>
    %84 = vector.shape_cast %83 : vector<1x16x32xbf16> to vector<16x32xbf16>
    %c224 = arith.constant 224 : index
    %c0_100 = arith.constant 0 : index
    %85 = vector.load %arg14[%c224, %c0_100] : memref<272x32xbf16, #tpu.memory_space<vmem>>, vector<16x32xbf16>
    tpu.vector_store %arg14[%c224, %c0_100], %84 {strides = array<i32>} : memref<272x32xbf16, #tpu.memory_space<vmem>>, vector<16x32xbf16>,
    %c28 = arith.constant 28 : index
    %c0_101 = arith.constant 0 : index
    %c0_102 = arith.constant 0 : index
    %86 = vector.load %arg1[%c28, %c0_101, %c0_102] : memref<32x16x32xbf16, #tpu.memory_space<vmem>>, vector<1x16x32xbf16>
    %87 = vector.shape_cast %86 : vector<1x16x32xbf16> to vector<16x32xbf16>
    %c224_103 = arith.constant 224 : index
    %c0_104 = arith.constant 0 : index
    %88 = vector.load %arg13[%c224_103, %c0_104] : memref<256x32xbf16, #tpu.memory_space<vmem>>, vector<16x32xbf16>
    tpu.vector_store %arg13[%c224_103, %c0_104], %87 {strides = array<i32>} : memref<256x32xbf16, #tpu.memory_space<vmem>>, vector<16x32xbf16>,
    %c29 = arith.constant 29 : index
    %c0_105 = arith.constant 0 : index
    %c0_106 = arith.constant 0 : index
    %89 = vector.load %arg1[%c29, %c0_105, %c0_106] : memref<32x16x32xbf16, #tpu.memory_space<vmem>>, vector<1x16x32xbf16>
    %90 = vector.shape_cast %89 : vector<1x16x32xbf16> to vector<16x32xbf16>
    %c240 = arith.constant 240 : index
    %c0_107 = arith.constant 0 : index
    %91 = vector.load %arg14[%c240, %c0_107] : memref<272x32xbf16, #tpu.memory_space<vmem>>, vector<16x32xbf16>
    tpu.vector_store %arg14[%c240, %c0_107], %90 {strides = array<i32>} : memref<272x32xbf16, #tpu.memory_space<vmem>>, vector<16x32xbf16>,
    %c30 = arith.constant 30 : index
    %c0_108 = arith.constant 0 : index
    %c0_109 = arith.constant 0 : index
    %92 = vector.load %arg1[%c30, %c0_108, %c0_109] : memref<32x16x32xbf16, #tpu.memory_space<vmem>>, vector<1x16x32xbf16>
    %93 = vector.shape_cast %92 : vector<1x16x32xbf16> to vector<16x32xbf16>
    %c240_110 = arith.constant 240 : index
    %c0_111 = arith.constant 0 : index
    %94 = vector.load %arg13[%c240_110, %c0_111] : memref<256x32xbf16, #tpu.memory_space<vmem>>, vector<16x32xbf16>
    tpu.vector_store %arg13[%c240_110, %c0_111], %93 {strides = array<i32>} : memref<256x32xbf16, #tpu.memory_space<vmem>>, vector<16x32xbf16>,
    %c31 = arith.constant 31 : index
    %c0_112 = arith.constant 0 : index
    %c0_113 = arith.constant 0 : index
    %95 = vector.load %arg1[%c31, %c0_112, %c0_113] : memref<32x16x32xbf16, #tpu.memory_space<vmem>>, vector<1x16x32xbf16>
    %96 = vector.shape_cast %95 : vector<1x16x32xbf16> to vector<16x32xbf16>
    %c256 = arith.constant 256 : index
    %c0_114 = arith.constant 0 : index
    %97 = vector.load %arg14[%c256, %c0_114] : memref<272x32xbf16, #tpu.memory_space<vmem>>, vector<16x32xbf16>
    tpu.vector_store %arg14[%c256, %c0_114], %96 {strides = array<i32>} : memref<272x32xbf16, #tpu.memory_space<vmem>>, vector<16x32xbf16>,
    %c0_115 = arith.constant 0 : index
    %c0_116 = arith.constant 0 : index
    %98 = vector.load %arg14[%c0_115, %c0_116] : memref<272x32xbf16, #tpu.memory_space<vmem>>, vector<256x32xbf16>
    %c0_117 = arith.constant 0 : index
    %c0_118 = arith.constant 0 : index
    %99 = vector.load %arg13[%c0_117, %c0_118] : memref<256x32xbf16, #tpu.memory_space<vmem>>, vector<256x32xbf16>
    %c16_119 = arith.constant 16 : index
    %c0_120 = arith.constant 0 : index
    %100 = vector.load %arg14[%c16_119, %c0_120] : memref<272x32xbf16, #tpu.memory_space<vmem>>, vector<256x32xbf16>
    %c1_121 = arith.constant 1 : index
    %c0_122 = arith.constant 0 : index
    %c0_123 = arith.constant 0 : index
    %101 = vector.load %arg2[%c1_121, %c0_122, %c0_123] : memref<3x32x256xbf16, #tpu.memory_space<vmem>>, vector<1x32x256xbf16>
    %102 = vector.shape_cast %101 : vector<1x32x256xbf16> to vector<32x256xbf16>
    %cst_124 = arith.constant dense<0.000000e+00> : vector<256x256xf32>
    %103 = tpu.matmul %99, %102, %cst_124 {dimension_numbers = #tpu.dot_dimension_numbers<[1], [0], [0], [1], [0, 0, 1, 1], [], []>} : vector<256x32xbf16>, vector<32x256xbf16>, vector<256x256xf32> -> vector<256x256xf32>
    %c0_125 = arith.constant 0 : index
    %c0_126 = arith.constant 0 : index
    %c0_127 = arith.constant 0 : index
    %104 = vector.load %arg2[%c0_125, %c0_126, %c0_127] : memref<3x32x256xbf16, #tpu.memory_space<vmem>>, vector<1x32x256xbf16>
    %105 = vector.shape_cast %104 : vector<1x32x256xbf16> to vector<32x256xbf16>
    %cst_128 = arith.constant dense<0.000000e+00> : vector<256x256xf32>
    %106 = tpu.matmul %98, %105, %cst_128 {dimension_numbers = #tpu.dot_dimension_numbers<[1], [0], [0], [1], [0, 0, 1, 1], [], []>} : vector<256x32xbf16>, vector<32x256xbf16>, vector<256x256xf32> -> vector<256x256xf32>
    %107 = arith.addf %103, %106 : vector<256x256xf32>
    %c2_129 = arith.constant 2 : index
    %c0_130 = arith.constant 0 : index
    %c0_131 = arith.constant 0 : index
    %108 = vector.load %arg2[%c2_129, %c0_130, %c0_131] : memref<3x32x256xbf16, #tpu.memory_space<vmem>>, vector<1x32x256xbf16>
    %109 = vector.shape_cast %108 : vector<1x32x256xbf16> to vector<32x256xbf16>
    %cst_132 = arith.constant dense<0.000000e+00> : vector<256x256xf32>
    %110 = tpu.matmul %100, %109, %cst_132 {dimension_numbers = #tpu.dot_dimension_numbers<[1], [0], [0], [1], [0, 0, 1, 1], [], []>} : vector<256x32xbf16>, vector<32x256xbf16>, vector<256x256xf32> -> vector<256x256xf32>
    %111 = arith.addf %107, %110 : vector<256x256xf32>
    %c0_133 = arith.constant 0 : index
    %c0_134 = arith.constant 0 : index
    %112 = vector.load %arg3[%c0_133, %c0_134] : memref<1x256xf32, #tpu.memory_space<vmem>>, vector<1x256xf32>
    %113 = vector.broadcast %112 : vector<1x256xf32> to vector<256x256xf32>
    %114 = arith.addf %111, %113 : vector<256x256xf32>
    %cst_135 = arith.constant 2.000000e-01 : f32
    %115 = vector.broadcast %cst_135 : f32 to vector<256x256xf32>
    %116 = arith.mulf %115, %114 : vector<256x256xf32>
    %117 = arith.maximumf %114, %116 : vector<256x256xf32>
    %118 = arith.truncf %117 : vector<256x256xf32> to vector<256x256xbf16>
    %cst_136 = arith.constant 0.000000e+00 : bf16
    %119 = vector.broadcast %cst_136 : bf16 to vector<16x256xbf16>
    %c0_137 = arith.constant 0 : index
    %c0_138 = arith.constant 0 : index
    %120 = vector.load %arg16[%c0_137, %c0_138] : memref<144x256xbf16, #tpu.memory_space<vmem>>, vector<16x256xbf16>
    tpu.vector_store %arg16[%c0_137, %c0_138], %119 {strides = array<i32>} : memref<144x256xbf16, #tpu.memory_space<vmem>>, vector<16x256xbf16>,
    %121 = vector.extract_strided_slice %118 {offsets = [0, 0], sizes = [16, 256], strides = [1, 1]} : vector<256x256xbf16> to vector<16x256xbf16>
    %c0_139 = arith.constant 0 : index
    %c0_140 = arith.constant 0 : index
    %122 = vector.load %arg15[%c0_139, %c0_140] : memref<128x256xbf16, #tpu.memory_space<vmem>>, vector<16x256xbf16>
    tpu.vector_store %arg15[%c0_139, %c0_140], %121 {strides = array<i32>} : memref<128x256xbf16, #tpu.memory_space<vmem>>, vector<16x256xbf16>,
    %123 = vector.extract_strided_slice %118 {offsets = [16, 0], sizes = [16, 256], strides = [1, 1]} : vector<256x256xbf16> to vector<16x256xbf16>
    %c16_141 = arith.constant 16 : index
    %c0_142 = arith.constant 0 : index
    %124 = vector.load %arg16[%c16_141, %c0_142] : memref<144x256xbf16, #tpu.memory_space<vmem>>, vector<16x256xbf16>
    tpu.vector_store %arg16[%c16_141, %c0_142], %123 {strides = array<i32>} : memref<144x256xbf16, #tpu.memory_space<vmem>>, vector<16x256xbf16>,
    %125 = vector.extract_strided_slice %118 {offsets = [32, 0], sizes = [16, 256], strides = [1, 1]} : vector<256x256xbf16> to vector<16x256xbf16>
    %c16_143 = arith.constant 16 : index
    %c0_144 = arith.constant 0 : index
    %126 = vector.load %arg15[%c16_143, %c0_144] : memref<128x256xbf16, #tpu.memory_space<vmem>>, vector<16x256xbf16>
    tpu.vector_store %arg15[%c16_143, %c0_144], %125 {strides = array<i32>} : memref<128x256xbf16, #tpu.memory_space<vmem>>, vector<16x256xbf16>,
    %127 = vector.extract_strided_slice %118 {offsets = [48, 0], sizes = [16, 256], strides = [1, 1]} : vector<256x256xbf16> to vector<16x256xbf16>
    %c32_145 = arith.constant 32 : index
    %c0_146 = arith.constant 0 : index
    %128 = vector.load %arg16[%c32_145, %c0_146] : memref<144x256xbf16, #tpu.memory_space<vmem>>, vector<16x256xbf16>
    tpu.vector_store %arg16[%c32_145, %c0_146], %127 {strides = array<i32>} : memref<144x256xbf16, #tpu.memory_space<vmem>>, vector<16x256xbf16>,
    %129 = vector.extract_strided_slice %118 {offsets = [64, 0], sizes = [16, 256], strides = [1, 1]} : vector<256x256xbf16> to vector<16x256xbf16>
    %c32_147 = arith.constant 32 : index
    %c0_148 = arith.constant 0 : index
    %130 = vector.load %arg15[%c32_147, %c0_148] : memref<128x256xbf16, #tpu.memory_space<vmem>>, vector<16x256xbf16>
    tpu.vector_store %arg15[%c32_147, %c0_148], %129 {strides = array<i32>} : memref<128x256xbf16, #tpu.memory_space<vmem>>, vector<16x256xbf16>,
    %131 = vector.extract_strided_slice %118 {offsets = [80, 0], sizes = [16, 256], strides = [1, 1]} : vector<256x256xbf16> to vector<16x256xbf16>
    %c48_149 = arith.constant 48 : index
    %c0_150 = arith.constant 0 : index
    %132 = vector.load %arg16[%c48_149, %c0_150] : memref<144x256xbf16, #tpu.memory_space<vmem>>, vector<16x256xbf16>
    tpu.vector_store %arg16[%c48_149, %c0_150], %131 {strides = array<i32>} : memref<144x256xbf16, #tpu.memory_space<vmem>>, vector<16x256xbf16>,
    %133 = vector.extract_strided_slice %118 {offsets = [96, 0], sizes = [16, 256], strides = [1, 1]} : vector<256x256xbf16> to vector<16x256xbf16>
    %c48_151 = arith.constant 48 : index
    %c0_152 = arith.constant 0 : index
    %134 = vector.load %arg15[%c48_151, %c0_152] : memref<128x256xbf16, #tpu.memory_space<vmem>>, vector<16x256xbf16>
    tpu.vector_store %arg15[%c48_151, %c0_152], %133 {strides = array<i32>} : memref<128x256xbf16, #tpu.memory_space<vmem>>, vector<16x256xbf16>,
    %135 = vector.extract_strided_slice %118 {offsets = [112, 0], sizes = [16, 256], strides = [1, 1]} : vector<256x256xbf16> to vector<16x256xbf16>
    %c64_153 = arith.constant 64 : index
    %c0_154 = arith.constant 0 : index
    %136 = vector.load %arg16[%c64_153, %c0_154] : memref<144x256xbf16, #tpu.memory_space<vmem>>, vector<16x256xbf16>
    tpu.vector_store %arg16[%c64_153, %c0_154], %135 {strides = array<i32>} : memref<144x256xbf16, #tpu.memory_space<vmem>>, vector<16x256xbf16>,
    %137 = vector.extract_strided_slice %118 {offsets = [128, 0], sizes = [16, 256], strides = [1, 1]} : vector<256x256xbf16> to vector<16x256xbf16>
    %c64_155 = arith.constant 64 : index
    %c0_156 = arith.constant 0 : index
    %138 = vector.load %arg15[%c64_155, %c0_156] : memref<128x256xbf16, #tpu.memory_space<vmem>>, vector<16x256xbf16>
    tpu.vector_store %arg15[%c64_155, %c0_156], %137 {strides = array<i32>} : memref<128x256xbf16, #tpu.memory_space<vmem>>, vector<16x256xbf16>,
    %139 = vector.extract_strided_slice %118 {offsets = [144, 0], sizes = [16, 256], strides = [1, 1]} : vector<256x256xbf16> to vector<16x256xbf16>
    %c80_157 = arith.constant 80 : index
    %c0_158 = arith.constant 0 : index
    %140 = vector.load %arg16[%c80_157, %c0_158] : memref<144x256xbf16, #tpu.memory_space<vmem>>, vector<16x256xbf16>
    tpu.vector_store %arg16[%c80_157, %c0_158], %139 {strides = array<i32>} : memref<144x256xbf16, #tpu.memory_space<vmem>>, vector<16x256xbf16>,
    %141 = vector.extract_strided_slice %118 {offsets = [160, 0], sizes = [16, 256], strides = [1, 1]} : vector<256x256xbf16> to vector<16x256xbf16>
    %c80_159 = arith.constant 80 : index
    %c0_160 = arith.constant 0 : index
    %142 = vector.load %arg15[%c80_159, %c0_160] : memref<128x256xbf16, #tpu.memory_space<vmem>>, vector<16x256xbf16>
    tpu.vector_store %arg15[%c80_159, %c0_160], %141 {strides = array<i32>} : memref<128x256xbf16, #tpu.memory_space<vmem>>, vector<16x256xbf16>,
    %143 = vector.extract_strided_slice %118 {offsets = [176, 0], sizes = [16, 256], strides = [1, 1]} : vector<256x256xbf16> to vector<16x256xbf16>
    %c96_161 = arith.constant 96 : index
    %c0_162 = arith.constant 0 : index
    %144 = vector.load %arg16[%c96_161, %c0_162] : memref<144x256xbf16, #tpu.memory_space<vmem>>, vector<16x256xbf16>
    tpu.vector_store %arg16[%c96_161, %c0_162], %143 {strides = array<i32>} : memref<144x256xbf16, #tpu.memory_space<vmem>>, vector<16x256xbf16>,
    %145 = vector.extract_strided_slice %118 {offsets = [192, 0], sizes = [16, 256], strides = [1, 1]} : vector<256x256xbf16> to vector<16x256xbf16>
    %c96_163 = arith.constant 96 : index
    %c0_164 = arith.constant 0 : index
    %146 = vector.load %arg15[%c96_163, %c0_164] : memref<128x256xbf16, #tpu.memory_space<vmem>>, vector<16x256xbf16>
    tpu.vector_store %arg15[%c96_163, %c0_164], %145 {strides = array<i32>} : memref<128x256xbf16, #tpu.memory_space<vmem>>, vector<16x256xbf16>,
    %147 = vector.extract_strided_slice %118 {offsets = [208, 0], sizes = [16, 256], strides = [1, 1]} : vector<256x256xbf16> to vector<16x256xbf16>
    %c112_165 = arith.constant 112 : index
    %c0_166 = arith.constant 0 : index
    %148 = vector.load %arg16[%c112_165, %c0_166] : memref<144x256xbf16, #tpu.memory_space<vmem>>, vector<16x256xbf16>
    tpu.vector_store %arg16[%c112_165, %c0_166], %147 {strides = array<i32>} : memref<144x256xbf16, #tpu.memory_space<vmem>>, vector<16x256xbf16>,
    %149 = vector.extract_strided_slice %118 {offsets = [224, 0], sizes = [16, 256], strides = [1, 1]} : vector<256x256xbf16> to vector<16x256xbf16>
    %c112_167 = arith.constant 112 : index
    %c0_168 = arith.constant 0 : index
    %150 = vector.load %arg15[%c112_167, %c0_168] : memref<128x256xbf16, #tpu.memory_space<vmem>>, vector<16x256xbf16>
    tpu.vector_store %arg15[%c112_167, %c0_168], %149 {strides = array<i32>} : memref<128x256xbf16, #tpu.memory_space<vmem>>, vector<16x256xbf16>,
    %151 = vector.extract_strided_slice %118 {offsets = [240, 0], sizes = [16, 256], strides = [1, 1]} : vector<256x256xbf16> to vector<16x256xbf16>
    %c128_169 = arith.constant 128 : index
    %c0_170 = arith.constant 0 : index
    %152 = vector.load %arg16[%c128_169, %c0_170] : memref<144x256xbf16, #tpu.memory_space<vmem>>, vector<16x256xbf16>
    tpu.vector_store %arg16[%c128_169, %c0_170], %151 {strides = array<i32>} : memref<144x256xbf16, #tpu.memory_space<vmem>>, vector<16x256xbf16>,
    %c0_171 = arith.constant 0 : index
    %c0_172 = arith.constant 0 : index
    %153 = vector.load %arg16[%c0_171, %c0_172] : memref<144x256xbf16, #tpu.memory_space<vmem>>, vector<128x256xbf16>
    %c0_173 = arith.constant 0 : index
    %c0_174 = arith.constant 0 : index
    %154 = vector.load %arg15[%c0_173, %c0_174] : memref<128x256xbf16, #tpu.memory_space<vmem>>, vector<128x256xbf16>
    %c16_175 = arith.constant 16 : index
    %c0_176 = arith.constant 0 : index
    %155 = vector.load %arg16[%c16_175, %c0_176] : memref<144x256xbf16, #tpu.memory_space<vmem>>, vector<128x256xbf16>
    %c1_177 = arith.constant 1 : index
    %c0_178 = arith.constant 0 : index
    %c0_179 = arith.constant 0 : index
    %156 = vector.load %arg4[%c1_177, %c0_178, %c0_179] : memref<3x256x256xbf16, #tpu.memory_space<vmem>>, vector<1x256x256xbf16>
    %157 = vector.shape_cast %156 : vector<1x256x256xbf16> to vector<256x256xbf16>
    %cst_180 = arith.constant dense<0.000000e+00> : vector<128x256xf32>
    %158 = tpu.matmul %154, %157, %cst_180 {dimension_numbers = #tpu.dot_dimension_numbers<[1], [0], [0], [1], [0, 0, 1, 1], [], []>} : vector<128x256xbf16>, vector<256x256xbf16>, vector<128x256xf32> -> vector<128x256xf32>
    %c0_181 = arith.constant 0 : index
    %c0_182 = arith.constant 0 : index
    %c0_183 = arith.constant 0 : index
    %159 = vector.load %arg4[%c0_181, %c0_182, %c0_183] : memref<3x256x256xbf16, #tpu.memory_space<vmem>>, vector<1x256x256xbf16>
    %160 = vector.shape_cast %159 : vector<1x256x256xbf16> to vector<256x256xbf16>
    %cst_184 = arith.constant dense<0.000000e+00> : vector<128x256xf32>
    %161 = tpu.matmul %153, %160, %cst_184 {dimension_numbers = #tpu.dot_dimension_numbers<[1], [0], [0], [1], [0, 0, 1, 1], [], []>} : vector<128x256xbf16>, vector<256x256xbf16>, vector<128x256xf32> -> vector<128x256xf32>
    %162 = arith.addf %158, %161 : vector<128x256xf32>
    %c2_185 = arith.constant 2 : index
    %c0_186 = arith.constant 0 : index
    %c0_187 = arith.constant 0 : index
    %163 = vector.load %arg4[%c2_185, %c0_186, %c0_187] : memref<3x256x256xbf16, #tpu.memory_space<vmem>>, vector<1x256x256xbf16>
    %164 = vector.shape_cast %163 : vector<1x256x256xbf16> to vector<256x256xbf16>
    %cst_188 = arith.constant dense<0.000000e+00> : vector<128x256xf32>
    %165 = tpu.matmul %155, %164, %cst_188 {dimension_numbers = #tpu.dot_dimension_numbers<[1], [0], [0], [1], [0, 0, 1, 1], [], []>} : vector<128x256xbf16>, vector<256x256xbf16>, vector<128x256xf32> -> vector<128x256xf32>
    %166 = arith.addf %162, %165 : vector<128x256xf32>
    %c0_189 = arith.constant 0 : index
    %c0_190 = arith.constant 0 : index
    %167 = vector.load %arg5[%c0_189, %c0_190] : memref<1x256xf32, #tpu.memory_space<vmem>>, vector<1x256xf32>
    %168 = vector.broadcast %167 : vector<1x256xf32> to vector<128x256xf32>
    %169 = arith.addf %166, %168 : vector<128x256xf32>
    %cst_191 = arith.constant 2.000000e-01 : f32
    %170 = vector.broadcast %cst_191 : f32 to vector<128x256xf32>
    %171 = arith.mulf %170, %169 : vector<128x256xf32>
    %172 = arith.maximumf %169, %171 : vector<128x256xf32>
    %173 = arith.truncf %172 : vector<128x256xf32> to vector<128x256xbf16>
    %cst_192 = arith.constant 0.000000e+00 : bf16
    %174 = vector.broadcast %cst_192 : bf16 to vector<16x256xbf16>
    %c0_193 = arith.constant 0 : index
    %c0_194 = arith.constant 0 : index
    %175 = vector.load %arg18[%c0_193, %c0_194] : memref<80x256xbf16, #tpu.memory_space<vmem>>, vector<16x256xbf16>
    tpu.vector_store %arg18[%c0_193, %c0_194], %174 {strides = array<i32>} : memref<80x256xbf16, #tpu.memory_space<vmem>>, vector<16x256xbf16>,
    %176 = vector.extract_strided_slice %173 {offsets = [0, 0], sizes = [16, 256], strides = [1, 1]} : vector<128x256xbf16> to vector<16x256xbf16>
    %c0_195 = arith.constant 0 : index
    %c0_196 = arith.constant 0 : index
    %177 = vector.load %arg17[%c0_195, %c0_196] : memref<64x256xbf16, #tpu.memory_space<vmem>>, vector<16x256xbf16>
    tpu.vector_store %arg17[%c0_195, %c0_196], %176 {strides = array<i32>} : memref<64x256xbf16, #tpu.memory_space<vmem>>, vector<16x256xbf16>,
    %178 = vector.extract_strided_slice %173 {offsets = [16, 0], sizes = [16, 256], strides = [1, 1]} : vector<128x256xbf16> to vector<16x256xbf16>
    %c16_197 = arith.constant 16 : index
    %c0_198 = arith.constant 0 : index
    %179 = vector.load %arg18[%c16_197, %c0_198] : memref<80x256xbf16, #tpu.memory_space<vmem>>, vector<16x256xbf16>
    tpu.vector_store %arg18[%c16_197, %c0_198], %178 {strides = array<i32>} : memref<80x256xbf16, #tpu.memory_space<vmem>>, vector<16x256xbf16>,
    %180 = vector.extract_strided_slice %173 {offsets = [32, 0], sizes = [16, 256], strides = [1, 1]} : vector<128x256xbf16> to vector<16x256xbf16>
    %c16_199 = arith.constant 16 : index
    %c0_200 = arith.constant 0 : index
    %181 = vector.load %arg17[%c16_199, %c0_200] : memref<64x256xbf16, #tpu.memory_space<vmem>>, vector<16x256xbf16>
    tpu.vector_store %arg17[%c16_199, %c0_200], %180 {strides = array<i32>} : memref<64x256xbf16, #tpu.memory_space<vmem>>, vector<16x256xbf16>,
    %182 = vector.extract_strided_slice %173 {offsets = [48, 0], sizes = [16, 256], strides = [1, 1]} : vector<128x256xbf16> to vector<16x256xbf16>
    %c32_201 = arith.constant 32 : index
    %c0_202 = arith.constant 0 : index
    %183 = vector.load %arg18[%c32_201, %c0_202] : memref<80x256xbf16, #tpu.memory_space<vmem>>, vector<16x256xbf16>
    tpu.vector_store %arg18[%c32_201, %c0_202], %182 {strides = array<i32>} : memref<80x256xbf16, #tpu.memory_space<vmem>>, vector<16x256xbf16>,
    %184 = vector.extract_strided_slice %173 {offsets = [64, 0], sizes = [16, 256], strides = [1, 1]} : vector<128x256xbf16> to vector<16x256xbf16>
    %c32_203 = arith.constant 32 : index
    %c0_204 = arith.constant 0 : index
    %185 = vector.load %arg17[%c32_203, %c0_204] : memref<64x256xbf16, #tpu.memory_space<vmem>>, vector<16x256xbf16>
    tpu.vector_store %arg17[%c32_203, %c0_204], %184 {strides = array<i32>} : memref<64x256xbf16, #tpu.memory_space<vmem>>, vector<16x256xbf16>,
    %186 = vector.extract_strided_slice %173 {offsets = [80, 0], sizes = [16, 256], strides = [1, 1]} : vector<128x256xbf16> to vector<16x256xbf16>
    %c48_205 = arith.constant 48 : index
    %c0_206 = arith.constant 0 : index
    %187 = vector.load %arg18[%c48_205, %c0_206] : memref<80x256xbf16, #tpu.memory_space<vmem>>, vector<16x256xbf16>
    tpu.vector_store %arg18[%c48_205, %c0_206], %186 {strides = array<i32>} : memref<80x256xbf16, #tpu.memory_space<vmem>>, vector<16x256xbf16>,
    %188 = vector.extract_strided_slice %173 {offsets = [96, 0], sizes = [16, 256], strides = [1, 1]} : vector<128x256xbf16> to vector<16x256xbf16>
    %c48_207 = arith.constant 48 : index
    %c0_208 = arith.constant 0 : index
    %189 = vector.load %arg17[%c48_207, %c0_208] : memref<64x256xbf16, #tpu.memory_space<vmem>>, vector<16x256xbf16>
    tpu.vector_store %arg17[%c48_207, %c0_208], %188 {strides = array<i32>} : memref<64x256xbf16, #tpu.memory_space<vmem>>, vector<16x256xbf16>,
    %190 = vector.extract_strided_slice %173 {offsets = [112, 0], sizes = [16, 256], strides = [1, 1]} : vector<128x256xbf16> to vector<16x256xbf16>
    %c64_209 = arith.constant 64 : index
    %c0_210 = arith.constant 0 : index
    %191 = vector.load %arg18[%c64_209, %c0_210] : memref<80x256xbf16, #tpu.memory_space<vmem>>, vector<16x256xbf16>
    tpu.vector_store %arg18[%c64_209, %c0_210], %190 {strides = array<i32>} : memref<80x256xbf16, #tpu.memory_space<vmem>>, vector<16x256xbf16>,
    %c0_211 = arith.constant 0 : index
    %c0_212 = arith.constant 0 : index
    %192 = vector.load %arg18[%c0_211, %c0_212] : memref<80x256xbf16, #tpu.memory_space<vmem>>, vector<64x256xbf16>
    %c0_213 = arith.constant 0 : index
    %c0_214 = arith.constant 0 : index
    %193 = vector.load %arg17[%c0_213, %c0_214] : memref<64x256xbf16, #tpu.memory_space<vmem>>, vector<64x256xbf16>
    %c16_215 = arith.constant 16 : index
    %c0_216 = arith.constant 0 : index
    %194 = vector.load %arg18[%c16_215, %c0_216] : memref<80x256xbf16, #tpu.memory_space<vmem>>, vector<64x256xbf16>
    %c1_217 = arith.constant 1 : index
    %c0_218 = arith.constant 0 : index
    %c0_219 = arith.constant 0 : index
    %195 = vector.load %arg6[%c1_217, %c0_218, %c0_219] : memref<3x256x256xbf16, #tpu.memory_space<vmem>>, vector<1x256x256xbf16>
    %196 = vector.shape_cast %195 : vector<1x256x256xbf16> to vector<256x256xbf16>
    %cst_220 = arith.constant dense<0.000000e+00> : vector<64x256xf32>
    %197 = tpu.matmul %193, %196, %cst_220 {dimension_numbers = #tpu.dot_dimension_numbers<[1], [0], [0], [1], [0, 0, 1, 1], [], []>} : vector<64x256xbf16>, vector<256x256xbf16>, vector<64x256xf32> -> vector<64x256xf32>
    %c0_221 = arith.constant 0 : index
    %c0_222 = arith.constant 0 : index
    %c0_223 = arith.constant 0 : index
    %198 = vector.load %arg6[%c0_221, %c0_222, %c0_223] : memref<3x256x256xbf16, #tpu.memory_space<vmem>>, vector<1x256x256xbf16>
    %199 = vector.shape_cast %198 : vector<1x256x256xbf16> to vector<256x256xbf16>
    %cst_224 = arith.constant dense<0.000000e+00> : vector<64x256xf32>
    %200 = tpu.matmul %192, %199, %cst_224 {dimension_numbers = #tpu.dot_dimension_numbers<[1], [0], [0], [1], [0, 0, 1, 1], [], []>} : vector<64x256xbf16>, vector<256x256xbf16>, vector<64x256xf32> -> vector<64x256xf32>
    %201 = arith.addf %197, %200 : vector<64x256xf32>
    %c2_225 = arith.constant 2 : index
    %c0_226 = arith.constant 0 : index
    %c0_227 = arith.constant 0 : index
    %202 = vector.load %arg6[%c2_225, %c0_226, %c0_227] : memref<3x256x256xbf16, #tpu.memory_space<vmem>>, vector<1x256x256xbf16>
    %203 = vector.shape_cast %202 : vector<1x256x256xbf16> to vector<256x256xbf16>
    %cst_228 = arith.constant dense<0.000000e+00> : vector<64x256xf32>
    %204 = tpu.matmul %194, %203, %cst_228 {dimension_numbers = #tpu.dot_dimension_numbers<[1], [0], [0], [1], [0, 0, 1, 1], [], []>} : vector<64x256xbf16>, vector<256x256xbf16>, vector<64x256xf32> -> vector<64x256xf32>
    %205 = arith.addf %201, %204 : vector<64x256xf32>
    %c0_229 = arith.constant 0 : index
    %c0_230 = arith.constant 0 : index
    %206 = vector.load %arg7[%c0_229, %c0_230] : memref<1x256xf32, #tpu.memory_space<vmem>>, vector<1x256xf32>
    %207 = vector.broadcast %206 : vector<1x256xf32> to vector<64x256xf32>
    %208 = arith.addf %205, %207 : vector<64x256xf32>
    %cst_231 = arith.constant 2.000000e-01 : f32
    %209 = vector.broadcast %cst_231 : f32 to vector<64x256xf32>
    %210 = arith.mulf %209, %208 : vector<64x256xf32>
    %211 = arith.maximumf %208, %210 : vector<64x256xf32>
    %212 = arith.truncf %211 : vector<64x256xf32> to vector<64x256xbf16>
    %cst_232 = arith.constant 0.000000e+00 : bf16
    %213 = vector.broadcast %cst_232 : bf16 to vector<16x256xbf16>
    %c0_233 = arith.constant 0 : index
    %c0_234 = arith.constant 0 : index
    %214 = vector.load %arg20[%c0_233, %c0_234] : memref<48x256xbf16, #tpu.memory_space<vmem>>, vector<16x256xbf16>
    tpu.vector_store %arg20[%c0_233, %c0_234], %213 {strides = array<i32>} : memref<48x256xbf16, #tpu.memory_space<vmem>>, vector<16x256xbf16>,
    %215 = vector.extract_strided_slice %212 {offsets = [0, 0], sizes = [16, 256], strides = [1, 1]} : vector<64x256xbf16> to vector<16x256xbf16>
    %c0_235 = arith.constant 0 : index
    %c0_236 = arith.constant 0 : index
    %216 = vector.load %arg19[%c0_235, %c0_236] : memref<32x256xbf16, #tpu.memory_space<vmem>>, vector<16x256xbf16>
    tpu.vector_store %arg19[%c0_235, %c0_236], %215 {strides = array<i32>} : memref<32x256xbf16, #tpu.memory_space<vmem>>, vector<16x256xbf16>,
    %217 = vector.extract_strided_slice %212 {offsets = [16, 0], sizes = [16, 256], strides = [1, 1]} : vector<64x256xbf16> to vector<16x256xbf16>
    %c16_237 = arith.constant 16 : index
    %c0_238 = arith.constant 0 : index
    %218 = vector.load %arg20[%c16_237, %c0_238] : memref<48x256xbf16, #tpu.memory_space<vmem>>, vector<16x256xbf16>
    tpu.vector_store %arg20[%c16_237, %c0_238], %217 {strides = array<i32>} : memref<48x256xbf16, #tpu.memory_space<vmem>>, vector<16x256xbf16>,
    %219 = vector.extract_strided_slice %212 {offsets = [32, 0], sizes = [16, 256], strides = [1, 1]} : vector<64x256xbf16> to vector<16x256xbf16>
    %c16_239 = arith.constant 16 : index
    %c0_240 = arith.constant 0 : index
    %220 = vector.load %arg19[%c16_239, %c0_240] : memref<32x256xbf16, #tpu.memory_space<vmem>>, vector<16x256xbf16>
    tpu.vector_store %arg19[%c16_239, %c0_240], %219 {strides = array<i32>} : memref<32x256xbf16, #tpu.memory_space<vmem>>, vector<16x256xbf16>,
    %221 = vector.extract_strided_slice %212 {offsets = [48, 0], sizes = [16, 256], strides = [1, 1]} : vector<64x256xbf16> to vector<16x256xbf16>
    %c32_241 = arith.constant 32 : index
    %c0_242 = arith.constant 0 : index
    %222 = vector.load %arg20[%c32_241, %c0_242] : memref<48x256xbf16, #tpu.memory_space<vmem>>, vector<16x256xbf16>
    tpu.vector_store %arg20[%c32_241, %c0_242], %221 {strides = array<i32>} : memref<48x256xbf16, #tpu.memory_space<vmem>>, vector<16x256xbf16>,
    %c0_243 = arith.constant 0 : index
    %c0_244 = arith.constant 0 : index
    %223 = vector.load %arg20[%c0_243, %c0_244] : memref<48x256xbf16, #tpu.memory_space<vmem>>, vector<32x256xbf16>
    %c0_245 = arith.constant 0 : index
    %c0_246 = arith.constant 0 : index
    %224 = vector.load %arg19[%c0_245, %c0_246] : memref<32x256xbf16, #tpu.memory_space<vmem>>, vector<32x256xbf16>
    %c16_247 = arith.constant 16 : index
    %c0_248 = arith.constant 0 : index
    %225 = vector.load %arg20[%c16_247, %c0_248] : memref<48x256xbf16, #tpu.memory_space<vmem>>, vector<32x256xbf16>
    %c1_249 = arith.constant 1 : index
    %c0_250 = arith.constant 0 : index
    %c0_251 = arith.constant 0 : index
    %226 = vector.load %arg8[%c1_249, %c0_250, %c0_251] : memref<3x256x256xbf16, #tpu.memory_space<vmem>>, vector<1x256x256xbf16>
    %227 = vector.shape_cast %226 : vector<1x256x256xbf16> to vector<256x256xbf16>
    %cst_252 = arith.constant dense<0.000000e+00> : vector<32x256xf32>
    %228 = tpu.matmul %224, %227, %cst_252 {dimension_numbers = #tpu.dot_dimension_numbers<[1], [0], [0], [1], [0, 0, 1, 1], [], []>} : vector<32x256xbf16>, vector<256x256xbf16>, vector<32x256xf32> -> vector<32x256xf32>
    %c0_253 = arith.constant 0 : index
    %c0_254 = arith.constant 0 : index
    %c0_255 = arith.constant 0 : index
    %229 = vector.load %arg8[%c0_253, %c0_254, %c0_255] : memref<3x256x256xbf16, #tpu.memory_space<vmem>>, vector<1x256x256xbf16>
    %230 = vector.shape_cast %229 : vector<1x256x256xbf16> to vector<256x256xbf16>
    %cst_256 = arith.constant dense<0.000000e+00> : vector<32x256xf32>
    %231 = tpu.matmul %223, %230, %cst_256 {dimension_numbers = #tpu.dot_dimension_numbers<[1], [0], [0], [1], [0, 0, 1, 1], [], []>} : vector<32x256xbf16>, vector<256x256xbf16>, vector<32x256xf32> -> vector<32x256xf32>
    %232 = arith.addf %228, %231 : vector<32x256xf32>
    %c2_257 = arith.constant 2 : index
    %c0_258 = arith.constant 0 : index
    %c0_259 = arith.constant 0 : index
    %233 = vector.load %arg8[%c2_257, %c0_258, %c0_259] : memref<3x256x256xbf16, #tpu.memory_space<vmem>>, vector<1x256x256xbf16>
    %234 = vector.shape_cast %233 : vector<1x256x256xbf16> to vector<256x256xbf16>
    %cst_260 = arith.constant dense<0.000000e+00> : vector<32x256xf32>
    %235 = tpu.matmul %225, %234, %cst_260 {dimension_numbers = #tpu.dot_dimension_numbers<[1], [0], [0], [1], [0, 0, 1, 1], [], []>} : vector<32x256xbf16>, vector<256x256xbf16>, vector<32x256xf32> -> vector<32x256xf32>
    %236 = arith.addf %232, %235 : vector<32x256xf32>
    %c0_261 = arith.constant 0 : index
    %c0_262 = arith.constant 0 : index
    %237 = vector.load %arg9[%c0_261, %c0_262] : memref<1x256xf32, #tpu.memory_space<vmem>>, vector<1x256xf32>
    %238 = vector.broadcast %237 : vector<1x256xf32> to vector<32x256xf32>
    %239 = arith.addf %236, %238 : vector<32x256xf32>
    %cst_263 = arith.constant 2.000000e-01 : f32
    %240 = vector.broadcast %cst_263 : f32 to vector<32x256xf32>
    %241 = arith.mulf %240, %239 : vector<32x256xf32>
    %242 = arith.maximumf %239, %241 : vector<32x256xf32>
    %243 = arith.truncf %242 : vector<32x256xf32> to vector<32x256xbf16>
    %c0_264 = arith.constant 0 : index
    %c0_265 = arith.constant 0 : index
    %244 = vector.load %arg21[%c0_264, %c0_265] : memref<32x256xbf16, #tpu.memory_space<vmem>>, vector<32x256xbf16>
    tpu.vector_store %arg21[%c0_264, %c0_265], %243 {strides = array<i32>} : memref<32x256xbf16, #tpu.memory_space<vmem>>, vector<32x256xbf16>,
    %c0_266 = arith.constant 0 : index
    %c0_267 = arith.constant 0 : index
    %245 = vector.load %arg10[%c0_266, %c0_267] : memref<2x256xf32, #tpu.memory_space<vmem>>, vector<2x256xf32>
    %c0_268 = arith.constant 0 : index
    %c0_269 = arith.constant 0 : index
    %246 = vector.load %arg21[%c0_268, %c0_269] : memref<32x256xbf16, #tpu.memory_space<vmem>>, vector<16x256xbf16>
    %247 = arith.extf %246 : vector<16x256xbf16> to vector<16x256xf32>
    %248 = vector.extract_strided_slice %245 {offsets = [0, 0], sizes = [1, 256], strides = [1, 1]} : vector<2x256xf32> to vector<1x256xf32>
    %249 = vector.broadcast %248 : vector<1x256xf32> to vector<16x256xf32>
    %250 = arith.mulf %247, %249 : vector<16x256xf32>
    %c16_270 = arith.constant 16 : index
    %c0_271 = arith.constant 0 : index
    %251 = vector.load %arg21[%c16_270, %c0_271] : memref<32x256xbf16, #tpu.memory_space<vmem>>, vector<16x256xbf16>
    %252 = arith.extf %251 : vector<16x256xbf16> to vector<16x256xf32>
    %253 = vector.extract_strided_slice %245 {offsets = [1, 0], sizes = [1, 256], strides = [1, 1]} : vector<2x256xf32> to vector<1x256xf32>
    %254 = vector.broadcast %253 : vector<1x256xf32> to vector<16x256xf32>
    %255 = arith.mulf %252, %254 : vector<16x256xf32>
    %256 = arith.addf %250, %255 : vector<16x256xf32>
    %cst_272 = arith.constant dense<0.000000e+00> : vector<16xf32>
    %257 = vector.multi_reduction <add>, %256, %cst_272 [1] : vector<16x256xf32> to vector<16xf32>
    %258 = vector.shape_cast %257 : vector<16xf32> to vector<16x1xf32>
    %c0_273 = arith.constant 0 : index
    %c0_274 = arith.constant 0 : index
    %259 = vector.load %arg11[%c0_273, %c0_274] : memref<1x1xf32, #tpu.memory_space<vmem>>, vector<1x1xf32>
    %260 = vector.broadcast %259 : vector<1x1xf32> to vector<16x1xf32>
    %261 = arith.addf %258, %260 : vector<16x1xf32>
    %c0_275 = arith.constant 0 : index
    %c0_276 = arith.constant 0 : index
    %262 = vector.load %arg12[%c0_275, %c0_276] : memref<16x1xf32, #tpu.memory_space<vmem>>, vector<16x1xf32>
    tpu.vector_store %arg12[%c0_275, %c0_276], %261 {strides = array<i32>} : memref<16x1xf32, #tpu.memory_space<vmem>>, vector<16x1xf32>,
    return
  }
  func.func @transform_0(%arg0: i32) -> (i32, i32, i32) {
    %c0_i32 = arith.constant 0 : i32
    %c0_i32_0 = arith.constant 0 : i32
    %c0_i32_1 = arith.constant 0 : i32
    return %c0_i32, %arg0, %c0_i32_0 : i32, i32, i32
  }
  func.func @transform_1(%arg0: i32) -> (i32, i32, i32) {
    %c0_i32 = arith.constant 0 : i32
    %c0_i32_0 = arith.constant 0 : i32
    %c0_i32_1 = arith.constant 0 : i32
    %c0_i32_2 = arith.constant 0 : i32
    return %c0_i32, %c0_i32_0, %c0_i32_1 : i32, i32, i32
  }
  func.func @transform_2(%arg0: i32) -> (i32, i32) {
    %c0_i32 = arith.constant 0 : i32
    %c0_i32_0 = arith.constant 0 : i32
    %c0_i32_1 = arith.constant 0 : i32
    return %c0_i32, %c0_i32_0 : i32, i32
  }
  func.func @transform_3(%arg0: i32) -> (i32, i32, i32) {
    %c0_i32 = arith.constant 0 : i32
    %c0_i32_0 = arith.constant 0 : i32
    %c0_i32_1 = arith.constant 0 : i32
    %c0_i32_2 = arith.constant 0 : i32
    return %c0_i32, %c0_i32_0, %c0_i32_1 : i32, i32, i32
  }
  func.func @transform_4(%arg0: i32) -> (i32, i32) {
    %c0_i32 = arith.constant 0 : i32
    %c0_i32_0 = arith.constant 0 : i32
    %c0_i32_1 = arith.constant 0 : i32
    return %c0_i32, %c0_i32_0 : i32, i32
  }
  func.func @transform_5(%arg0: i32) -> (i32, i32, i32) {
    %c0_i32 = arith.constant 0 : i32
    %c0_i32_0 = arith.constant 0 : i32
    %c0_i32_1 = arith.constant 0 : i32
    %c0_i32_2 = arith.constant 0 : i32
    return %c0_i32, %c0_i32_0, %c0_i32_1 : i32, i32, i32
  }
  func.func @transform_6(%arg0: i32) -> (i32, i32) {
    %c0_i32 = arith.constant 0 : i32
    %c0_i32_0 = arith.constant 0 : i32
    %c0_i32_1 = arith.constant 0 : i32
    return %c0_i32, %c0_i32_0 : i32, i32
  }
  func.func @transform_7(%arg0: i32) -> (i32, i32, i32) {
    %c0_i32 = arith.constant 0 : i32
    %c0_i32_0 = arith.constant 0 : i32
    %c0_i32_1 = arith.constant 0 : i32
    %c0_i32_2 = arith.constant 0 : i32
    return %c0_i32, %c0_i32_0, %c0_i32_1 : i32, i32, i32
  }
  func.func @transform_8(%arg0: i32) -> (i32, i32) {
    %c0_i32 = arith.constant 0 : i32
    %c0_i32_0 = arith.constant 0 : i32
    %c0_i32_1 = arith.constant 0 : i32
    return %c0_i32, %c0_i32_0 : i32, i32
  }
  func.func @transform_9(%arg0: i32) -> (i32, i32) {
    %c0_i32 = arith.constant 0 : i32
    %c0_i32_0 = arith.constant 0 : i32
    %c0_i32_1 = arith.constant 0 : i32
    return %c0_i32, %c0_i32_0 : i32, i32
  }
  func.func @transform_10(%arg0: i32) -> (i32, i32) {
    %c0_i32 = arith.constant 0 : i32
    %c0_i32_0 = arith.constant 0 : i32
    %c0_i32_1 = arith.constant 0 : i32
    return %c0_i32, %c0_i32_0 : i32, i32
  }
  func.func @transform_11(%arg0: i32) -> (i32, i32) {
    %c0_i32 = arith.constant 0 : i32
    %c0_i32_0 = arith.constant 0 : i32
    return %arg0, %c0_i32 : i32, i32
  }
}

</mosaic_0001>

<bundles_post_ra>
// kernel: discriminator_forward.1
= control target key start
LH: loop header
LB: loop body
LE: loop exit
PB: predicated region body
PF: predicated region fallthrough
CT: control target
= control target key end

     0   :  { %s8504_s0 = inlined_call_operand.vmem [shape: bf16[32,32,32], index: 0, kind: input, shape index: {}]   ;;  %s8505_s1 = inlined_call_operand.hbm [shape: bf16[3,32,256], index: 1, kind: input, shape index: {}]   ;;  %s8506_s2 = inlined_call_operand.hbm [shape: f32[1,256], index: 2, kind: input, shape index: {}]   ;;  %s8507_s3 = inlined_call_operand.vmem [shape: bf16[3,256,256], index: 3, kind: input, shape index: {}]   ;;  %s8508_s4 = inlined_call_operand.hbm [shape: f32[1,256], index: 4, kind: input, shape index: {}]   ;;  %s8509_s5 = inlined_call_operand.vmem [shape: bf16[3,256,256], index: 5, kind: input, shape index: {}]   ;;  %s8510_s6 = inlined_call_operand.hbm [shape: f32[1,256], index: 6, kind: input, shape index: {}]   ;;  %s8511_s7 = inlined_call_operand.hbm [shape: bf16[3,256,256], index: 7, kind: input, shape index: {}]   ;;  %s8512_s8 = inlined_call_operand.hbm [shape: f32[1,256], index: 8, kind: input, shape index: {}]   ;;  %s8513_s9 = inlined_call_operand.vmem [shape: f32[2,256], index: 9, kind: input, shape index: {}]   ;;  %s8514_s10 = inlined_call_operand.<no memory space> [shape: f32[1,1], index: 10, kind: input, shape index: {}]   ;;  %s8515_s11 = inlined_call_operand.vmem [shape: f32[32,1], index: 11, kind: output, shape index: {}]  }
   0x1   :  { %8533 = sst [smem:[#allocation44_spill]] %s8506_s2  ;;  %v16_v0 = vstv %s8514_s10 }
   0x2   :  { %8534 = sst [smem:[#allocation45_spill]] %s8510_s6  ;;  %17 = vst [vmem:[#allocation11] sm:$0x1] %v16_v0 }
   0x3   :  { %8535 = sst [smem:[#allocation46_spill]] %s8513_s9 }
   0x4   :  { %8536 = sst [smem:[#allocation47_spill]] %s8515_s11 }
   0x5   :  { %18 = vsyncpa [#allocation14], 0 }
   0x6   :  { %19 = vsyncpa [#allocation16], 0 }
   0x7   :  { %20 = vsyncpa [#allocation19], 0 }
   0x8   :  { %21 = vsyncpa [#allocation22], 0  ;;  %s6954_s19 = smov 0   ;;  %s6956_s20 = smov 0  }
   0x9   :  { %s6958_s21 = smov 0  }
   0xa LB: > { %s8516_s10 = sadd.s32 4294967295, %s6880_s21   ;;  %s6971_s22 = sadd.s32 1, %s6880_s21   ;;  %s6880_s21 = sphi %s6958_s21, %s8583_s21   ;;  %s6876_s20 = sphi %s6956_s20, %s8586_s20   ;;  %s6872_s19 = sphi %s6954_s19, %s8585_s19  }
   0xb   : > { %8537 = sst [smem:[#allocation27_spill]] %s6971_s22  ;;  %s31_s23 = ssub.s32 %s6880_s21, %s6971_s22 }
   0xc   : > { %s34_s24 = sadd.s32 1, %s6876_s20  ;;  %p32_p0 = scmp.eq.s32.totalorder %s31_s23, 0 }
   0xd   : > { %p41_p1 = scmp.ne.s32.totalorder %s6876_s20, %s6872_s19  ;;  %p42_p2 = scmp.eq.s32.totalorder %s6880_s21, 0 }
   0xe   : > { %p5265_p3 = scmp.ge.s32.totalorder %s6880_s21, 1  ;;  %p294_p5 = scmp.lt.s32.totalorder %s6880_s21, 3 }
   0xf   : > { %s6981_s25 = scalar_select %p32_p0, %s6876_s20, %s34_s24  }
  0x10   : > { %p6983_p4 = por %p42_p2, %p41_p1  ;;  %p6990_p6 = scmp.eq.s32.totalorder %s8516_s10, 0 }
  0x11   : > { %8538 = sst [smem:[#allocation28_spill]] %s6981_s25  ;;  %p6994_p7 = pnand %p5265_p3, %p294_p5 }
  0x12   : > { %s8539_s26 = scalar_select %p6983_p4, 1, 0 }
  0x13   : > { %s8540_s27 = scalar_select %p6990_p6, 1, 0 }
  0x14   : > { %s8541_s28 = scalar_select %p6994_p7, 1, 0 }
  0x15   : > { %s6882_s29 = smov [#allocation15]   ;;  %p6128_p8 = pneg %p6994_p7 }
  0x16   : > { %s320_s30 = sshll.u32 %s6882_s29, 4  ;;  %s6883_s12 = smov [#allocation18]   ;;  %s321_s30 = int_to_ptr.vmem [resolvable:$true] %s320_s30 }
  0x17   : > { %s348_s13 = sshll.u32 %s6883_s12, 4  ;;  %p7002_p9 = pnand %p6990_p6, %p6128_p8  ;;  %s7006_s13 = int_to_ptr.vmem [resolvable:$true] %s348_s13 }
  0x18   : > { %s6884_s15 = smov [#allocation13]   ;;  %s8543_s2 = sld [smem:[#allocation44_spill]] }
  0x19   : > { %s306_s16 = sshll.u32 %s6884_s15, 4  ;;  %p7018_p11 = pneg %p7002_p9  ;;  %s7008_s16 = int_to_ptr.vmem [resolvable:$true] %s306_s16 }
  0x1e   : > { %s6674_s23 = scalar_lea.hbm %s8543_s2, 32 }
  0x1f   : > { %p6675_p10 = scmp.ne.s32.totalorder %s8543_s2, %s6674_s23  ;;  %p6681_p0 = scmp.lt.u32.totalorder %s6674_s23, %s8543_s2 }
  0x21   : > { %p6677_p12 = pnand %p7018_p11, %p6675_p10 }
  0x23   : > { %p6678_p13 = pneg %p6677_p12 }
  0x25   : > { %p6683_p1 = pnand %p6681_p0, %p6678_p13 }
  0x27   : > { %6686 = shalt.err (!%p6683_p1)
}
  0x28   : > { %s6687_s17 = scalar_lea.vmem %s321_s30, 32  ;;  %p6695_p8 = scmp.lt.s32.totalorder %s321_s30, %s321_s30 }
  0x29   : > { %p6688_p2 = scmp.ne.s32.totalorder %s321_s30, %s6687_s17  ;;  %p6696_p6 = scmp.lt.s32.totalorder %s6687_s17, %s6687_s17 }
  0x2b   : > { %p6690_p3 = pnand %p6688_p2, %p7018_p11  ;;  %p6697_p7 = por %p6696_p6, %p6695_p8 }
  0x2d   : > { %p6691_p5 = pneg %p6690_p3 }
  0x2f   : > { %p6698_p4 = pnand %p6697_p7, %p6691_p5 }
  0x31   : > { %6701 = shalt.err (!%p6698_p4)
}
  0x32   : > { %6134 = dma.hbm_to_vmem [thread:$0]  (!%p7002_p9), %s8543_s2, 32, %s321_s30, [#allocation16]  }
  0x33   : > { %s8545_s6 = sld [smem:[#allocation45_spill]] }
  0x39   : > { %s6702_s29 = scalar_lea.hbm %s8545_s6, 32 }
  0x3a   : > { %p6703_p10 = scmp.ne.s32.totalorder %s8545_s6, %s6702_s29  ;;  %p6709_p4 = scmp.lt.u32.totalorder %s6702_s29, %s8545_s6 }
  0x3c   : > { %p6705_p12 = pnand %p6703_p10, %p7018_p11 }
  0x3e   : > { %p6706_p6 = pneg %p6705_p12 }
  0x40   : > { %p6711_p7 = pnand %p6709_p4, %p6706_p6 }
  0x42   : > { %6714 = shalt.err (!%p6711_p7)
}
  0x43   : > { %s6715_s30 = scalar_lea.vmem %s7006_s13, 32  ;;  %p6723_p2 = scmp.lt.s32.totalorder %s7006_s13, %s7006_s13 }
  0x44   : > { %p6716_p13 = scmp.ne.s32.totalorder %s7006_s13, %s6715_s30  ;;  %p6724_p3 = scmp.lt.s32.totalorder %s6715_s30, %s6715_s30 }
  0x46   : > { %p6718_p0 = pnand %p6716_p13, %p7018_p11  ;;  %p6725_p5 = por %p6724_p3, %p6723_p2 }
  0x48   : > { %p6719_p1 = pneg %p6718_p0 }
  0x4a   : > { %p6726_p8 = pnand %p6725_p5, %p6719_p1 }
  0x4c   : > { %6729 = shalt.err (!%p6726_p8)
}
  0x4d   : > { %6140 = dma.hbm_to_vmem [thread:$0]  (!%p7002_p9), %s8545_s6, 32, %s7006_s13, [#allocation19]  }
  0x4e   : > { %s6730_s10 = scalar_lea.hbm %s8505_s1, 1536 }
  0x4f   : > { %p6731_p10 = scmp.ne.s32.totalorder %s8505_s1, %s6730_s10  ;;  %p6737_p4 = scmp.lt.u32.totalorder %s6730_s10, %s8505_s1 }
  0x51   : > { %p6733_p12 = pnand %p6731_p10, %p7018_p11 }
  0x53   : > { %p6734_p6 = pneg %p6733_p12 }
  0x55   : > { %p6739_p7 = pnand %p6737_p4, %p6734_p6 }
  0x57   : > { %6742 = shalt.err (!%p6739_p7)
}
  0x58   : > { %s6743_s13 = scalar_lea.vmem %s7008_s16, 1536  ;;  %p6751_p2 = scmp.lt.s32.totalorder %s7008_s16, %s7008_s16 }
  0x59   : > { %p6744_p13 = scmp.ne.s32.totalorder %s7008_s16, %s6743_s13  ;;  %p6752_p3 = scmp.lt.s32.totalorder %s6743_s13, %s6743_s13 }
  0x5b   : > { %p6746_p0 = pnand %p6744_p13, %p7018_p11  ;;  %p6753_p5 = por %p6752_p3, %p6751_p2 }
  0x5d   : > { %p6747_p1 = pneg %p6746_p0 }
  0x5f   : > { %p6754_p8 = pnand %p6753_p5, %p6747_p1 }
  0x61   : > { %6757 = shalt.err (!%p6754_p8)
}
  0x62   : > { %s6885_s30 = smov 128   ;;  %s6886_s22 = smov 8  }
  0x63   : > { %6131 = dma.hbm_to_vmem [thread:$0]  (!%p7002_p9), %s8505_s1, 1536, %s7008_s16, [#allocation14], %s6885_s30, %s6885_s30, %s6886_s22  }
  0x64   : > { %s6887_s24 = smov [#allocation17]   ;;  %s6888_s23 = smov [#allocation20]  }
  0x65   : > { %s334_s10 = sshll.u32 %s6887_s24, 4  ;;  %s358_s29 = sshll.u32 %s6888_s23, 4  ;;  %s335_s10 = int_to_ptr.vmem [resolvable:$true] %s334_s10  ;;  %s359_s29 = int_to_ptr.vmem [resolvable:$true] %s358_s29 }
  0x66   : > { %s6758_s13 = scalar_lea.hbm %s8508_s4, 32 }
  0x67   : > { %p6759_p10 = scmp.ne.s32.totalorder %s8508_s4, %s6758_s13  ;;  %p6765_p4 = scmp.lt.u32.totalorder %s6758_s13, %s8508_s4 }
  0x69   : > { %p6761_p12 = pnand %p6759_p10, %p7018_p11 }
  0x6b   : > { %p6762_p6 = pneg %p6761_p12 }
  0x6d   : > { %p6767_p7 = pnand %p6765_p4, %p6762_p6 }
  0x6f   : > { %6770 = shalt.err (!%p6767_p7)
}
  0x70   : > { %s6771_s16 = scalar_lea.vmem %s335_s10, 32  ;;  %p6779_p2 = scmp.lt.s32.totalorder %s335_s10, %s335_s10 }
  0x71   : > { %p6772_p13 = scmp.ne.s32.totalorder %s335_s10, %s6771_s16  ;;  %p6780_p3 = scmp.lt.s32.totalorder %s6771_s16, %s6771_s16 }
  0x73   : > { %p6774_p0 = pnand %p6772_p13, %p7018_p11  ;;  %p6781_p5 = por %p6780_p3, %p6779_p2 }
  0x75   : > { %p6775_p1 = pneg %p6774_p0 }
  0x77   : > { %p6782_p8 = pnand %p6781_p5, %p6775_p1 }
  0x79   : > { %6785 = shalt.err (!%p6782_p8)
}
  0x7a   : > { %6137 = dma.hbm_to_vmem [thread:$0]  (!%p7002_p9), %s8508_s4, 32, %s335_s10, [#allocation16]  }
  0x7b   : > { %s6786_s25 = scalar_lea.hbm %s8511_s7, 12288 }
  0x7c   : > { %p6787_p10 = scmp.ne.s32.totalorder %s8511_s7, %s6786_s25  ;;  %p6793_p4 = scmp.lt.u32.totalorder %s6786_s25, %s8511_s7 }
  0x7e   : > { %p6789_p12 = pnand %p6787_p10, %p7018_p11 }
  0x80   : > { %p6790_p6 = pneg %p6789_p12 }
  0x82   : > { %p6795_p7 = pnand %p6793_p4, %p6790_p6 }
  0x84   : > { %6798 = shalt.err (!%p6795_p7)
}
  0x85   : > { %s6799_s17 = scalar_lea.vmem %s359_s29, 12288  ;;  %p6807_p2 = scmp.lt.s32.totalorder %s359_s29, %s359_s29 }
  0x86   : > { %p6800_p13 = scmp.ne.s32.totalorder %s359_s29, %s6799_s17  ;;  %p6808_p3 = scmp.lt.s32.totalorder %s6799_s17, %s6799_s17 }
  0x88   : > { %p6802_p0 = pnand %p6800_p13, %p7018_p11  ;;  %p6809_p5 = por %p6808_p3, %p6807_p2 }
  0x8a   : > { %p6803_p1 = pneg %p6802_p0 }
  0x8c   : > { %p6810_p8 = pnand %p6809_p5, %p6803_p1 }
  0x8e   : > { %6813 = shalt.err (!%p6810_p8)
}
  0x8f   : > { %6143 = dma.hbm_to_vmem [thread:$0]  (!%p7002_p9), %s8511_s7, 12288, %s359_s29, [#allocation19], %s6885_s30, %s6885_s30, %s6886_s22  }
  0x90   : > { %s6889_s16 = smov [#allocation21]   ;;  %s6814_s11 = scalar_lea.hbm %s8512_s8, 32 }
  0x91   : > { %s372_s2 = sshll.u32 %s6889_s16, 4  ;;  %p6815_p10 = scmp.ne.s32.totalorder %s8512_s8, %s6814_s11  ;;  %s373_s2 = int_to_ptr.vmem [resolvable:$true] %s372_s2 }
  0x92   : > { %p6821_p4 = scmp.lt.u32.totalorder %s6814_s11, %s8512_s8 }
  0x93   : > { %p6817_p12 = pnand %p6815_p10, %p7018_p11 }
  0x95   : > { %p6818_p6 = pneg %p6817_p12 }
  0x97   : > { %p6823_p7 = pnand %p6821_p4, %p6818_p6 }
  0x99   : > { %6826 = shalt.err (!%p6823_p7)
}
  0x9a   : > { %s6827_s30 = scalar_lea.vmem %s373_s2, 32  ;;  %p6835_p2 = scmp.lt.s32.totalorder %s373_s2, %s373_s2 }
  0x9b   : > { %p6828_p13 = scmp.ne.s32.totalorder %s373_s2, %s6827_s30  ;;  %p6836_p3 = scmp.lt.s32.totalorder %s6827_s30, %s6827_s30 }
  0x9d   : > { %p6830_p0 = pnand %p6828_p13, %p7018_p11  ;;  %p6837_p5 = por %p6836_p3, %p6835_p2 }
  0x9f   : > { %p6831_p1 = pneg %p6830_p0 }
  0xa1   : > { %p6838_p8 = pnand %p6837_p5, %p6831_p1 }
  0xa3   : > { %6841 = shalt.err (!%p6838_p8)
}
  0xa4   : > { %6146 = dma.hbm_to_vmem [thread:$0]  (!%p7002_p9), %s8512_s8, 32, %s373_s2, [#allocation22]  }
  0xa5   : > { %p5272_p10 = scmp.ge.s32.totalorder %s6880_s21, 2 }
  0xa6   : > { %p8546_p12 = scmp.ne.s32.totalorder (!%p5272_p10), %s8539_s26, 0 }
  0xa7   : > { %385 = sbr.rel (%p5272_p10) target bundleno = 194 (0xc2), region = 56 }
  0xae   : > { %388 = sbr.rel (!%p8546_p12) target bundleno = 194 (0xc2), region = 60  ;;  %s390_s12 = sand.u32 (%p8546_p12), 1, %s6876_s20  }
  0xaf   : > { %s5859_s15 = sshll.u32 (%p8546_p12), %s6880_s21, 3  ;;  %s5273_s17 = sshll.u32 (%p8546_p12), %s390_s12, 8 }
  0xb0   : > { %s7148_s16 = scalar_lea.vmem (%p8546_p12), %s8504_s0, %s5859_s15  ;;  %s7153_s26 = scalar_lea.vmem (%p8546_p12), [#allocation12], %s5273_s17 }
  0xb1   : > { %v411_v1 = vld [vmem:[%s7148_s16] sm:$0xff] (%p8546_p12)   ;;  %v415_v2 = vld [vmem:[%s7148_s16 + $0x10] sm:$0xff] (%p8546_p12)  }
  0xb2   : > { %v419_v3 = vld [vmem:[%s7148_s16 + $0x20] sm:$0xff] (%p8546_p12)   ;;  %412 = vst [vmem:[%s7153_s26] sm:$0xff] (%p8546_p12), %v411_v1   ;;  %416 = vst [vmem:[%s7153_s26 + $0x8] sm:$0xff] (%p8546_p12), %v415_v2   ;;  %v423_v4 = vld [vmem:[%s7148_s16 + $0x30] sm:$0xff] (%p8546_p12)  }
  0xb3   : > { %420 = vst [vmem:[%s7153_s26 + $0x10] sm:$0xff] (%p8546_p12), %v419_v3   ;;  %v427_v5 = vld [vmem:[%s7148_s16 + $0x40] sm:$0xff] (%p8546_p12)   ;;  %v431_v6 = vld [vmem:[%s7148_s16 + $0x50] sm:$0xff] (%p8546_p12)   ;;  %424 = vst [vmem:[%s7153_s26 + $0x18] sm:$0xff] (%p8546_p12), %v423_v4  }
  0xb4   : > { %428 = vst [vmem:[%s7153_s26 + $0x20] sm:$0xff] (%p8546_p12), %v427_v5   ;;  %432 = vst [vmem:[%s7153_s26 + $0x28] sm:$0xff] (%p8546_p12), %v431_v6   ;;  %v435_v7 = vld [vmem:[%s7148_s16 + $0x60] sm:$0xff] (%p8546_p12)   ;;  %v439_v8 = vld [vmem:[%s7148_s16 + $0x70] sm:$0xff] (%p8546_p12)  }
  0xb5   : > { %v443_v9 = vld [vmem:[%s7148_s16 + $0x80] sm:$0xff]   ;;  %436 = vst [vmem:[%s7153_s26 + $0x30] sm:$0xff] %v435_v7   ;;  %440 = vst [vmem:[%s7153_s26 + $0x38] sm:$0xff] %v439_v8   ;;  %v447_v10 = vld [vmem:[%s7148_s16 + $0x90] sm:$0xff]  }
  0xb6   : > { %444 = vst [vmem:[%s7153_s26 + $0x40] sm:$0xff] %v443_v9   ;;  %v451_v11 = vld [vmem:[%s7148_s16 + $0xa0] sm:$0xff]   ;;  %v455_v12 = vld [vmem:[%s7148_s16 + $0xb0] sm:$0xff]   ;;  %448 = vst [vmem:[%s7153_s26 + $0x48] sm:$0xff] %v447_v10  }
  0xb7   : > { %452 = vst [vmem:[%s7153_s26 + $0x50] sm:$0xff] %v451_v11   ;;  %456 = vst [vmem:[%s7153_s26 + $0x58] sm:$0xff] %v455_v12   ;;  %v459_v13 = vld [vmem:[%s7148_s16 + $0xc0] sm:$0xff]   ;;  %v463_v14 = vld [vmem:[%s7148_s16 + $0xd0] sm:$0xff]  }
  0xb8   : > { %v467_v15 = vld [vmem:[%s7148_s16 + $0xe0] sm:$0xff]   ;;  %460 = vst [vmem:[%s7153_s26 + $0x60] sm:$0xff] %v459_v13   ;;  %464 = vst [vmem:[%s7153_s26 + $0x68] sm:$0xff] %v463_v14   ;;  %v471_v16 = vld [vmem:[%s7148_s16 + $0xf0] sm:$0xff]  }
  0xb9   : > { %468 = vst [vmem:[%s7153_s26 + $0x70] sm:$0xff] %v467_v15   ;;  %v475_v17 = vld [vmem:[%s7148_s16 + $0x100] sm:$0xff]   ;;  %v479_v18 = vld [vmem:[%s7148_s16 + $0x110] sm:$0xff]   ;;  %472 = vst [vmem:[%s7153_s26 + $0x78] sm:$0xff] %v471_v16  }
  0xba   : > { %476 = vst [vmem:[%s7153_s26 + $0x80] sm:$0xff] %v475_v17   ;;  %480 = vst [vmem:[%s7153_s26 + $0x88] sm:$0xff] %v479_v18   ;;  %v483_v19 = vld [vmem:[%s7148_s16 + $0x120] sm:$0xff]   ;;  %v487_v20 = vld [vmem:[%s7148_s16 + $0x130] sm:$0xff]  }
  0xbb   : > { %v491_v21 = vld [vmem:[%s7148_s16 + $0x140] sm:$0xff]   ;;  %484 = vst [vmem:[%s7153_s26 + $0x90] sm:$0xff] %v483_v19   ;;  %488 = vst [vmem:[%s7153_s26 + $0x98] sm:$0xff] %v487_v20   ;;  %v495_v22 = vld [vmem:[%s7148_s16 + $0x150] sm:$0xff]  }
  0xbc   : > { %492 = vst [vmem:[%s7153_s26 + $0xa0] sm:$0xff] %v491_v21   ;;  %v499_v23 = vld [vmem:[%s7148_s16 + $0x160] sm:$0xff]   ;;  %v503_v24 = vld [vmem:[%s7148_s16 + $0x170] sm:$0xff]   ;;  %496 = vst [vmem:[%s7153_s26 + $0xa8] sm:$0xff] %v495_v22  }
  0xbd   : > { %500 = vst [vmem:[%s7153_s26 + $0xb0] sm:$0xff] %v499_v23   ;;  %504 = vst [vmem:[%s7153_s26 + $0xb8] sm:$0xff] %v503_v24   ;;  %v507_v25 = vld [vmem:[%s7148_s16 + $0x180] sm:$0xff]   ;;  %v511_v26 = vld [vmem:[%s7148_s16 + $0x190] sm:$0xff]  }
  0xbe   : > { %v515_v27 = vld [vmem:[%s7148_s16 + $0x1a0] sm:$0xff]   ;;  %508 = vst [vmem:[%s7153_s26 + $0xc0] sm:$0xff] %v507_v25   ;;  %512 = vst [vmem:[%s7153_s26 + $0xc8] sm:$0xff] %v511_v26   ;;  %v519_v28 = vld [vmem:[%s7148_s16 + $0x1b0] sm:$0xff]  }
  0xbf   : > { %516 = vst [vmem:[%s7153_s26 + $0xd0] sm:$0xff] %v515_v27   ;;  %v523_v29 = vld [vmem:[%s7148_s16 + $0x1c0] sm:$0xff]   ;;  %v527_v30 = vld [vmem:[%s7148_s16 + $0x1d0] sm:$0xff]   ;;  %520 = vst [vmem:[%s7153_s26 + $0xd8] sm:$0xff] %v519_v28  }
  0xc0   : > { %524 = vst [vmem:[%s7153_s26 + $0xe0] sm:$0xff] %v523_v29   ;;  %528 = vst [vmem:[%s7153_s26 + $0xe8] sm:$0xff] %v527_v30   ;;  %v531_v31 = vld [vmem:[%s7148_s16 + $0x1e0] sm:$0xff]   ;;  %v535_v32 = vld [vmem:[%s7148_s16 + $0x1f0] sm:$0xff]  }
  0xc1   : > { %532 = vst [vmem:[%s7153_s26 + $0xf0] sm:$0xff] %v531_v31   ;;  %536 = vst [vmem:[%s7153_s26 + $0xf8] sm:$0xff] %v535_v32  }
  0xc2 PF: > { %p8547_p9 = scmp.ne.s32.totalorder %s8541_s28, 0 }
  0xc4   : > { %692 = sbr.rel (%p8547_p9) target bundleno = 1821 (0x71d), region = 101 }
  0xcb   : > { %s695_s14 = sand.u32 1, %s6872_s19   ;;  %p8548_p11 = scmp.ne.s32.totalorder %s8540_s27, 0 }
  0xcc   : > { %s5277_s2 = sshll.u32 %s695_s14, 8 }
  0xcd   : > { %s7219_s6 = scalar_lea.vmem [#allocation12], %s5277_s2 }
  0xce   : > { %6855 = dma.done.wait (%p8548_p11), [#allocation14], 1536  }
  0xcf   : > { %6857 = vsyncadd (%p8548_p11), [#allocation14], 4294965760 }
  0xd0   : > { %6859 = dma.done.wait (%p8548_p11), [#allocation16], 64  }
  0xd1   : > { %6861 = vsyncadd (%p8548_p11), [#allocation16], 4294967232 }
  0xd2   : > { %6863 = dma.done.wait (%p8548_p11), [#allocation19], 12320  }
  0xd3   : > { %6865 = vsyncadd (%p8548_p11), [#allocation19], 4294954976 }
  0xd4   : > { %6867 = dma.done.wait (%p8548_p11), [#allocation22], 32  }
  0xd5   : > { %6869 = vsyncadd (%p8548_p11), [#allocation22], 4294967264  ;;  %vm766_vm0 = vcmask 261120   ;;  %v8522_v33 = vmov 0   ;;  %v6192_v34 = vld [vmem:[#allocation13 + $0x4] ss:$8 sps:$4 sm:$0xff]  }
  0xd6   : > { %1229 = vmatprep.mubr.bf16.mxu0 %v8522_v33  ;;  %767 = vst.msk [vmem:[#allocation3] sm:$0xff] %vm766_vm0, %v8522_v33  ;;  %1279 = vmatprep.mubr.bf16.mxu1 %v8522_v33  ;;  %v6194_v35 = vld [vmem:[#allocation13] ss:$8 sps:$4 sm:$0xff]   ;;  %v6195_v36 = vld [vmem:[#allocation13 + $0x14] ss:$8 sps:$4 sm:$0xff]   ;;  %s8580_s12 = sld [smem:[#allocation46_spill]] }
  0xd7   : > { %1197 = vmatprep.subr.bf16.mxu0 %v6192_v34  ;;  %5860 = vmatprep.subr.bf16.mxu1 %v6192_v34  ;;  %v6197_v37 = vld [vmem:[#allocation13 + $0x10] ss:$8 sps:$4 sm:$0xff]   ;;  %v6200_v38 = vld [vmem:[#allocation13 + $0x24] ss:$8 sps:$4 sm:$0xff]   ;;  %v6198_v42 = vld [vmem:[#allocation13 + $0x20] ss:$8 sps:$4 sm:$0xff]  }
  0xd8   : > { %1198 = vmatpush1.bf16.msra.mxu0 %v6194_v35  ;;  %5862 = vmatpush1.bf16.msra.mxu1 %v6194_v35  ;;  %v6201_v40 = vld [vmem:[%s7219_s6 + $0x8] sm:$0xff]   ;;  %v6202_v41 = vld [vmem:[%s7219_s6 + $0x18] sm:$0xff]   ;;  %v6208_v46 = vld [vmem:[%s7219_s6] sm:$0xff]   ;;  %s8581_s15 = sadd.s32 4294967295, %s6880_s21   ;;  %s8582_s26 = sld [smem:[#allocation47_spill]]  ;;  %vm5138_vm1 = vcmask 7168  }
  0xd9   : > { %1199 = vmatprep.subr.bf16.mxu0 %v6195_v36  ;;  %5861 = vmatprep.subr.bf16.mxu1 %v6195_v36  ;;  %786 = vst.msk [vmem:[#allocation3 + $0x8] sm:$0xff] %vm766_vm0, %v6201_v40  ;;  %v6205_v43 = vld [vmem:[#allocation13 + $0x34] ss:$8 sps:$4 sm:$0xff]   ;;  %806 = vst.msk [vmem:[#allocation3 + $0x10] sm:$0xff] %vm766_vm0, %v6202_v41  ;;  %v6206_v44 = vld [vmem:[%s7219_s6 + $0x28] sm:$0xff]   ;;  %s5284_s17 = sshll.u32 %s8581_s15, 1 }
  0xda   : > { %v6207_v45 = vld [vmem:[%s7219_s6 + $0x38] sm:$0xff]   ;;  %826 = vst.msk [vmem:[#allocation3 + $0x18] sm:$0xff] %vm766_vm0, %v6206_v44  ;;  %v6211_v48 = vld [vmem:[#allocation13 + $0x44] ss:$8 sps:$4 sm:$0xff]   ;;  %776 = vst.msk [vmem:[#allocation2] sm:$0xff] %vm766_vm0, %v6208_v46  ;;  %p760_p6 = scmp.lt.s32.totalorder %s5284_s17, 3 }
  0xdb   : > { %v6203_v47 = vld [vmem:[#allocation13 + $0x30] ss:$8 sps:$4 sm:$0xff]   ;;  %846 = vst.msk [vmem:[#allocation3 + $0x20] sm:$0xff] %vm766_vm0, %v6207_v45  ;;  %v6213_v50 = vld [vmem:[%s7219_s6 + $0x20] sm:$0xff]   ;;  %v6222_v6 = vld [vmem:[#allocation13 + $0x54] ss:$8 sps:$4 sm:$0xff]  }
  0xdc   : > { %1200 = vmatpush1.bf16.msra.mxu0 %v6197_v37  ;;  %5863 = vmatpush1.bf16.msra.mxu1 %v6197_v37  ;;  %v6212_v49 = vld [vmem:[%s7219_s6 + $0x10] sm:$0xff]   ;;  %816 = vst.msk [vmem:[#allocation2 + $0x10] sm:$0xff] %vm766_vm0, %v6213_v50  ;;  %v6215_v53 = vld [vmem:[%s7219_s6 + $0x40] sm:$0xff]   ;;  %v6230_v11 = vld [vmem:[%s7219_s6 + $0x48] sm:$0xff]   ;;  %s8588_s17 = smov (!%p760_p6, %s5284_s17), 3 }
  0xdd   : > { %v1087_v39 = vld [vmem:[#allocation3] sm:$0xff]  ;;  %1458 = vmatprep.subr.bf16.mxu0 %v6200_v38  ;;  %796 = vst.msk [vmem:[#allocation2 + $0x8] sm:$0xff] %vm766_vm0, %v6212_v49  ;;  %856 = vst.msk [vmem:[#allocation2 + $0x20] sm:$0xff] %vm766_vm0, %v6215_v53  ;;  %v6217_v55 = vld [vmem:[%s7219_s6 + $0x60] sm:$0xff]   ;;  %s5285_s10 = sshll.u32 %s8588_s17, 3 }
  0xde   : > { %v6214_v52 = vld [vmem:[%s7219_s6 + $0x30] sm:$0xff]   ;;  %896 = vst.msk [vmem:[#allocation2 + $0x30] sm:$0xff] %vm766_vm0, %v6217_v55  ;;  %v6219_v57 = vld [vmem:[%s7219_s6 + $0x80] sm:$0xff]   ;;  %866 = vst.msk [vmem:[#allocation3 + $0x28] sm:$0xff] %vm766_vm0, %v6230_v11  ;;  %s763_s14 = scalar_lea.vmem %s8582_s26, %s5285_s10 }
  0xdf   : > { %5384 = vmatmul.mubr.msk.bf16.vlgmr.msra.gmra.mrb[0].mxu0 %vm766_vm0, %v1087_v39  ;;  %836 = vst.msk [vmem:[#allocation2 + $0x18] sm:$0xff] %vm766_vm0, %v6214_v52  ;;  %v6216_v54 = vld [vmem:[%s7219_s6 + $0x50] sm:$0xff]   ;;  %936 = vst.msk [vmem:[#allocation2 + $0x40] sm:$0xff] %vm766_vm0, %v6219_v57  ;;  %v6224_v60 = vld [vmem:[%s7219_s6 + $0xa0] sm:$0xff]  }
  0xe0   : > { %1459 = vmatpush1.bf16.msra.mxu0 %v6198_v42  ;;  %1239 = vmatprep.mubr.bf16.mxu0 %v8522_v33  ;;  %v7256_v51 = vld [vmem:[#allocation3 + $0x8] sm:$0xff]  ;;  %876 = vst.msk [vmem:[#allocation2 + $0x28] sm:$0xff] %vm766_vm0, %v6216_v54  ;;  %v6218_v56 = vld [vmem:[%s7219_s6 + $0x70] sm:$0xff]   ;;  %v7273_v58 = vld [vmem:[#allocation3 + $0x10] sm:$0xff] }
  0xe1   : > { %1460 = vmatprep.subr.bf16.mxu0 %v6205_v43  ;;  %916 = vst.msk [vmem:[#allocation2 + $0x38] sm:$0xff] %vm766_vm0, %v6218_v56  ;;  %v6223_v59 = vld [vmem:[%s7219_s6 + $0x90] sm:$0xff]   ;;  %976 = vst.msk [vmem:[#allocation2 + $0x50] sm:$0xff] %vm766_vm0, %v6224_v60  ;;  %v6226_v62 = vld [vmem:[%s7219_s6 + $0xc0] sm:$0xff]  }
  0xe2   : > { %956 = vst.msk [vmem:[#allocation2 + $0x48] sm:$0xff] %vm766_vm0, %v6223_v59  ;;  %v6225_v61 = vld [vmem:[%s7219_s6 + $0xb0] sm:$0xff]   ;;  %1016 = vst.msk [vmem:[#allocation2 + $0x60] sm:$0xff] %vm766_vm0, %v6226_v62  ;;  %v6228_v1 = vld [vmem:[%s7219_s6 + $0xe0] sm:$0xff]  }
  0xe3   : > { %996 = vst.msk [vmem:[#allocation2 + $0x58] sm:$0xff] %vm766_vm0, %v6225_v61  ;;  %v7286_v63 = vld [vmem:[#allocation3 + $0x18] sm:$0xff]  ;;  %1056 = vst.msk [vmem:[#allocation2 + $0x70] sm:$0xff] %vm766_vm0, %v6228_v1  ;;  %v7298_v3 = vld [vmem:[#allocation3 + $0x20] sm:$0xff] }
  0xe4   : > { %1461 = vmatpush1.bf16.msra.mxu0 %v6203_v47  ;;  %v6227_v0 = vld [vmem:[%s7219_s6 + $0xd0] sm:$0xff]   ;;  %v6209_v5 = vld [vmem:[#allocation13 + $0x40] ss:$8 sps:$4 sm:$0xff]   ;;  %v6231_v13 = vld [vmem:[%s7219_s6 + $0x58] sm:$0xff]  }
  0xe5   : > { %1679 = vmatprep.subr.bf16.mxu0 %v6211_v48  ;;  %1036 = vst.msk [vmem:[#allocation2 + $0x68] sm:$0xff] %vm766_vm0, %v6227_v0  ;;  %v6229_v2 = vld [vmem:[%s7219_s6 + $0xf0] sm:$0xff]   ;;  %v1104_v8 = vld [vmem:[#allocation2 + $0x8] sm:$0xff]  ;;  %v1105_v9 = vld [vmem:[#allocation2 + $0x10] sm:$0xff] }
  0xe6   : > { %1076 = vst.msk [vmem:[#allocation2 + $0x78] sm:$0xff] %vm766_vm0, %v6229_v2  ;;  %v1103_v4 = vld [vmem:[#allocation2] sm:$0xff]  ;;  %v1106_v10 = vld [vmem:[#allocation2 + $0x18] sm:$0xff]  ;;  %v7314_v14 = vld [vmem:[#allocation3 + $0x28] sm:$0xff] }
  0xe7   : > { %5385 = vmatmul.mubr.msk.bf16.gmra.mrb[4].mxu0 %vm766_vm0, %v7256_v51  ;;  %v6220_v7 = vld [vmem:[#allocation13 + $0x50] ss:$8 sps:$4 sm:$0xff]   ;;  %5389 = vmatmul.mubr.msk.bf16.vlgmr.msra.gmra.mrb[0].mxu1 %vm766_vm0, %v7314_v14  ;;  %886 = vst.msk [vmem:[#allocation3 + $0x30] sm:$0xff] %vm766_vm0, %v6231_v13  ;;  %v1108_v15 = vld [vmem:[#allocation2 + $0x28] sm:$0xff]  ;;  %v6232_v16 = vld [vmem:[%s7219_s6 + $0x68] sm:$0xff]  }
  0xe8   : > { %1249 = vmatprep.mubr.bf16.mxu0 %v8522_v33  ;;  %v1107_v12 = vld [vmem:[#allocation2 + $0x20] sm:$0xff]  ;;  %1289 = vmatprep.mubr.bf16.mxu1 %v8522_v33  ;;  %906 = vst.msk [vmem:[#allocation3 + $0x38] sm:$0xff] %vm766_vm0, %v6232_v16  ;;  %v1109_v18 = vld [vmem:[#allocation2 + $0x30] sm:$0xff]  ;;  %v1110_v21 = vld [vmem:[#allocation2 + $0x38] sm:$0xff] }
  0xe9   : > { %v6233_v19 = vld [vmem:[%s7219_s6 + $0x78] sm:$0xff]   ;;  %v6234_v22 = vld [vmem:[%s7219_s6 + $0x88] sm:$0xff]  }
  0xea   : > { %926 = vst.msk [vmem:[#allocation3 + $0x40] sm:$0xff] %vm766_vm0, %v6233_v19  ;;  %946 = vst.msk [vmem:[#allocation3 + $0x48] sm:$0xff] %vm766_vm0, %v6234_v22  ;;  %v1111_v24 = vld [vmem:[#allocation2 + $0x40] sm:$0xff]  ;;  %v1112_v27 = vld [vmem:[#allocation2 + $0x48] sm:$0xff] }
  0xeb   : > { %v6235_v25 = vld [vmem:[%s7219_s6 + $0x98] sm:$0xff]   ;;  %v6236_v28 = vld [vmem:[%s7219_s6 + $0xa8] sm:$0xff]  }
  0xec   : > { %966 = vst.msk [vmem:[#allocation3 + $0x50] sm:$0xff] %vm766_vm0, %v6235_v25  ;;  %986 = vst.msk [vmem:[#allocation3 + $0x58] sm:$0xff] %vm766_vm0, %v6236_v28  ;;  %v1113_v30 = vld [vmem:[#allocation2 + $0x50] sm:$0xff]  ;;  %v6237_v31 = vld [vmem:[%s7219_s6 + $0xb8] sm:$0xff]  }
  0xed   : > { %1006 = vst.msk [vmem:[#allocation3 + $0x60] sm:$0xff] %vm766_vm0, %v6237_v31  ;;  %v1114_v34 = vld [vmem:[#allocation2 + $0x58] sm:$0xff]  ;;  %v1115_v37 = vld [vmem:[#allocation2 + $0x60] sm:$0xff]  ;;  %v1116_v40 = vld [vmem:[#allocation2 + $0x68] sm:$0xff] }
  0xee   : > { %v7323_v17 = vld [vmem:[#allocation3 + $0x30] sm:$0xff]  ;;  %v6239_v38 = vld [vmem:[%s7219_s6 + $0xd8] sm:$0xff]   ;;  %v1118_v46 = vld [vmem:[#allocation2 + $0x78] sm:$0xff] }
  0xef   : > { %5386 = vmatmul.mubr.msk.bf16.gmra.mrb[8].mxu0 %vm766_vm0, %v7273_v58  ;;  %5390 = vmatmul.mubr.msk.bf16.gmra.mrb[4].mxu1 %vm766_vm0, %v7323_v17  ;;  %v7332_v20 = vld [vmem:[#allocation3 + $0x38] sm:$0xff]  ;;  %1046 = vst.msk [vmem:[#allocation3 + $0x70] sm:$0xff] %vm766_vm0, %v6239_v38  ;;  %v1117_v43 = vld [vmem:[#allocation2 + $0x70] sm:$0xff]  ;;  %v6241_v44 = vld [vmem:[%s7219_s6 + $0xf8] sm:$0xff]  }
  0xf0   : > { %1259 = vmatprep.mubr.bf16.mxu0 %v8522_v33  ;;  %1299 = vmatprep.mubr.bf16.mxu1 %v8522_v33  ;;  %v6238_v35 = vld [vmem:[%s7219_s6 + $0xc8] sm:$0xff]   ;;  %1086 = vst.msk [vmem:[#allocation3 + $0x80] sm:$0xff] %vm766_vm0, %v6241_v44  ;;  %v6242_v47 = vld [vmem:[%s8507_s3] ss:$8 sps:$4 sm:$0xff]   ;;  %v6244_v48 = vld [vmem:[%s8507_s3 + $0x4] ss:$8 sps:$4 sm:$0xff]  }
  0xf1   : > { %v7341_v23 = vld [vmem:[#allocation3 + $0x40] sm:$0xff]  ;;  %v7350_v26 = vld [vmem:[#allocation3 + $0x48] sm:$0xff]  ;;  %1026 = vst.msk [vmem:[#allocation3 + $0x68] sm:$0xff] %vm766_vm0, %v6238_v35  ;;  %v6240_v41 = vld [vmem:[%s7219_s6 + $0xe8] sm:$0xff]   ;;  %2479 = vmatprep.subr.bf16.mxu1 %v6244_v48 }
  0xf2   : > { %1066 = vst.msk [vmem:[#allocation3 + $0x78] sm:$0xff] %vm766_vm0, %v6240_v41  ;;  %v6247_v49 = vld [vmem:[%s8507_s3 + $0x14] ss:$8 sps:$4 sm:$0xff]   ;;  %2480 = vmatpush1.bf16.msra.mxu1 %v6242_v47  ;;  %v6245_v50 = vld [vmem:[%s8507_s3 + $0x10] ss:$8 sps:$4 sm:$0xff]  }
  0xf3   : > { %v7359_v29 = vld [vmem:[#allocation3 + $0x50] sm:$0xff]  ;;  %v7368_v32 = vld [vmem:[#allocation3 + $0x58] sm:$0xff]  ;;  %2481 = vmatprep.subr.bf16.mxu1 %v6247_v49  ;;  %v6250_v52 = vld [vmem:[%s8507_s3 + $0x24] ss:$8 sps:$4 sm:$0xff]  }
  0xf4   : > { %v7377_v36 = vld [vmem:[#allocation3 + $0x60] sm:$0xff]  ;;  %v6253_v54 = vld [vmem:[%s8507_s3 + $0x34] ss:$8 sps:$4 sm:$0xff]   ;;  %v6251_v55 = vld [vmem:[%s8507_s3 + $0x30] ss:$8 sps:$4 sm:$0xff]  }
  0xf5   : > { %v6248_v53 = vld [vmem:[%s8507_s3 + $0x20] ss:$8 sps:$4 sm:$0xff]   ;;  %v6256_v56 = vld [vmem:[%s8507_s3 + $0x44] ss:$8 sps:$4 sm:$0xff]   ;;  %v6259_v57 = vld [vmem:[%s8507_s3 + $0x54] ss:$8 sps:$4 sm:$0xff]  }
  0xf6   : > { %v7395_v42 = vld [vmem:[#allocation3 + $0x70] sm:$0xff]  ;;  %2482 = vmatpush1.bf16.msra.mxu1 %v6245_v50  ;;  %v6262_v60 = vld [vmem:[%s8507_s3 + $0x64] ss:$8 sps:$4 sm:$0xff]   ;;  %v6290_v31 = vld [vmem:[%s8507_s3 + $0x100] ss:$8 sps:$4 sm:$0xff]  }
  0xf7   : > { %5387 = vmatmul.mubr.msk.bf16.gmra.mrb[12].mxu0 %vm766_vm0, %v7286_v63  ;;  %5391 = vmatmul.mubr.msk.bf16.gmra.mrb[8].mxu1 %vm766_vm0, %v7332_v20  ;;  %v6257_v59 = vld [vmem:[%s8507_s3 + $0x50] ss:$8 sps:$4 sm:$0xff]   ;;  %v6265_v61 = vld [vmem:[%s8507_s3 + $0x74] ss:$8 sps:$4 sm:$0xff]   ;;  %v6268_v0 = vld [vmem:[%s8507_s3 + $0x84] ss:$8 sps:$4 sm:$0xff]  }
  0xf8   : > { %1269 = vmatprep.mubr.bf16.mxu0 %v8522_v33  ;;  %1309 = vmatprep.mubr.bf16.mxu1 %v8522_v33  ;;  %v7386_v39 = vld [vmem:[#allocation3 + $0x68] sm:$0xff]  ;;  %v6263_v62 = vld [vmem:[%s8507_s3 + $0x70] ss:$8 sps:$4 sm:$0xff]   ;;  %v6271_v1 = vld [vmem:[%s8507_s3 + $0x94] ss:$8 sps:$4 sm:$0xff]  }
  0xf9   : > { %v7404_v45 = vld [vmem:[#allocation3 + $0x78] sm:$0xff]  ;;  %2483 = vmatprep.subr.bf16.mxu1 %v6250_v52  ;;  %v6286_v11 = vld [vmem:[%s8507_s3 + $0xe4] ss:$8 sps:$4 sm:$0xff]   ;;  %v6302_v48 = vld [vmem:[%s8507_s3 + $0x140] ss:$8 sps:$4 sm:$0xff]  }
  0xfa   : > { %2484 = vmatpush1.bf16.msra.mxu1 %v6248_v53  ;;  %v6269_v2 = vld [vmem:[%s8507_s3 + $0x90] ss:$8 sps:$4 sm:$0xff]   ;;  %v6289_v13 = vld [vmem:[%s8507_s3 + $0xf4] ss:$8 sps:$4 sm:$0xff]   ;;  %v6298_v38 = vld [vmem:[%s8507_s3 + $0x124] ss:$8 sps:$4 sm:$0xff]  }
  0xfb   : > { %2485 = vmatprep.subr.bf16.mxu1 %v6253_v54  ;;  %v6295_v35 = vld [vmem:[%s8507_s3 + $0x114] ss:$8 sps:$4 sm:$0xff]   ;;  %v6299_v44 = vld [vmem:[%s8507_s3 + $0x130] ss:$8 sps:$4 sm:$0xff]  }
  0xfc   : > { %v6307_v52 = vld [vmem:[%s8507_s3 + $0x154] ss:$8 sps:$4 sm:$0xff]   ;;  %v6305_v53 = vld [vmem:[%s8507_s3 + $0x150] ss:$8 sps:$4 sm:$0xff]  }
  0xfe   : > { %2486 = vmatpush1.bf16.msra.mxu1 %v6251_v55  ;;  %v6310_v55 = vld [vmem:[%s8507_s3 + $0x164] ss:$8 sps:$4 sm:$0xff]  }
  0xff   : > { %5388 = vmatmul.mubr.msk.bf16.gmra.mrb[16].mxu0 %vm766_vm0, %v7298_v3  ;;  %5392 = vmatmul.mubr.msk.bf16.gmra.mrb[12].mxu1 %vm766_vm0, %v7341_v23 }
 0x100   : > { %1490 = vmatprep.mubr.bf16.mxu0 %v8522_v33  ;;  %1319 = vmatprep.mubr.bf16.mxu1 %v8522_v33 }
 0x101   : > { %2487 = vmatprep.subr.bf16.mxu1 %v6256_v56 }
 0x107   : > { %5404 = vmatmul.mubr.msk.bf16.vlgmr.msra.gmra.mrb[0].mxu0 %vm766_vm0, %v1103_v4  ;;  %5393 = vmatmul.mubr.msk.bf16.gmra.mrb[16].mxu1 %vm766_vm0, %v7350_v26  ;;  %v6274_v4 = vld [vmem:[%s8507_s3 + $0xa4] ss:$8 sps:$4 sm:$0xff]  }
 0x108   : > { %1680 = vmatpush1.bf16.msra.mxu0 %v6209_v5  ;;  %1500 = vmatprep.mubr.bf16.mxu0 %v8522_v33  ;;  %v6277_v5 = vld [vmem:[%s8507_s3 + $0xb4] ss:$8 sps:$4 sm:$0xff]  }
 0x109   : > { %1681 = vmatprep.subr.bf16.mxu0 %v6222_v6  ;;  %1329 = vmatprep.mubr.bf16.mxu1 %v8522_v33  ;;  %v6275_v6 = vld [vmem:[%s8507_s3 + $0xb0] ss:$8 sps:$4 sm:$0xff]  }
 0x10c   : > { %1682 = vmatpush1.bf16.msra.mxu0 %v6220_v7  ;;  %v6280_v7 = vld [vmem:[%s8507_s3 + $0xc4] ss:$8 sps:$4 sm:$0xff]  }
 0x10f   : > { %5405 = vmatmul.mubr.msk.bf16.gmra.mrb[4].mxu0 %vm766_vm0, %v1104_v8  ;;  %5394 = vmatmul.mubr.msk.bf16.gmra.mrb[20].mxu1 %vm766_vm0, %v7359_v29  ;;  %v6278_v8 = vld [vmem:[%s8507_s3 + $0xc0] ss:$8 sps:$4 sm:$0xff]  }
 0x110   : > { %1510 = vmatprep.mubr.bf16.mxu0 %v8522_v33  ;;  %1339 = vmatprep.mubr.bf16.mxu1 %v8522_v33 }
 0x117   : > { %5406 = vmatmul.mubr.msk.bf16.gmra.mrb[8].mxu0 %vm766_vm0, %v1105_v9  ;;  %5395 = vmatmul.mubr.msk.bf16.gmra.mrb[24].mxu1 %vm766_vm0, %v7368_v32  ;;  %v6283_v9 = vld [vmem:[%s8507_s3 + $0xd4] ss:$8 sps:$4 sm:$0xff]  }
 0x118   : > { %1520 = vmatprep.mubr.bf16.mxu0 %v8522_v33  ;;  %1349 = vmatprep.mubr.bf16.mxu1 %v8522_v33 }
 0x11f   : > { %5407 = vmatmul.mubr.msk.bf16.gmra.mrb[12].mxu0 %vm766_vm0, %v1106_v10  ;;  %5396 = vmatmul.mubr.msk.bf16.gmra.mrb[28].mxu1 %vm766_vm0, %v7377_v36  ;;  %v6281_v10 = vld [vmem:[%s8507_s3 + $0xd0] ss:$8 sps:$4 sm:$0xff]  }
 0x120   : > { %1530 = vmatprep.mubr.bf16.mxu0 %v8522_v33  ;;  %1359 = vmatprep.mubr.bf16.mxu1 %v8522_v33 }
 0x127   : > { %5408 = vmatmul.mubr.msk.bf16.gmra.mrb[16].mxu0 %vm766_vm0, %v1107_v12  ;;  %5397 = vmatmul.mubr.msk.bf16.gmra.mrb[32].mxu1 %vm766_vm0, %v7386_v39  ;;  %v6284_v12 = vld [vmem:[%s8507_s3 + $0xe0] ss:$8 sps:$4 sm:$0xff]  }
 0x128   : > { %1540 = vmatprep.mubr.bf16.mxu0 %v8522_v33  ;;  %1369 = vmatprep.mubr.bf16.mxu1 %v8522_v33 }
 0x12f   : > { %5409 = vmatmul.mubr.msk.bf16.gmra.mrb[20].mxu0 %vm766_vm0, %v1108_v15  ;;  %5398 = vmatmul.mubr.msk.bf16.gmra.mrb[36].mxu1 %vm766_vm0, %v7395_v42  ;;  %v1119_v15 = vld [vmem:[#allocation3 + $0x80] sm:$0xff] }
 0x130   : > { %1550 = vmatprep.mubr.bf16.mxu0 %v8522_v33  ;;  %1379 = vmatprep.mubr.bf16.mxu1 %v8522_v33 }
 0x137   : > { %5410 = vmatmul.mubr.msk.bf16.gmra.mrb[24].mxu0 %vm766_vm0, %v1109_v18  ;;  %5399 = vmatmul.mubr.msk.bf16.gmra.mrb[40].mxu1 %vm766_vm0, %v7404_v45 }
 0x138   : > { %1560 = vmatprep.mubr.bf16.mxu0 %v8522_v33  ;;  %2511 = vmatprep.mubr.bf16.mxu1 %v8522_v33 }
 0x13f   : > { %5411 = vmatmul.mubr.msk.bf16.gmra.mrb[28].mxu0 %vm766_vm0, %v1110_v21 }
 0x140   : > { %1570 = vmatprep.mubr.bf16.mxu0 %v8522_v33 }
 0x147   : > { %5412 = vmatmul.mubr.msk.bf16.gmra.mrb[32].mxu0 %vm766_vm0, %v1111_v24 }
 0x148   : > { %1580 = vmatprep.mubr.bf16.mxu0 %v8522_v33 }
 0x14f   : > { %5413 = vmatmul.mubr.msk.bf16.gmra.mrb[36].mxu0 %vm766_vm0, %v1112_v27 }
 0x150   : > { %1590 = vmatprep.mubr.bf16.mxu0 %v8522_v33 }
 0x157   : > { %5414 = vmatmul.mubr.msk.bf16.gmra.mrb[40].mxu0 %vm766_vm0, %v1113_v30 }
 0x158   : > { %1600 = vmatprep.mubr.bf16.mxu0 %v8522_v33 }
 0x15f   : > { %5415 = vmatmul.mubr.msk.bf16.gmra.mrb[44].mxu0 %vm766_vm0, %v1114_v34 }
 0x160   : > { %1610 = vmatprep.mubr.bf16.mxu0 %v8522_v33 }
 0x167   : > { %5416 = vmatmul.mubr.msk.bf16.gmra.mrb[48].mxu0 %vm766_vm0, %v1115_v37 }
 0x168   : > { %1620 = vmatprep.mubr.bf16.mxu0 %v8522_v33 }
 0x16f   : > { %5417 = vmatmul.mubr.msk.bf16.gmra.mrb[52].mxu0 %vm766_vm0, %v1116_v40  ;;  %v6296_v40 = vld [vmem:[%s8507_s3 + $0x120] ss:$8 sps:$4 sm:$0xff]  }
 0x170   : > { %1630 = vmatprep.mubr.bf16.mxu0 %v8522_v33 }
 0x177   : > { %5418 = vmatmul.mubr.msk.bf16.gmra.mrb[56].mxu0 %vm766_vm0, %v1117_v43  ;;  %v6301_v43 = vld [vmem:[%s8507_s3 + $0x134] ss:$8 sps:$4 sm:$0xff]  }
 0x178   : > { %1640 = vmatprep.mubr.bf16.mxu0 %v8522_v33 }
 0x17f   : > { %5419 = vmatmul.mubr.msk.bf16.gmra.mrb[60].mxu0 %vm766_vm0, %v1118_v46  ;;  %v6304_v46 = vld [vmem:[%s8507_s3 + $0x144] ss:$8 sps:$4 sm:$0xff]  }
 0x180   : > { %1711 = vmatprep.mubr.bf16.mxu0 %v8522_v33 }
 0x187   : > { %5424 = vmatmul.mubr.msk.bf16.vlgmr.msra.gmra.mrb[0].mxu0 %vm766_vm0, %v7256_v51  ;;  %v6254_v51 = vld [vmem:[%s8507_s3 + $0x40] ss:$8 sps:$4 sm:$0xff]  }
 0x188   : > { %1721 = vmatprep.mubr.bf16.mxu0 %v8522_v33  ;;  %2488 = vmatpush1.bf16.msra.mxu1 %v6254_v51  ;;  %v6308_v51 = vld [vmem:[%s8507_s3 + $0x160] ss:$8 sps:$4 sm:$0xff]  }
 0x189   : > { %2489 = vmatprep.subr.bf16.mxu1 %v6259_v57 }
 0x18c   : > { %2490 = vmatpush1.bf16.msra.mxu1 %v6257_v59 }
 0x18d   : > { %2491 = vmatprep.subr.bf16.mxu1 %v6262_v60  ;;  %v6313_v60 = vld [vmem:[%s8507_s3 + $0x174] ss:$8 sps:$4 sm:$0xff]  }
 0x18f   : > { %5425 = vmatmul.mubr.msk.bf16.gmra.mrb[4].mxu0 %vm766_vm0, %v7273_v58  ;;  %v6260_v58 = vld [vmem:[%s8507_s3 + $0x60] ss:$8 sps:$4 sm:$0xff]  }
 0x190   : > { %1731 = vmatprep.mubr.bf16.mxu0 %v8522_v33  ;;  %2492 = vmatpush1.bf16.msra.mxu1 %v6260_v58  ;;  %v6311_v58 = vld [vmem:[%s8507_s3 + $0x170] ss:$8 sps:$4 sm:$0xff]  }
 0x191   : > { %2493 = vmatprep.subr.bf16.mxu1 %v6265_v61 }
 0x194   : > { %2494 = vmatpush1.bf16.msra.mxu1 %v6263_v62  ;;  %v6316_v62 = vld [vmem:[%s8507_s3 + $0x184] ss:$8 sps:$4 sm:$0xff]  }
 0x195   : > { %2495 = vmatprep.subr.bf16.mxu1 %v6268_v0 }
 0x197   : > { %5426 = vmatmul.mubr.msk.bf16.gmra.mrb[8].mxu0 %vm766_vm0, %v7286_v63  ;;  %v6266_v63 = vld [vmem:[%s8507_s3 + $0x80] ss:$8 sps:$4 sm:$0xff]  }
 0x198   : > { %1741 = vmatprep.mubr.bf16.mxu0 %v8522_v33  ;;  %2496 = vmatpush1.bf16.msra.mxu1 %v6266_v63  ;;  %v6314_v63 = vld [vmem:[%s8507_s3 + $0x180] ss:$8 sps:$4 sm:$0xff]  }
 0x199   : > { %2497 = vmatprep.subr.bf16.mxu1 %v6271_v1 }
 0x19c   : > { %2498 = vmatpush1.bf16.msra.mxu1 %v6269_v2 }
 0x19d   : > { %2499 = vmatprep.subr.bf16.mxu1 %v6274_v4  ;;  %v6319_v4 = vld [vmem:[%s8507_s3 + $0x194] ss:$8 sps:$4 sm:$0xff]  }
 0x19f   : > { %5427 = vmatmul.mubr.msk.bf16.gmra.mrb[12].mxu0 %vm766_vm0, %v7298_v3  ;;  %v6272_v3 = vld [vmem:[%s8507_s3 + $0xa0] ss:$8 sps:$4 sm:$0xff]  }
 0x1a0   : > { %1751 = vmatprep.mubr.bf16.mxu0 %v8522_v33  ;;  %2500 = vmatpush1.bf16.msra.mxu1 %v6272_v3  ;;  %v6317_v3 = vld [vmem:[%s8507_s3 + $0x190] ss:$8 sps:$4 sm:$0xff]  }
 0x1a1   : > { %2501 = vmatprep.subr.bf16.mxu1 %v6277_v5 }
 0x1a4   : > { %2502 = vmatpush1.bf16.msra.mxu1 %v6275_v6  ;;  %v6322_v6 = vld [vmem:[%s8507_s3 + $0x1a4] ss:$8 sps:$4 sm:$0xff]  }
 0x1a5   : > { %2503 = vmatprep.subr.bf16.mxu1 %v6280_v7 }
 0x1a7   : > { %5428 = vmatmul.mubr.msk.bf16.gmra.mrb[16].mxu0 %vm766_vm0, %v7314_v14  ;;  %v6287_v14 = vld [vmem:[%s8507_s3 + $0xf0] ss:$8 sps:$4 sm:$0xff]  }
 0x1a8   : > { %1761 = vmatprep.mubr.bf16.mxu0 %v8522_v33  ;;  %2504 = vmatpush1.bf16.msra.mxu1 %v6278_v8  ;;  %v6320_v8 = vld [vmem:[%s8507_s3 + $0x1a0] ss:$8 sps:$4 sm:$0xff]  }
 0x1a9   : > { %2505 = vmatprep.subr.bf16.mxu1 %v6283_v9 }
 0x1ac   : > { %2506 = vmatpush1.bf16.msra.mxu1 %v6281_v10 }
 0x1ad   : > { %2507 = vmatprep.subr.bf16.mxu1 %v6286_v11  ;;  %v6325_v11 = vld [vmem:[%s8507_s3 + $0x1b4] ss:$8 sps:$4 sm:$0xff]  }
 0x1af   : > { %5429 = vmatmul.mubr.msk.bf16.gmra.mrb[20].mxu0 %vm766_vm0, %v7323_v17 }
 0x1b0   : > { %1771 = vmatprep.mubr.bf16.mxu0 %v8522_v33  ;;  %2508 = vmatpush1.bf16.msra.mxu1 %v6284_v12  ;;  %v6323_v12 = vld [vmem:[%s8507_s3 + $0x1b0] ss:$8 sps:$4 sm:$0xff]  }
 0x1b1   : > { %2509 = vmatprep.subr.bf16.mxu1 %v6289_v13  ;;  %v6328_v13 = vld [vmem:[%s8507_s3 + $0x1c4] ss:$8 sps:$4 sm:$0xff]  }
 0x1b4   : > { %2510 = vmatpush1.bf16.msra.mxu1 %v6287_v14  ;;  %v6326_v14 = vld [vmem:[%s8507_s3 + $0x1c0] ss:$8 sps:$4 sm:$0xff]  }
 0x1b7   : > { %5430 = vmatmul.mubr.msk.bf16.gmra.mrb[24].mxu0 %vm766_vm0, %v7332_v20  ;;  %2512 = vmatmul.mubr.bf16.vlgmr.msra.gmra.mrb[44].mxu1 %v8522_v33 }
 0x1b8   : > { %1781 = vmatprep.mubr.bf16.mxu0 %v8522_v33 }
 0x1ba   : > { %v7557_v16 = vpop.f32.mrb[0].mxu1 }
 0x1bb   : > { %v7559_v17 = vpop.f32.mrb[1].mxu1 }
 0x1bc   : > { %v7562_v18 = vpop.f32.mrb[2].mxu1 }
 0x1bd   : > { %v7564_v19 = vpop.f32.mrb[3].mxu1 }
 0x1bf   : > { %5431 = vmatmul.mubr.msk.bf16.gmra.mrb[28].mxu0 %vm766_vm0, %v7341_v23 }
 0x1c0   : > { %1791 = vmatprep.mubr.bf16.mxu0 %v8522_v33 }
 0x1c2   : > { %v7566_v20 = vpop.f32.mrb[4].mxu1 }
 0x1c3   : > { %v7568_v21 = vpop.f32.mrb[5].mxu1 }
 0x1c4   : > { %v7570_v22 = vpop.f32.mrb[6].mxu1 }
 0x1c5   : > { %v7572_v23 = vpop.f32.mrb[7].mxu1 }
 0x1c7   : > { %5432 = vmatmul.mubr.msk.bf16.gmra.mrb[32].mxu0 %vm766_vm0, %v7350_v26 }
 0x1c8   : > { %1801 = vmatprep.mubr.bf16.mxu0 %v8522_v33 }
 0x1ca   : > { %v7574_v24 = vpop.f32.mrb[8].mxu1 }
 0x1cb   : > { %v7576_v25 = vpop.f32.mrb[9].mxu1 }
 0x1cc   : > { %v7578_v26 = vpop.f32.mrb[10].mxu1 }
 0x1cd   : > { %v7580_v27 = vpop.f32.mrb[11].mxu1 }
 0x1cf   : > { %5433 = vmatmul.mubr.msk.bf16.gmra.mrb[36].mxu0 %vm766_vm0, %v7359_v29  ;;  %v6292_v29 = vld [vmem:[%s8507_s3 + $0x104] ss:$8 sps:$4 sm:$0xff]  }
 0x1d0   : > { %1811 = vmatprep.mubr.bf16.mxu0 %v8522_v33  ;;  %2752 = vmatprep.subr.bf16.mxu1 %v6292_v29  ;;  %v1938_v29 = vlaneseq }
 0x1d1   : > { %2753 = vmatpush1.bf16.msra.mxu1 %v6290_v31 }
 0x1d2   : > { %v7582_v28 = vpop.f32.mrb[12].mxu1  ;;  %2754 = vmatprep.subr.bf16.mxu1 %v6295_v35  ;;  %v6331_v35 = vld [vmem:[%s8507_s3 + $0x1d4] ss:$8 sps:$4 sm:$0xff]  }
 0x1d3   : > { %v7587_v30 = vpop.f32.mrb[13].mxu1 }
 0x1d7   : > { %5434 = vmatmul.mubr.msk.bf16.gmra.mrb[40].mxu0 %vm766_vm0, %v7368_v32  ;;  %v7592_v32 = vpop.f32.mrb[14].mxu1 }
 0x1d8   : > { %1821 = vmatprep.mubr.bf16.mxu0 %v8522_v33  ;;  %v7594_v34 = vpop.f32.mrb[15].mxu1 }
 0x1da   : > { %v7602_v37 = vpop.f32.mrb[16].mxu1 }
 0x1df   : > { %5435 = vmatmul.mubr.msk.bf16.gmra.mrb[44].mxu0 %vm766_vm0, %v7377_v36  ;;  %v6293_v36 = vld [vmem:[%s8507_s3 + $0x110] ss:$8 sps:$4 sm:$0xff]  }
 0x1e0   : > { %1831 = vmatprep.mubr.bf16.mxu0 %v8522_v33  ;;  %2755 = vmatpush1.bf16.msra.mxu1 %v6293_v36 }
 0x1e1   : > { %2756 = vmatprep.subr.bf16.mxu1 %v6298_v38  ;;  %v6329_v38 = vld [vmem:[%s8507_s3 + $0x1d0] ss:$8 sps:$4 sm:$0xff]  }
 0x1e4   : > { %2757 = vmatpush1.bf16.msra.mxu1 %v6296_v40 }
 0x1e5   : > { %2758 = vmatprep.subr.bf16.mxu1 %v6301_v43  ;;  %v7722_v43 = vshrl.u32 %v1938_v29, 7 }
 0x1e7   : > { %5436 = vmatmul.mubr.msk.bf16.gmra.mrb[48].mxu0 %vm766_vm0, %v7386_v39  ;;  %v7607_v39 = vpop.f32.mrb[17].mxu1  ;;  %8550 = vst [vmem:[#allocation30_spill] sm:$0xff] %v7722_v43 }
 0x1e8   : > { %1841 = vmatprep.mubr.bf16.mxu0 %v8522_v33  ;;  %v7612_v41 = vpop.f32.mrb[18].mxu1  ;;  %2759 = vmatpush1.bf16.msra.mxu1 %v6299_v44  ;;  %v6334_v44 = vld [vmem:[%s8507_s3 + $0x1e4] ss:$8 sps:$4 sm:$0xff]  }
 0x1e9   : > { %2760 = vmatprep.subr.bf16.mxu1 %v6304_v46  ;;  %v6332_v46 = vld [vmem:[%s8507_s3 + $0x1e0] ss:$8 sps:$4 sm:$0xff]  }
 0x1ec   : > { %2761 = vmatpush1.bf16.msra.mxu1 %v6302_v48 }
 0x1ed   : > { %2762 = vmatprep.subr.bf16.mxu1 %v6307_v52  ;;  %v7733_v52 = vsub.s32 0, %v7722_v43 }
 0x1ef   : > { %5437 = vmatmul.mubr.msk.bf16.gmra.mrb[52].mxu0 %vm766_vm0, %v7395_v42  ;;  %v7614_v42 = vpop.f32.mrb[19].mxu1  ;;  %8552 = vst [vmem:[#allocation32_spill] sm:$0xff] %v7733_v52 }
 0x1f0   : > { %1851 = vmatprep.mubr.bf16.mxu0 %v8522_v33  ;;  %2763 = vmatpush1.bf16.msra.mxu1 %v6305_v53 }
 0x1f1   : > { %2764 = vmatprep.subr.bf16.mxu1 %v6310_v55  ;;  %v6337_v55 = vld [vmem:[%s8507_s3 + $0x1f4] ss:$8 sps:$4 sm:$0xff]  }
 0x1f4   : > { %2765 = vmatpush1.bf16.msra.mxu1 %v6308_v51  ;;  %v1936_v51 = vld [vmem:[#allocation15] sm:$0x3] }
 0x1f5   : > { %2766 = vmatprep.subr.bf16.mxu1 %v6313_v60  ;;  %v7741_v60 = vsub.s32 1, %v7722_v43 }
 0x1f7   : > { %5438 = vmatmul.mubr.msk.bf16.gmra.mrb[56].mxu0 %vm766_vm0, %v7404_v45  ;;  %v7622_v45 = vpop.f32.mrb[20].mxu1  ;;  %8554 = vst [vmem:[#allocation34_spill] sm:$0xff] %v7741_v60 }
 0x1f8   : > { %1861 = vmatprep.mubr.bf16.mxu0 %v8522_v33  ;;  %v7627_v47 = vpop.f32.mrb[21].mxu1  ;;  %2767 = vmatpush1.bf16.msra.mxu1 %v6311_v58 }
 0x1f9   : > { %v7632_v49 = vpop.f32.mrb[22].mxu1  ;;  %2768 = vmatprep.subr.bf16.mxu1 %v6316_v62  ;;  %v6335_v62 = vld [vmem:[%s8507_s3 + $0x1f0] ss:$8 sps:$4 sm:$0xff]  }
 0x1fa   : > { %v7634_v50 = vpop.f32.mrb[23].mxu1 }
 0x1fb   : > { %v7642_v54 = vpop.f32.mrb[24].mxu1 }
 0x1fc   : > { %v7647_v56 = vpop.f32.mrb[25].mxu1  ;;  %2769 = vmatpush1.bf16.msra.mxu1 %v6314_v63 }
 0x1fd   : > { %v7652_v57 = vpop.f32.mrb[26].mxu1  ;;  %2770 = vmatprep.subr.bf16.mxu1 %v6319_v4  ;;  %v7751_v4 = vrot.slane %v1936_v51, %v7733_v52 }
 0x1fe   : > { %v7654_v59 = vpop.f32.mrb[27].mxu1 }
 0x1ff   : > { %5439 = vmatmul.mubr.msk.bf16.gmra.mrb[60].mxu0 %vm766_vm0, %v1119_v15  ;;  %v7662_v61 = vpop.f32.mrb[28].mxu1 }
 0x200   : > { %4529 = vmatprep.mubr.bf16.mxu0 %v8522_v33  ;;  %v7667_v0 = vpop.f32.mrb[29].mxu1  ;;  %2771 = vmatpush1.bf16.msra.mxu1 %v6317_v3  ;;  %v6340_v3 = vld [vmem:[%s8507_s3 + $0x204] ss:$8 sps:$4 sm:$0xff]  }
 0x201   : > { %v7672_v1 = vpop.f32.mrb[30].mxu1  ;;  %2772 = vmatprep.subr.bf16.mxu1 %v6322_v6  ;;  %v7757_v6 = vrot.slane %v1936_v51, %v7741_v60 }
 0x202   : > { %v7674_v2 = vpop.f32.mrb[31].mxu1 }
 0x203   : > { %v7682_v5 = vpop.f32.mrb[32].mxu1 }
 0x204   : > { %v7687_v7 = vpop.f32.mrb[33].mxu1  ;;  %2773 = vmatpush1.bf16.msra.mxu1 %v6320_v8 }
 0x205   : > { %v7692_v9 = vpop.f32.mrb[34].mxu1  ;;  %2774 = vmatprep.subr.bf16.mxu1 %v6325_v11 }
 0x206   : > { %v7694_v10 = vpop.f32.mrb[35].mxu1 }
 0x207   : > { %v7708_v15 = vpop.f32.mrb[36].mxu1 }
 0x208   : > { %2775 = vmatpush1.bf16.msra.mxu1 %v6323_v12  ;;  %v7710_v31 = vpop.f32.mrb[37].mxu1 }
 0x209   : > { %2776 = vmatprep.subr.bf16.mxu1 %v6328_v13  ;;  %v7715_v36 = vpop.f32.mrb[38].mxu1 }
 0x20a   : > { %v7720_v40 = vpop.f32.mrb[39].mxu1 }
 0x20b   : > { %8549 = vst [vmem:[#allocation29_spill] sm:$0xff] %v7720_v40  ;;  %v7730_v48 = vpop.f32.mrb[40].mxu1 }
 0x20c   : > { %2777 = vmatpush1.bf16.msra.mxu1 %v6326_v14  ;;  %8551 = vst [vmem:[#allocation31_spill] sm:$0xff] %v7730_v48  ;;  %v7735_v53 = vpop.f32.mrb[41].mxu1 }
 0x20d   : > { %2778 = vmatprep.subr.bf16.mxu1 %v6331_v35  ;;  %8553 = vst [vmem:[#allocation33_spill] sm:$0xff] %v7735_v53  ;;  %v7743_v58 = vpop.f32.mrb[42].mxu1 }
 0x20e   : > { %8555 = vst [vmem:[#allocation35_spill] sm:$0xff] %v7743_v58  ;;  %v7748_v63 = vpop.f32.mrb[43].mxu1 }
 0x20f   : > { %8556 = vst [vmem:[#allocation36_spill] sm:$0xff] %v7748_v63 }
 0x210   : > { %2779 = vmatpush1.bf16.msra.mxu1 %v6329_v38 }
 0x211   : > { %2780 = vmatprep.subr.bf16.mxu1 %v6334_v44 }
 0x214   : > { %2781 = vmatpush1.bf16.msra.mxu1 %v6332_v46 }
 0x215   : > { %2782 = vmatprep.subr.bf16.mxu1 %v6337_v55 }
 0x218   : > { %2783 = vmatpush1.bf16.msra.mxu1 %v6335_v62 }
 0x219   : > { %3058 = vmatprep.subr.bf16.mxu1 %v6340_v3 }
 0x25a   : > { %v1713_v8 = vpop.f32.mrb[0].mxu0 }
 0x25b   : > { %v1948_v11 = vadd.f32 %v7751_v4, %v1713_v8  ;;  %v1715_v12 = vpop.f32.mrb[1].mxu0 }
 0x25c   : > { %v1949_v13 = vadd.f32 %v7757_v6, %v1715_v12  ;;  %v1717_v14 = vpop.f32.mrb[2].mxu0 }
 0x25d   : > { %v2012_v29 = vmul.f32 0.2, %v1948_v11  ;;  %v1950_v35 = vadd.f32 %v7751_v4, %v1717_v14  ;;  %v1719_v38 = vpop.f32.mrb[3].mxu0 }
 0x25e   : > { %v2013_v44 = vmul.f32 0.2, %v1949_v13  ;;  %v1951_v46 = vadd.f32 %v7757_v6, %v1719_v38 }
 0x25f   : > { %v2014_v55 = vmul.f32 0.2, %v1950_v35  ;;  %v2076_v33 = vmax.f32 %v1948_v11, %v2012_v29 }
 0x260   : > { %v2015_v62 = vmul.f32 0.2, %v1951_v46  ;;  %v2077_v43 = vmax.f32 %v1949_v13, %v2013_v44 }
 0x261   : > { %v2078_v51 = vmax.f32 %v1950_v35, %v2014_v55 }
 0x262   : > { %v2079_v3 = vmax.f32 %v1951_v46, %v2015_v62  ;;  %v1723_v60 = vpop.f32.mrb[4].mxu0 }
 0x263   : > { %v7763_v52 = vpack.c.bf16 %v2078_v51, %v2076_v33  ;;  %v1952_v8 = vadd.f32 %v7751_v4, %v1723_v60  ;;  %v1725_v12 = vpop.f32.mrb[5].mxu0 }
 0x264   : > { %v1953_v63 = vadd.f32 %v7757_v6, %v1725_v12  ;;  %v1727_v58 = vpop.f32.mrb[6].mxu0  ;;  %v7767_v14 = vpack.c.bf16 %v2079_v3, %v2077_v43 }
 0x265   : > { %8557 = vst [vmem:[#allocation37_spill] sm:$0xff] %v7763_v52  ;;  %v2016_v53 = vmul.f32 0.2, %v1952_v8  ;;  %v1954_v38 = vadd.f32 %v7751_v4, %v1727_v58  ;;  %v1729_v48 = vpop.f32.mrb[7].mxu0 }
 0x266   : > { %8558 = vst [vmem:[#allocation38_spill] sm:$0xff] %v7767_v14  ;;  %v2017_v40 = vmul.f32 0.2, %v1953_v63  ;;  %v1955_v11 = vadd.f32 %v7757_v6, %v1729_v48 }
 0x267   : > { %v2018_v13 = vmul.f32 0.2, %v1954_v38  ;;  %v2080_v35 = vmax.f32 %v1952_v8, %v2016_v53 }
 0x268   : > { %v2019_v29 = vmul.f32 0.2, %v1955_v11  ;;  %v2081_v44 = vmax.f32 %v1953_v63, %v2017_v40 }
 0x269   : > { %v2082_v33 = vmax.f32 %v1954_v38, %v2018_v13 }
 0x26a   : > { %v2083_v46 = vmax.f32 %v1955_v11, %v2019_v29  ;;  %v1733_v60 = vpop.f32.mrb[8].mxu0 }
 0x26b   : > { %v1956_v55 = vadd.f32 %v7751_v4, %v1733_v60  ;;  %v1735_v62 = vpop.f32.mrb[9].mxu0  ;;  %v7772_v51 = vpack.c.bf16 %v2082_v33, %v2080_v35 }
 0x26c   : > { %v1957_v43 = vadd.f32 %v7757_v6, %v1735_v62  ;;  %v1737_v3 = vpop.f32.mrb[10].mxu0  ;;  %v7775_v58 = vpack.c.bf16 %v2083_v46, %v2081_v44 }
 0x26d   : > { %8559 = vst [vmem:[#allocation39_spill] sm:$0xff] %v7772_v51  ;;  %v2020_v12 = vmul.f32 0.2, %v1956_v55  ;;  %v1958_v48 = vadd.f32 %v7751_v4, %v1737_v3  ;;  %v1739_v52 = vpop.f32.mrb[11].mxu0 }
 0x26e   : > { %8560 = vst [vmem:[#allocation40_spill] sm:$0xff] %v7775_v58  ;;  %v2021_v14 = vmul.f32 0.2, %v1957_v43  ;;  %v1959_v53 = vadd.f32 %v7757_v6, %v1739_v52  ;;  %2521 = vmatprep.mubr.bf16.mxu1 %v7775_v58 }
 0x26f   : > { %v2022_v40 = vmul.f32 0.2, %v1958_v48  ;;  %2522 = vmatmul.mubr.bf16.gmra.mrb[48].mxu1 %v7772_v51  ;;  %v2084_v8 = vmax.f32 %v1956_v55, %v2020_v12 }
 0x270   : > { %v2023_v63 = vmul.f32 0.2, %v1959_v53  ;;  %v2085_v11 = vmax.f32 %v1957_v43, %v2021_v14 }
 0x271   : > { %v2086_v38 = vmax.f32 %v1958_v48, %v2022_v40 }
 0x272   : > { %v2087_v13 = vmax.f32 %v1959_v53, %v2023_v63  ;;  %v1743_v29 = vpop.f32.mrb[12].mxu0 }
 0x273   : > { %v1960_v35 = vadd.f32 %v7751_v4, %v1743_v29  ;;  %v1745_v33 = vpop.f32.mrb[13].mxu0  ;;  %v7782_v44 = vpack.c.bf16 %v2086_v38, %v2084_v8 }
 0x274   : > { %v1961_v46 = vadd.f32 %v7757_v6, %v1745_v33  ;;  %v1747_v60 = vpop.f32.mrb[14].mxu0  ;;  %v7785_v52 = vpack.c.bf16 %v2087_v13, %v2085_v11 }
 0x275   : > { %8561 = vst [vmem:[#allocation41_spill] sm:$0xff] %v7782_v44  ;;  %v2024_v62 = vmul.f32 0.2, %v1960_v35  ;;  %v1962_v3 = vadd.f32 %v7751_v4, %v1747_v60  ;;  %v1749_v51 = vpop.f32.mrb[15].mxu0 }
 0x276   : > { %8562 = vst [vmem:[#allocation42_spill] sm:$0xff] %v7785_v52  ;;  %v2025_v58 = vmul.f32 0.2, %v1961_v46  ;;  %v1963_v55 = vadd.f32 %v7757_v6, %v1749_v51 }
 0x277   : > { %v2026_v14 = vmul.f32 0.2, %v1962_v3  ;;  %v2088_v12 = vmax.f32 %v1960_v35, %v2024_v62 }
 0x278   : > { %v2027_v43 = vmul.f32 0.2, %v1963_v55  ;;  %v2089_v53 = vmax.f32 %v1961_v46, %v2025_v58 }
 0x279   : > { %v2090_v48 = vmax.f32 %v1962_v3, %v2026_v14 }
 0x27a   : > { %v2091_v40 = vmax.f32 %v1963_v55, %v2027_v43  ;;  %v1753_v63 = vpop.f32.mrb[16].mxu0 }
 0x27b   : > { %v1964_v8 = vadd.f32 %v7751_v4, %v1753_v63  ;;  %v1755_v38 = vpop.f32.mrb[17].mxu0  ;;  %v7790_v29 = vpack.c.bf16 %v2090_v48, %v2088_v12 }
 0x27c   : > { %v1965_v11 = vadd.f32 %v7757_v6, %v1755_v38  ;;  %v1757_v13 = vpop.f32.mrb[18].mxu0  ;;  %v7793_v33 = vpack.c.bf16 %v2091_v40, %v2089_v53 }
 0x27d   : > { %8563 = vst [vmem:[#allocation43_spill] sm:$0xff] %v7790_v29  ;;  %v2028_v60 = vmul.f32 0.2, %v1964_v8  ;;  %v1966_v51 = vadd.f32 %v7751_v4, %v1757_v13  ;;  %v1759_v44 = vpop.f32.mrb[19].mxu0 }
 0x27e   : > { %v2029_v52 = vmul.f32 0.2, %v1965_v11  ;;  %v1967_v35 = vadd.f32 %v7757_v6, %v1759_v44  ;;  %2531 = vmatprep.mubr.bf16.mxu1 %v7793_v33 }
 0x27f   : > { %v2030_v58 = vmul.f32 0.2, %v1966_v51  ;;  %2532 = vmatmul.mubr.bf16.gmra.mrb[52].mxu1 %v7790_v29  ;;  %v2092_v62 = vmax.f32 %v1964_v8, %v2028_v60 }
 0x280   : > { %v2031_v46 = vmul.f32 0.2, %v1967_v35  ;;  %v2093_v55 = vmax.f32 %v1965_v11, %v2029_v52 }
 0x281   : > { %v2094_v3 = vmax.f32 %v1966_v51, %v2030_v58 }
 0x282   : > { %v2095_v14 = vmax.f32 %v1967_v35, %v2031_v46  ;;  %v1763_v43 = vpop.f32.mrb[20].mxu0 }
 0x283   : > { %v5864_v12 = vadd.f32 %v1763_v43, %v7557_v16  ;;  %v1765_v48 = vpop.f32.mrb[21].mxu0  ;;  %v7800_v53 = vpack.c.bf16 %v2094_v3, %v2092_v62 }
 0x284   : > { %v5865_v40 = vadd.f32 %v1765_v48, %v7559_v17  ;;  %v1767_v63 = vpop.f32.mrb[22].mxu0  ;;  %v7803_v44 = vpack.c.bf16 %v2095_v14, %v2093_v55 }
 0x285   : > { %v1968_v38 = vadd.f32 %v5864_v12, %v7751_v4  ;;  %v5866_v13 = vadd.f32 %v1767_v63, %v7562_v18  ;;  %v1769_v29 = vpop.f32.mrb[23].mxu0 }
 0x286   : > { %v1969_v8 = vadd.f32 %v5865_v40, %v7757_v6  ;;  %v5867_v52 = vadd.f32 %v1769_v29, %v7564_v19 }
 0x287   : > { %v2032_v11 = vmul.f32 0.2, %v1968_v38  ;;  %v1970_v16 = vadd.f32 %v5866_v13, %v7751_v4 }
 0x288   : > { %v2033_v60 = vmul.f32 0.2, %v1969_v8  ;;  %v1971_v51 = vadd.f32 %v5867_v52, %v7757_v6 }
 0x289   : > { %v2034_v35 = vmul.f32 0.2, %v1970_v16  ;;  %v2096_v46 = vmax.f32 %v1968_v38, %v2032_v11 }
 0x28a   : > { %v2035_v17 = vmul.f32 0.2, %v1971_v51  ;;  %v1773_v58 = vpop.f32.mrb[24].mxu0  ;;  %v2097_v18 = vmax.f32 %v1969_v8, %v2033_v60 }
 0x28b   : > { %v2098_v62 = vmax.f32 %v1970_v16, %v2034_v35  ;;  %v5868_v3 = vadd.f32 %v1773_v58, %v7566_v20  ;;  %v1775_v55 = vpop.f32.mrb[25].mxu0 }
 0x28c   : > { %v2099_v14 = vmax.f32 %v1971_v51, %v2035_v17  ;;  %v5869_v43 = vadd.f32 %v1775_v55, %v7568_v21  ;;  %v1777_v12 = vpop.f32.mrb[26].mxu0 }
 0x28d   : > { %v1972_v19 = vadd.f32 %v5868_v3, %v7751_v4  ;;  %v5870_v29 = vadd.f32 %v1777_v12, %v7570_v22  ;;  %v1779_v48 = vpop.f32.mrb[27].mxu0  ;;  %v7815_v40 = vpack.c.bf16 %v2098_v62, %v2096_v46 }
 0x28e   : > { %v1973_v63 = vadd.f32 %v5869_v43, %v7757_v6  ;;  %v5871_v38 = vadd.f32 %v1779_v48, %v7572_v23  ;;  %v7819_v13 = vpack.c.bf16 %v2099_v14, %v2097_v18 }
 0x28f   : > { %v2036_v20 = vmul.f32 0.2, %v1972_v19  ;;  %v1974_v8 = vadd.f32 %v5870_v29, %v7751_v4 }
 0x290   : > { %v2037_v52 = vmul.f32 0.2, %v1973_v63  ;;  %v1975_v21 = vadd.f32 %v5871_v38, %v7757_v6  ;;  %2541 = vmatprep.mubr.bf16.mxu1 %v7819_v13 }
 0x291   : > { %v2038_v11 = vmul.f32 0.2, %v1974_v8  ;;  %2542 = vmatmul.mubr.bf16.gmra.mrb[56].mxu1 %v7815_v40  ;;  %v2100_v60 = vmax.f32 %v1972_v19, %v2036_v20 }
 0x292   : > { %v2039_v22 = vmul.f32 0.2, %v1975_v21  ;;  %v1783_v16 = vpop.f32.mrb[28].mxu0  ;;  %v2101_v17 = vmax.f32 %v1973_v63, %v2037_v52 }
 0x293   : > { %v2102_v51 = vmax.f32 %v1974_v8, %v2038_v11  ;;  %v5872_v35 = vadd.f32 %v1783_v16, %v7574_v24  ;;  %v1785_v23 = vpop.f32.mrb[29].mxu0 }
 0x294   : > { %v2103_v58 = vmax.f32 %v1975_v21, %v2039_v22  ;;  %v5873_v46 = vadd.f32 %v1785_v23, %v7576_v25  ;;  %v1787_v62 = vpop.f32.mrb[30].mxu0 }
 0x295   : > { %v1976_v3 = vadd.f32 %v5872_v35, %v7751_v4  ;;  %v5874_v55 = vadd.f32 %v1787_v62, %v7578_v26  ;;  %v1789_v18 = vpop.f32.mrb[31].mxu0  ;;  %v7829_v14 = vpack.c.bf16 %v2102_v51, %v2100_v60 }
 0x296   : > { %v1977_v43 = vadd.f32 %v5873_v46, %v7757_v6  ;;  %v5875_v12 = vadd.f32 %v1789_v18, %v7580_v27  ;;  %v7833_v19 = vpack.c.bf16 %v2103_v58, %v2101_v17 }
 0x297   : > { %v2040_v24 = vmul.f32 0.2, %v1976_v3  ;;  %v1978_v29 = vadd.f32 %v5874_v55, %v7751_v4 }
 0x298   : > { %v2041_v48 = vmul.f32 0.2, %v1977_v43  ;;  %v1979_v25 = vadd.f32 %v5875_v12, %v7757_v6 }
 0x299   : > { %v2042_v63 = vmul.f32 0.2, %v1978_v29  ;;  %v2104_v8 = vmax.f32 %v1976_v3, %v2040_v24 }
 0x29a   : > { %v2043_v38 = vmul.f32 0.2, %v1979_v25  ;;  %v1793_v20 = vpop.f32.mrb[32].mxu0  ;;  %v2105_v11 = vmax.f32 %v1977_v43, %v2041_v48 }
 0x29b   : > { %v2106_v26 = vmax.f32 %v1978_v29, %v2042_v63  ;;  %v5876_v52 = vadd.f32 %v1793_v20, %v7582_v28  ;;  %v1795_v21 = vpop.f32.mrb[33].mxu0 }
 0x29c   : > { %v2107_v22 = vmax.f32 %v1979_v25, %v2043_v38  ;;  %v5877_v27 = vadd.f32 %v1795_v21, %v7587_v30  ;;  %v1797_v16 = vpop.f32.mrb[34].mxu0 }
 0x29d   : > { %v1980_v60 = vadd.f32 %v5876_v52, %v7751_v4  ;;  %v5878_v51 = vadd.f32 %v1797_v16, %v7592_v32  ;;  %v1799_v35 = vpop.f32.mrb[35].mxu0  ;;  %v7841_v23 = vpack.c.bf16 %v2106_v26, %v2104_v8 }
 0x29e   : > { %v1981_v17 = vadd.f32 %v5877_v27, %v7757_v6  ;;  %v5879_v58 = vadd.f32 %v1799_v35, %v7594_v34  ;;  %v7845_v46 = vpack.c.bf16 %v2107_v22, %v2105_v11 }
 0x29f   : > { %v2044_v28 = vmul.f32 0.2, %v1980_v60  ;;  %v1982_v62 = vadd.f32 %v5878_v51, %v7751_v4 }
 0x2a0   : > { %v2045_v3 = vmul.f32 0.2, %v1981_v17  ;;  %v1983_v30 = vadd.f32 %v5879_v58, %v7757_v6  ;;  %2551 = vmatprep.mubr.bf16.mxu1 %v7845_v46 }
 0x2a1   : > { %v2046_v55 = vmul.f32 0.2, %v1982_v62  ;;  %2552 = vmatmul.mubr.bf16.gmra.mrb[60].mxu1 %v7841_v23  ;;  %v2108_v43 = vmax.f32 %v1980_v60, %v2044_v28 }
 0x2a2   : > { %v2047_v32 = vmul.f32 0.2, %v1983_v30  ;;  %v1803_v18 = vpop.f32.mrb[36].mxu0  ;;  %v2109_v29 = vmax.f32 %v1981_v17, %v2045_v3 }
 0x2a3   : > { %v2110_v12 = vmax.f32 %v1982_v62, %v2046_v55  ;;  %v5880_v24 = vadd.f32 %v1803_v18, %v7602_v37  ;;  %v1805_v34 = vpop.f32.mrb[37].mxu0 }
 0x2a4   : > { %v2111_v48 = vmax.f32 %v1983_v30, %v2047_v32  ;;  %v5881_v25 = vadd.f32 %v1805_v34, %v7607_v39  ;;  %v1807_v63 = vpop.f32.mrb[38].mxu0 }
 0x2a5   : > { %v1984_v38 = vadd.f32 %v5880_v24, %v7751_v4  ;;  %v5882_v20 = vadd.f32 %v1807_v63, %v7612_v41  ;;  %v1809_v8 = vpop.f32.mrb[39].mxu0  ;;  %v7855_v26 = vpack.c.bf16 %v2110_v12, %v2108_v43 }
 0x2a6   : > { %v1985_v52 = vadd.f32 %v5881_v25, %v7757_v6  ;;  %v5883_v21 = vadd.f32 %v1809_v8, %v7614_v42  ;;  %v7859_v11 = vpack.c.bf16 %v2111_v48, %v2109_v29 }
 0x2a7   : > { %v2048_v37 = vmul.f32 0.2, %v1984_v38  ;;  %v1986_v22 = vadd.f32 %v5882_v20, %v7751_v4 }
 0x2a8   : > { %v2049_v27 = vmul.f32 0.2, %v1985_v52  ;;  %v1987_v39 = vadd.f32 %v5883_v21, %v7757_v6 }
 0x2a9   : > { %v2050_v16 = vmul.f32 0.2, %v1986_v22  ;;  %v2112_v35 = vmax.f32 %v1984_v38, %v2048_v37 }
 0x2aa   : > { %v2051_v60 = vmul.f32 0.2, %v1987_v39  ;;  %v1813_v51 = vpop.f32.mrb[40].mxu0  ;;  %v2113_v28 = vmax.f32 %v1985_v52, %v2049_v27 }
 0x2ab   : > { %v2114_v41 = vmax.f32 %v1986_v22, %v2050_v16  ;;  %v5884_v17 = vadd.f32 %v1813_v51, %v7622_v45  ;;  %v1815_v58 = vpop.f32.mrb[41].mxu0 }
 0x2ac   : > { %v2115_v62 = vmax.f32 %v1987_v39, %v2051_v60  ;;  %v5885_v42 = vadd.f32 %v1815_v58, %v7627_v47  ;;  %v1817_v3 = vpop.f32.mrb[42].mxu0 }
 0x2ad   : > { %v1988_v30 = vadd.f32 %v5884_v17, %v7751_v4  ;;  %v5886_v55 = vadd.f32 %v1817_v3, %v7632_v49  ;;  %v1819_v32 = vpop.f32.mrb[43].mxu0  ;;  %v7867_v18 = vpack.c.bf16 %v2114_v41, %v2112_v35 }
 0x2ae   : > { %v1989_v43 = vadd.f32 %v5885_v42, %v7757_v6  ;;  %v5887_v12 = vadd.f32 %v1819_v32, %v7634_v50  ;;  %v7871_v24 = vpack.c.bf16 %v2115_v62, %v2113_v28 }
 0x2af   : > { %v2052_v45 = vmul.f32 0.2, %v1988_v30  ;;  %v1990_v34 = vadd.f32 %v5886_v55, %v7751_v4 }
 0x2b0   : > { %v2053_v29 = vmul.f32 0.2, %v1989_v43  ;;  %v1991_v47 = vadd.f32 %v5887_v12, %v7757_v6  ;;  %2561 = vmatprep.mubr.bf16.mxu1 %v7871_v24 }
 0x2b1   : > { %v2054_v48 = vmul.f32 0.2, %v1990_v34  ;;  %2562 = vmatmul.mubr.bf16.gmra.mrb[64].mxu1 %v7867_v18  ;;  %v2116_v63 = vmax.f32 %v1988_v30, %v2052_v45 }
 0x2b2   : > { %v2055_v49 = vmul.f32 0.2, %v1991_v47  ;;  %v1823_v25 = vpop.f32.mrb[44].mxu0  ;;  %v2117_v8 = vmax.f32 %v1989_v43, %v2053_v29 }
 0x2b3   : > { %v2118_v38 = vmax.f32 %v1990_v34, %v2054_v48  ;;  %v5888_v20 = vadd.f32 %v1823_v25, %v7642_v54  ;;  %v1825_v50 = vpop.f32.mrb[45].mxu0 }
 0x2b4   : > { %v2119_v52 = vmax.f32 %v1991_v47, %v2055_v49  ;;  %v5889_v21 = vadd.f32 %v1825_v50, %v7647_v56  ;;  %v1827_v37 = vpop.f32.mrb[46].mxu0 }
 0x2b5   : > { %v1992_v22 = vadd.f32 %v5888_v20, %v7751_v4  ;;  %v5890_v27 = vadd.f32 %v1827_v37, %v7652_v57  ;;  %v1829_v39 = vpop.f32.mrb[47].mxu0  ;;  %v7881_v16 = vpack.c.bf16 %v2118_v38, %v2116_v63 }
 0x2b6   : > { %v1993_v60 = vadd.f32 %v5889_v21, %v7757_v6  ;;  %v5891_v51 = vadd.f32 %v1829_v39, %v7654_v59  ;;  %v7885_v35 = vpack.c.bf16 %v2119_v52, %v2117_v8 }
 0x2b7   : > { %v2056_v54 = vmul.f32 0.2, %v1992_v22  ;;  %v1994_v41 = vadd.f32 %v5890_v27, %v7751_v4 }
 0x2b8   : > { %v2057_v17 = vmul.f32 0.2, %v1993_v60  ;;  %v1995_v56 = vadd.f32 %v5891_v51, %v7757_v6 }
 0x2b9   : > { %v2058_v58 = vmul.f32 0.2, %v1994_v41  ;;  %v2120_v42 = vmax.f32 %v1992_v22, %v2056_v54 }
 0x2ba   : > { %v2059_v28 = vmul.f32 0.2, %v1995_v56  ;;  %v1833_v62 = vpop.f32.mrb[48].mxu0  ;;  %v2121_v55 = vmax.f32 %v1993_v60, %v2057_v17 }
 0x2bb   : > { %v2122_v57 = vmax.f32 %v1994_v41, %v2058_v58  ;;  %v5892_v3 = vadd.f32 %v1833_v62, %v7662_v61  ;;  %v1835_v30 = vpop.f32.mrb[49].mxu0 }
 0x2bc   : > { %v2123_v32 = vmax.f32 %v1995_v56, %v2059_v28  ;;  %v5893_v59 = vadd.f32 %v1835_v30, %v7667_v0  ;;  %v1837_v43 = vpop.f32.mrb[50].mxu0 }
 0x2bd   : > { %v1996_v12 = vadd.f32 %v5892_v3, %v7751_v4  ;;  %v5894_v45 = vadd.f32 %v1837_v43, %v7672_v1  ;;  %v1839_v34 = vpop.f32.mrb[51].mxu0  ;;  %v7893_v29 = vpack.c.bf16 %v2122_v57, %v2120_v42 }
 0x2be   : > { %v1997_v47 = vadd.f32 %v5893_v59, %v7757_v6  ;;  %v5895_v48 = vadd.f32 %v1839_v34, %v7674_v2  ;;  %v7897_v49 = vpack.c.bf16 %v2123_v32, %v2121_v55 }
 0x2bf   : > { %v2060_v61 = vmul.f32 0.2, %v1996_v12  ;;  %v1998_v25 = vadd.f32 %v5894_v45, %v7751_v4 }
 0x2c0   : > { %v2061_v63 = vmul.f32 0.2, %v1997_v47  ;;  %v1999_v0 = vadd.f32 %v5895_v48, %v7757_v6  ;;  %2571 = vmatprep.mubr.bf16.mxu1 %v7897_v49 }
 0x2c1   : > { %v2062_v38 = vmul.f32 0.2, %v1998_v25  ;;  %2572 = vmatmul.mubr.bf16.gmra.mrb[68].mxu1 %v7893_v29  ;;  %v2124_v50 = vmax.f32 %v1996_v12, %v2060_v61  ;;  %v8564_v61 = vld [vmem:[#allocation29_spill] sm:$0xff] }
 0x2c2   : > { %v2063_v1 = vmul.f32 0.2, %v1999_v0  ;;  %v1843_v20 = vpop.f32.mrb[52].mxu0  ;;  %v2125_v21 = vmax.f32 %v1997_v47, %v2061_v63 }
 0x2c3   : > { %v2126_v8 = vmax.f32 %v1998_v25, %v2062_v38  ;;  %v5896_v52 = vadd.f32 %v1843_v20, %v7682_v5  ;;  %v1845_v2 = vpop.f32.mrb[53].mxu0 }
 0x2c4   : > { %v2127_v37 = vmax.f32 %v1999_v0, %v2063_v1  ;;  %v5897_v22 = vadd.f32 %v1845_v2, %v7687_v7  ;;  %v1847_v27 = vpop.f32.mrb[54].mxu0  ;;  %v8566_v2 = vld [vmem:[#allocation31_spill] sm:$0xff] }
 0x2c5   : > { %v2000_v39 = vadd.f32 %v5896_v52, %v7751_v4  ;;  %v5898_v60 = vadd.f32 %v1847_v27, %v7692_v9  ;;  %v1849_v51 = vpop.f32.mrb[55].mxu0  ;;  %v7907_v54 = vpack.c.bf16 %v2126_v8, %v2124_v50  ;;  %v8565_v50 = vld [vmem:[#allocation38_spill] sm:$0xff] }
 0x2c6   : > { %v2001_v41 = vadd.f32 %v5897_v22, %v7757_v6  ;;  %v5899_v17 = vadd.f32 %v1849_v51, %v7694_v10  ;;  %v7911_v56 = vpack.c.bf16 %v2127_v37, %v2125_v21 }
 0x2c7   : > { %v2064_v5 = vmul.f32 0.2, %v2000_v39  ;;  %v2002_v58 = vadd.f32 %v5898_v60, %v7751_v4 }
 0x2c8   : > { %v2065_v28 = vmul.f32 0.2, %v2001_v41  ;;  %v2003_v7 = vadd.f32 %v5899_v17, %v7757_v6  ;;  %v8568_v17 = vld [vmem:[#allocation35_spill] sm:$0xff] }
 0x2c9   : > { %v2066_v62 = vmul.f32 0.2, %v2002_v58  ;;  %v2128_v3 = vmax.f32 %v2000_v39, %v2064_v5  ;;  %v8567_v39 = vld [vmem:[#allocation33_spill] sm:$0xff] }
 0x2ca   : > { %v2067_v42 = vmul.f32 0.2, %v2003_v7  ;;  %v1853_v57 = vpop.f32.mrb[56].mxu0  ;;  %v2129_v32 = vmax.f32 %v2001_v41, %v2065_v28 }
 0x2cb   : > { %v2130_v9 = vmax.f32 %v2002_v58, %v2066_v62  ;;  %v5900_v30 = vadd.f32 %v1853_v57, %v7708_v15  ;;  %v1855_v55 = vpop.f32.mrb[57].mxu0  ;;  %v8569_v62 = vld [vmem:[#allocation36_spill] sm:$0xff] }
 0x2cc   : > { %v2131_v59 = vmax.f32 %v2003_v7, %v2067_v42  ;;  %v5901_v10 = vadd.f32 %v1855_v55, %v7710_v31  ;;  %v1857_v43 = vpop.f32.mrb[58].mxu0  ;;  %v6338_v57 = vld [vmem:[%s8507_s3 + $0x200] ss:$8 sps:$4 sm:$0xff]   ;;  %v6343_v55 = vld [vmem:[%s8507_s3 + $0x214] ss:$8 sps:$4 sm:$0xff]  }
 0x2cd   : > { %v2004_v12 = vadd.f32 %v5900_v30, %v7751_v4  ;;  %v5902_v45 = vadd.f32 %v1857_v43, %v7715_v36  ;;  %v1859_v34 = vpop.f32.mrb[59].mxu0  ;;  %v7919_v47 = vpack.c.bf16 %v2130_v9, %v2128_v3  ;;  %v8570_v43 = vld [vmem:[#allocation37_spill] sm:$0xff] }
 0x2ce   : > { %v2005_v48 = vadd.f32 %v5901_v10, %v7757_v6  ;;  %v5903_v25 = vadd.f32 %v1859_v34, %v8564_v61  ;;  %v7923_v63 = vpack.c.bf16 %v2131_v59, %v2129_v32  ;;  %v6341_v34 = vld [vmem:[%s8507_s3 + $0x210] ss:$8 sps:$4 sm:$0xff]   ;;  %v6346_v61 = vld [vmem:[%s8507_s3 + $0x224] ss:$8 sps:$4 sm:$0xff]  }
 0x2cf   : > { %v2068_v15 = vmul.f32 0.2, %v2004_v12  ;;  %v2006_v0 = vadd.f32 %v5902_v45, %v7751_v4  ;;  %v8571_v45 = vld [vmem:[#allocation42_spill] sm:$0xff] }
 0x2d0   : > { %v2069_v38 = vmul.f32 0.2, %v2005_v48  ;;  %v2007_v31 = vadd.f32 %v5903_v25, %v7757_v6  ;;  %2581 = vmatprep.mubr.bf16.mxu1 %v7923_v63 }
 0x2d1   : > { %v2070_v1 = vmul.f32 0.2, %v2006_v0  ;;  %2582 = vmatmul.mubr.bf16.gmra.mrb[72].mxu1 %v7919_v47  ;;  %v2132_v8 = vmax.f32 %v2004_v12, %v2068_v15 }
 0x2d2   : > { %v2071_v36 = vmul.f32 0.2, %v2007_v31  ;;  %v1863_v20 = vpop.f32.mrb[60].mxu0  ;;  %2784 = vmatprep.mubr.bf16.mxu1 %v8565_v50  ;;  %v2133_v22 = vmax.f32 %v2005_v48, %v2069_v38  ;;  %v6350_v50 = vld [vmem:[%s8507_s3 + $0x240] ss:$8 sps:$4 sm:$0xff]  }
 0x2d3   : > { %v2134_v52 = vmax.f32 %v2006_v0, %v2070_v1  ;;  %v5904_v21 = vadd.f32 %v1863_v20, %v8566_v2  ;;  %v1865_v37 = vpop.f32.mrb[61].mxu0  ;;  %v6344_v0 = vld [vmem:[%s8507_s3 + $0x220] ss:$8 sps:$4 sm:$0xff]   ;;  %v8572_v1 = vld [vmem:[#allocation41_spill] sm:$0xff]  ;;  %v6352_v20 = vld [vmem:[%s8507_s3 + $0x244] ss:$8 sps:$4 sm:$0xff]  }
 0x2d4   : > { %v2135_v27 = vmax.f32 %v2007_v31, %v2071_v36  ;;  %v5905_v60 = vadd.f32 %v1865_v37, %v8567_v39  ;;  %v1867_v51 = vpop.f32.mrb[62].mxu0  ;;  %v6349_v31 = vld [vmem:[%s8507_s3 + $0x234] ss:$8 sps:$4 sm:$0xff]   ;;  %v6347_v36 = vld [vmem:[%s8507_s3 + $0x230] ss:$8 sps:$4 sm:$0xff]  }
 0x2d5   : > { %v2008_v41 = vadd.f32 %v5904_v21, %v7751_v4  ;;  %v5906_v5 = vadd.f32 %v1867_v51, %v8568_v17  ;;  %v1869_v58 = vpop.f32.mrb[63].mxu0  ;;  %v7934_v28 = vpack.c.bf16 %v2134_v52, %v2132_v8  ;;  %v6353_v8 = vld [vmem:[%s8507_s3 + $0x250] ss:$8 sps:$4 sm:$0xff]   ;;  %v6358_v52 = vld [vmem:[%s8507_s3 + $0x264] ss:$8 sps:$4 sm:$0xff]  }
 0x2d6   : > { %v2009_v7 = vadd.f32 %v5905_v60, %v7757_v6  ;;  %v5907_v42 = vadd.f32 %v1869_v58, %v8569_v62  ;;  %v7941_v3 = vpack.c.bf16 %v2135_v27, %v2133_v22  ;;  %v6356_v2 = vld [vmem:[%s8507_s3 + $0x260] ss:$8 sps:$4 sm:$0xff]   ;;  %v6364_v21 = vld [vmem:[%s8507_s3 + $0x284] ss:$8 sps:$4 sm:$0xff]  }
 0x2d7   : > { %v2072_v9 = vmul.f32 0.2, %v2008_v41  ;;  %v2010_v30 = vadd.f32 %v5906_v5, %v7751_v4  ;;  %v6362_v37 = vld [vmem:[%s8507_s3 + $0x280] ss:$8 sps:$4 sm:$0xff]   ;;  %v6370_v22 = vld [vmem:[%s8507_s3 + $0x2a4] ss:$8 sps:$4 sm:$0xff]  }
 0x2d8   : > { %v2073_v32 = vmul.f32 0.2, %v2009_v7  ;;  %v2011_v59 = vadd.f32 %v5907_v42, %v7757_v6  ;;  %v6368_v27 = vld [vmem:[%s8507_s3 + $0x2a0] ss:$8 sps:$4 sm:$0xff]   ;;  %v6376_v39 = vld [vmem:[%s8507_s3 + $0x2c4] ss:$8 sps:$4 sm:$0xff]  }
 0x2d9   : > { %v2074_v10 = vmul.f32 0.2, %v2010_v30  ;;  %2785 = vmatmul.mubr.bf16.vlgmr.msra.gmra.mrb[44].mxu1 %v8570_v43  ;;  %v2136_v48 = vmax.f32 %v2008_v41, %v2072_v9  ;;  %v6374_v60 = vld [vmem:[%s8507_s3 + $0x2c0] ss:$8 sps:$4 sm:$0xff]   ;;  %v6382_v51 = vld [vmem:[%s8507_s3 + $0x2e4] ss:$8 sps:$4 sm:$0xff]  }
 0x2da   : > { %v2075_v12 = vmul.f32 0.2, %v2011_v59  ;;  %2794 = vmatprep.mubr.bf16.mxu1 %v8571_v45  ;;  %3059 = vmatpush1.bf16.msra.mxu1 %v6338_v57  ;;  %v2137_v25 = vmax.f32 %v2009_v7, %v2073_v32  ;;  %v6380_v41 = vld [vmem:[%s8507_s3 + $0x2e0] ss:$8 sps:$4 sm:$0xff]   ;;  %v6383_v5 = vld [vmem:[%s8507_s3 + $0x2f0] ss:$8 sps:$4 sm:$0xff]  }
 0x2db   : > { %v2138_v4 = vmax.f32 %v2010_v30, %v2074_v10  ;;  %3060 = vmatprep.subr.bf16.mxu1 %v6343_v55  ;;  %v8573_v17 = vld [vmem:[#allocation40_spill] sm:$0xff]  ;;  %v8574_v62 = vld [vmem:[#allocation39_spill] sm:$0xff] }
 0x2dc   : > { %v2139_v6 = vmax.f32 %v2011_v59, %v2075_v12  ;;  %v6388_v58 = vld [vmem:[%s8509_s5 + $0x4] ss:$8 sps:$4 sm:$0xff]   ;;  %v6386_v7 = vld [vmem:[%s8509_s5] ss:$8 sps:$4 sm:$0xff]   ;;  %v6389_v42 = vld [vmem:[%s8509_s5 + $0x10] ss:$8 sps:$4 sm:$0xff]  }
 0x2dd   : > { %v7956_v15 = vpack.c.bf16 %v2138_v4, %v2136_v48  ;;  %v6394_v57 = vld [vmem:[%s8509_s5 + $0x24] ss:$8 sps:$4 sm:$0xff]   ;;  %v6395_v30 = vld [vmem:[%s8509_s5 + $0x30] ss:$8 sps:$4 sm:$0xff]   ;;  %v6398_v32 = vld [vmem:[%s8509_s5 + $0x40] ss:$8 sps:$4 sm:$0xff]  }
 0x2de   : > { %3061 = vmatpush1.bf16.msra.mxu1 %v6341_v34  ;;  %v7961_v38 = vpack.c.bf16 %v2139_v6, %v2137_v25  ;;  %v8575_v9 = vld [vmem:[#allocation43_spill] sm:$0xff]  ;;  %v6401_v59 = vld [vmem:[%s8509_s5 + $0x50] ss:$8 sps:$4 sm:$0xff]  }
 0x2df   : > { %3062 = vmatprep.subr.bf16.mxu1 %v6346_v61  ;;  %v6400_v55 = vld [vmem:[%s8509_s5 + $0x44] ss:$8 sps:$4 sm:$0xff]   ;;  %v6404_v43 = vld [vmem:[%s8509_s5 + $0x60] ss:$8 sps:$4 sm:$0xff]  }
 0x2e0   : > { %v6406_v10 = vld [vmem:[%s8509_s5 + $0x64] ss:$8 sps:$4 sm:$0xff]   ;;  %v6410_v45 = vld [vmem:[%s8509_s5 + $0x80] ss:$8 sps:$4 sm:$0xff]  }
 0x2e1   : > { %2795 = vmatmul.mubr.bf16.gmra.mrb[48].mxu1 %v8572_v1  ;;  %v6412_v12 = vld [vmem:[%s8509_s5 + $0x84] ss:$8 sps:$4 sm:$0xff]   ;;  %v6416_v48 = vld [vmem:[%s8509_s5 + $0xa0] ss:$8 sps:$4 sm:$0xff]  }
 0x2e2   : > { %2804 = vmatprep.mubr.bf16.mxu1 %v7803_v44  ;;  %3063 = vmatpush1.bf16.msra.mxu1 %v6344_v0  ;;  %v6355_v44 = vld [vmem:[%s8507_s3 + $0x254] ss:$8 sps:$4 sm:$0xff]   ;;  %v6418_v34 = vld [vmem:[%s8509_s5 + $0xa4] ss:$8 sps:$4 sm:$0xff]   ;;  %v6422_v61 = vld [vmem:[%s8509_s5 + $0xc0] ss:$8 sps:$4 sm:$0xff]  }
 0x2e3   : > { %3064 = vmatprep.subr.bf16.mxu1 %v6349_v31  ;;  %v6424_v4 = vld [vmem:[%s8509_s5 + $0xc4] ss:$8 sps:$4 sm:$0xff]   ;;  %v6428_v6 = vld [vmem:[%s8509_s5 + $0xe0] ss:$8 sps:$4 sm:$0xff]   ;;  %v6431_v0 = vld [vmem:[%s8509_s5 + $0xf0] ss:$8 sps:$4 sm:$0xff]  }
 0x2e4   : > { %v6430_v25 = vld [vmem:[%s8509_s5 + $0xe4] ss:$8 sps:$4 sm:$0xff]   ;;  %v6434_v1 = vld [vmem:[%s8509_s5 + $0x100] ss:$8 sps:$4 sm:$0xff]  }
 0x2e5   : > { %v6436_v31 = vld [vmem:[%s8509_s5 + $0x104] ss:$8 sps:$4 sm:$0xff]  }
 0x2e6   : > { %3065 = vmatpush1.bf16.msra.mxu1 %v6347_v36  ;;  %v6437_v36 = vld [vmem:[%s8509_s5 + $0x110] ss:$8 sps:$4 sm:$0xff]  }
 0x2e7   : > { %3066 = vmatprep.subr.bf16.mxu1 %v6352_v20  ;;  %v6442_v20 = vld [vmem:[%s8509_s5 + $0x124] ss:$8 sps:$4 sm:$0xff]  }
 0x2e9   : > { %2805 = vmatmul.mubr.bf16.gmra.mrb[52].mxu1 %v7800_v53  ;;  %v6361_v53 = vld [vmem:[%s8507_s3 + $0x274] ss:$8 sps:$4 sm:$0xff]  }
 0x2ea   : > { %2814 = vmatprep.mubr.bf16.mxu1 %v7833_v19  ;;  %3067 = vmatpush1.bf16.msra.mxu1 %v6350_v50  ;;  %v6359_v19 = vld [vmem:[%s8507_s3 + $0x270] ss:$8 sps:$4 sm:$0xff]   ;;  %v6440_v50 = vld [vmem:[%s8509_s5 + $0x120] ss:$8 sps:$4 sm:$0xff]  }
 0x2eb   : > { %3068 = vmatprep.subr.bf16.mxu1 %v6355_v44  ;;  %v6445_v44 = vld [vmem:[%s8509_s5 + $0x134] ss:$8 sps:$4 sm:$0xff]  }
 0x2ee   : > { %3069 = vmatpush1.bf16.msra.mxu1 %v6353_v8  ;;  %v6443_v8 = vld [vmem:[%s8509_s5 + $0x130] ss:$8 sps:$4 sm:$0xff]  }
 0x2ef   : > { %3070 = vmatprep.subr.bf16.mxu1 %v6358_v52  ;;  %v6448_v52 = vld [vmem:[%s8509_s5 + $0x144] ss:$8 sps:$4 sm:$0xff]  }
 0x2f1   : > { %2815 = vmatmul.mubr.bf16.gmra.mrb[56].mxu1 %v7829_v14  ;;  %v6367_v14 = vld [vmem:[%s8507_s3 + $0x294] ss:$8 sps:$4 sm:$0xff]  }
 0x2f2   : > { %2824 = vmatprep.mubr.bf16.mxu1 %v7859_v11  ;;  %3071 = vmatpush1.bf16.msra.mxu1 %v6356_v2  ;;  %v6365_v11 = vld [vmem:[%s8507_s3 + $0x290] ss:$8 sps:$4 sm:$0xff]   ;;  %v6446_v2 = vld [vmem:[%s8509_s5 + $0x140] ss:$8 sps:$4 sm:$0xff]  }
 0x2f3   : > { %3072 = vmatprep.subr.bf16.mxu1 %v6361_v53  ;;  %v6451_v53 = vld [vmem:[%s8509_s5 + $0x154] ss:$8 sps:$4 sm:$0xff]  }
 0x2f6   : > { %3073 = vmatpush1.bf16.msra.mxu1 %v6359_v19  ;;  %v6449_v19 = vld [vmem:[%s8509_s5 + $0x150] ss:$8 sps:$4 sm:$0xff]  }
 0x2f7   : > { %3074 = vmatprep.subr.bf16.mxu1 %v6364_v21  ;;  %v6454_v21 = vld [vmem:[%s8509_s5 + $0x164] ss:$8 sps:$4 sm:$0xff]  }
 0x2f9   : > { %2825 = vmatmul.mubr.bf16.gmra.mrb[60].mxu1 %v7855_v26  ;;  %v6373_v26 = vld [vmem:[%s8507_s3 + $0x2b4] ss:$8 sps:$4 sm:$0xff]  }
 0x2fa   : > { %2834 = vmatprep.mubr.bf16.mxu1 %v7885_v35  ;;  %3075 = vmatpush1.bf16.msra.mxu1 %v6362_v37  ;;  %v6371_v35 = vld [vmem:[%s8507_s3 + $0x2b0] ss:$8 sps:$4 sm:$0xff]   ;;  %v6452_v37 = vld [vmem:[%s8509_s5 + $0x160] ss:$8 sps:$4 sm:$0xff]  }
 0x2fb   : > { %3076 = vmatprep.subr.bf16.mxu1 %v6367_v14  ;;  %v6457_v14 = vld [vmem:[%s8509_s5 + $0x174] ss:$8 sps:$4 sm:$0xff]  }
 0x2fe   : > { %3077 = vmatpush1.bf16.msra.mxu1 %v6365_v11  ;;  %v6455_v11 = vld [vmem:[%s8509_s5 + $0x170] ss:$8 sps:$4 sm:$0xff]  }
 0x2ff   : > { %3078 = vmatprep.subr.bf16.mxu1 %v6370_v22  ;;  %v6460_v22 = vld [vmem:[%s8509_s5 + $0x184] ss:$8 sps:$4 sm:$0xff]  }
 0x301   : > { %2835 = vmatmul.mubr.bf16.gmra.mrb[64].mxu1 %v7881_v16  ;;  %v6379_v16 = vld [vmem:[%s8507_s3 + $0x2d4] ss:$8 sps:$4 sm:$0xff]  }
 0x302   : > { %2844 = vmatprep.mubr.bf16.mxu1 %v7911_v56  ;;  %3079 = vmatpush1.bf16.msra.mxu1 %v6368_v27  ;;  %v6377_v56 = vld [vmem:[%s8507_s3 + $0x2d0] ss:$8 sps:$4 sm:$0xff]   ;;  %v6458_v27 = vld [vmem:[%s8509_s5 + $0x180] ss:$8 sps:$4 sm:$0xff]  }
 0x303   : > { %3080 = vmatprep.subr.bf16.mxu1 %v6373_v26  ;;  %v6463_v26 = vld [vmem:[%s8509_s5 + $0x194] ss:$8 sps:$4 sm:$0xff]  }
 0x306   : > { %3081 = vmatpush1.bf16.msra.mxu1 %v6371_v35  ;;  %v6461_v35 = vld [vmem:[%s8509_s5 + $0x190] ss:$8 sps:$4 sm:$0xff]  }
 0x307   : > { %3082 = vmatprep.subr.bf16.mxu1 %v6376_v39  ;;  %v6466_v39 = vld [vmem:[%s8509_s5 + $0x1a4] ss:$8 sps:$4 sm:$0xff]  }
 0x309   : > { %2845 = vmatmul.mubr.bf16.gmra.mrb[68].mxu1 %v7907_v54  ;;  %v6385_v54 = vld [vmem:[%s8507_s3 + $0x2f4] ss:$8 sps:$4 sm:$0xff]  }
 0x30a   : > { %2854 = vmatprep.mubr.bf16.mxu1 %v7941_v3  ;;  %3083 = vmatpush1.bf16.msra.mxu1 %v6374_v60  ;;  %v6392_v3 = vld [vmem:[%s8509_s5 + $0x20] ss:$8 sps:$4 sm:$0xff]  }
 0x30b   : > { %3084 = vmatprep.subr.bf16.mxu1 %v6379_v16  ;;  %v6464_v60 = vld [vmem:[%s8509_s5 + $0x1a0] ss:$8 sps:$4 sm:$0xff]   ;;  %v6469_v16 = vld [vmem:[%s8509_s5 + $0x1b4] ss:$8 sps:$4 sm:$0xff]  }
 0x30e   : > { %3085 = vmatpush1.bf16.msra.mxu1 %v6377_v56  ;;  %v6467_v56 = vld [vmem:[%s8509_s5 + $0x1b0] ss:$8 sps:$4 sm:$0xff]  }
 0x30f   : > { %3086 = vmatprep.subr.bf16.mxu1 %v6382_v51  ;;  %v6472_v51 = vld [vmem:[%s8509_s5 + $0x1c4] ss:$8 sps:$4 sm:$0xff]  }
 0x311   : > { %2855 = vmatmul.mubr.bf16.gmra.mrb[72].mxu1 %v7934_v28  ;;  %v6391_v28 = vld [vmem:[%s8509_s5 + $0x14] ss:$8 sps:$4 sm:$0xff]  }
 0x312   : > { %3087 = vmatpush1.bf16.msra.mxu1 %v6380_v41  ;;  %3090 = vmatprep.mubr.bf16.mxu1 %v8573_v17  ;;  %v6470_v41 = vld [vmem:[%s8509_s5 + $0x1c0] ss:$8 sps:$4 sm:$0xff]   ;;  %v6473_v17 = vld [vmem:[%s8509_s5 + $0x1d0] ss:$8 sps:$4 sm:$0xff]  }
 0x313   : > { %3088 = vmatprep.subr.bf16.mxu1 %v6385_v54  ;;  %v6475_v54 = vld [vmem:[%s8509_s5 + $0x1d4] ss:$8 sps:$4 sm:$0xff]  }
 0x316   : > { %3089 = vmatpush1.bf16.msra.mxu1 %v6383_v5  ;;  %v6478_v5 = vld [vmem:[%s8509_s5 + $0x1e4] ss:$8 sps:$4 sm:$0xff]  }
 0x317   : > { %3594 = vmatprep.subr.bf16.mxu1 %v6388_v58  ;;  %v6476_v58 = vld [vmem:[%s8509_s5 + $0x1e0] ss:$8 sps:$4 sm:$0xff]  }
 0x319   : > { %3091 = vmatmul.mubr.bf16.vlgmr.msra.gmra.mrb[44].mxu1 %v8574_v62  ;;  %v6484_v62 = vld [vmem:[%s8509_s5 + $0x204] ss:$8 sps:$4 sm:$0xff]  }
 0x31a   : > { %3100 = vmatprep.mubr.bf16.mxu1 %v7793_v33  ;;  %3595 = vmatpush1.bf16.msra.mxu1 %v6386_v7  ;;  %v6397_v33 = vld [vmem:[%s8509_s5 + $0x34] ss:$8 sps:$4 sm:$0xff]  }
 0x31b   : > { %3596 = vmatprep.subr.bf16.mxu1 %v6391_v28  ;;  %v6481_v7 = vld [vmem:[%s8509_s5 + $0x1f4] ss:$8 sps:$4 sm:$0xff]   ;;  %v6479_v28 = vld [vmem:[%s8509_s5 + $0x1f0] ss:$8 sps:$4 sm:$0xff]  }
 0x31e   : > { %3597 = vmatpush1.bf16.msra.mxu1 %v6389_v42  ;;  %v3203_v42 = vld [vmem:[#allocation17] sm:$0x3] }
 0x31f   : > { %3598 = vmatprep.subr.bf16.mxu1 %v6394_v57  ;;  %v8577_v57 = vld [vmem:[#allocation32_spill] sm:$0xff] }
 0x321   : > { %3101 = vmatmul.mubr.bf16.gmra.mrb[48].mxu1 %v8575_v9 }
 0x322   : > { %3110 = vmatprep.mubr.bf16.mxu1 %v7819_v13  ;;  %3599 = vmatpush1.bf16.msra.mxu1 %v6392_v3  ;;  %v6403_v13 = vld [vmem:[%s8509_s5 + $0x54] ss:$8 sps:$4 sm:$0xff]   ;;  %v8268_v3 = vrot.slane %v3203_v42, %v8577_v57 }
 0x323   : > { %3600 = vmatprep.subr.bf16.mxu1 %v6397_v33  ;;  %v8578_v33 = vld [vmem:[#allocation34_spill] sm:$0xff] }
 0x324   : > { %v8271_v9 = vrot.slane %v3203_v42, %v8578_v33 }
 0x326   : > { %3601 = vmatpush1.bf16.msra.mxu1 %v6395_v30 }
 0x327   : > { %3602 = vmatprep.subr.bf16.mxu1 %v6400_v55 }
 0x329   : > { %3111 = vmatmul.mubr.bf16.gmra.mrb[52].mxu1 %v7815_v40  ;;  %v6409_v40 = vld [vmem:[%s8509_s5 + $0x74] ss:$8 sps:$4 sm:$0xff]  }
 0x32a   : > { %3120 = vmatprep.mubr.bf16.mxu1 %v7845_v46  ;;  %3603 = vmatpush1.bf16.msra.mxu1 %v6398_v32  ;;  %v6407_v46 = vld [vmem:[%s8509_s5 + $0x70] ss:$8 sps:$4 sm:$0xff]  }
 0x32b   : > { %3604 = vmatprep.subr.bf16.mxu1 %v6403_v13 }
 0x32e   : > { %3605 = vmatpush1.bf16.msra.mxu1 %v6401_v59 }
 0x32f   : > { %3606 = vmatprep.subr.bf16.mxu1 %v6406_v10 }
 0x331   : > { %3121 = vmatmul.mubr.bf16.gmra.mrb[56].mxu1 %v7841_v23  ;;  %v6415_v23 = vld [vmem:[%s8509_s5 + $0x94] ss:$8 sps:$4 sm:$0xff]  }
 0x332   : > { %3130 = vmatprep.mubr.bf16.mxu1 %v7871_v24  ;;  %3607 = vmatpush1.bf16.msra.mxu1 %v6404_v43  ;;  %v6413_v24 = vld [vmem:[%s8509_s5 + $0x90] ss:$8 sps:$4 sm:$0xff]  }
 0x333   : > { %3608 = vmatprep.subr.bf16.mxu1 %v6409_v40 }
 0x336   : > { %3609 = vmatpush1.bf16.msra.mxu1 %v6407_v46 }
 0x337   : > { %3610 = vmatprep.subr.bf16.mxu1 %v6412_v12 }
 0x339   : > { %3131 = vmatmul.mubr.bf16.gmra.mrb[60].mxu1 %v7867_v18  ;;  %v6421_v18 = vld [vmem:[%s8509_s5 + $0xb4] ss:$8 sps:$4 sm:$0xff]  }
 0x33a   : > { %3140 = vmatprep.mubr.bf16.mxu1 %v7897_v49  ;;  %3611 = vmatpush1.bf16.msra.mxu1 %v6410_v45  ;;  %v6419_v49 = vld [vmem:[%s8509_s5 + $0xb0] ss:$8 sps:$4 sm:$0xff]  }
 0x33b   : > { %3612 = vmatprep.subr.bf16.mxu1 %v6415_v23 }
 0x33e   : > { %3613 = vmatpush1.bf16.msra.mxu1 %v6413_v24 }
 0x33f   : > { %3614 = vmatprep.subr.bf16.mxu1 %v6418_v34 }
 0x341   : > { %3141 = vmatmul.mubr.bf16.gmra.mrb[64].mxu1 %v7893_v29  ;;  %v6427_v29 = vld [vmem:[%s8509_s5 + $0xd4] ss:$8 sps:$4 sm:$0xff]  }
 0x342   : > { %3150 = vmatprep.mubr.bf16.mxu1 %v7923_v63  ;;  %3615 = vmatpush1.bf16.msra.mxu1 %v6416_v48  ;;  %v6425_v63 = vld [vmem:[%s8509_s5 + $0xd0] ss:$8 sps:$4 sm:$0xff]  }
 0x343   : > { %3616 = vmatprep.subr.bf16.mxu1 %v6421_v18 }
 0x346   : > { %3617 = vmatpush1.bf16.msra.mxu1 %v6419_v49 }
 0x347   : > { %3618 = vmatprep.subr.bf16.mxu1 %v6424_v4 }
 0x349   : > { %3151 = vmatmul.mubr.bf16.gmra.mrb[68].mxu1 %v7919_v47  ;;  %v6433_v47 = vld [vmem:[%s8509_s5 + $0xf4] ss:$8 sps:$4 sm:$0xff]  }
 0x34a   : > { %3160 = vmatprep.mubr.bf16.mxu1 %v7961_v38  ;;  %3619 = vmatpush1.bf16.msra.mxu1 %v6422_v61  ;;  %v8576_v38 = vmov 0  }
 0x34b   : > { %3620 = vmatprep.subr.bf16.mxu1 %v6427_v29 }
 0x34e   : > { %3621 = vmatpush1.bf16.msra.mxu1 %v6425_v63 }
 0x34f   : > { %3622 = vmatprep.subr.bf16.mxu1 %v6430_v25 }
 0x351   : > { %3161 = vmatmul.mubr.bf16.gmra.mrb[72].mxu1 %v7956_v15  ;;  %v6439_v15 = vld [vmem:[%s8509_s5 + $0x114] ss:$8 sps:$4 sm:$0xff]  }
 0x352   : > { %3623 = vmatpush1.bf16.msra.mxu1 %v6428_v6  ;;  %3626 = vmatprep.mubr.bf16.mxu1 %v8576_v38 }
 0x353   : > { %3624 = vmatprep.subr.bf16.mxu1 %v6433_v47 }
 0x356   : > { %3625 = vmatpush1.bf16.msra.mxu1 %v6431_v0 }
 0x357   : > { %3827 = vmatprep.subr.bf16.mxu1 %v6436_v31 }
 0x359   : > { %3627 = vmatmul.mubr.bf16.vlgmr.msra.gmra.mrb[76].mxu1 %v8576_v38 }
 0x35a   : > { %3828 = vmatpush1.bf16.msra.mxu1 %v6434_v1 }
 0x35b   : > { %3829 = vmatprep.subr.bf16.mxu1 %v6439_v15 }
 0x35e   : > { %3830 = vmatpush1.bf16.msra.mxu1 %v6437_v36 }
 0x35f   : > { %3831 = vmatprep.subr.bf16.mxu1 %v6442_v20 }
 0x362   : > { %3832 = vmatpush1.bf16.msra.mxu1 %v6440_v50 }
 0x363   : > { %3833 = vmatprep.subr.bf16.mxu1 %v6445_v44 }
 0x366   : > { %3834 = vmatpush1.bf16.msra.mxu1 %v6443_v8 }
 0x367   : > { %3835 = vmatprep.subr.bf16.mxu1 %v6448_v52 }
 0x36a   : > { %3836 = vmatpush1.bf16.msra.mxu1 %v6446_v2 }
 0x36b   : > { %3837 = vmatprep.subr.bf16.mxu1 %v6451_v53 }
 0x36e   : > { %3838 = vmatpush1.bf16.msra.mxu1 %v6449_v19 }
 0x36f   : > { %3839 = vmatprep.subr.bf16.mxu1 %v6454_v21 }
 0x372   : > { %3840 = vmatpush1.bf16.msra.mxu1 %v6452_v37 }
 0x373   : > { %3841 = vmatprep.subr.bf16.mxu1 %v6457_v14 }
 0x376   : > { %3842 = vmatpush1.bf16.msra.mxu1 %v6455_v11 }
 0x377   : > { %3843 = vmatprep.subr.bf16.mxu1 %v6460_v22 }
 0x37a   : > { %3844 = vmatpush1.bf16.msra.mxu1 %v6458_v27 }
 0x37b   : > { %3845 = vmatprep.subr.bf16.mxu1 %v6463_v26 }
 0x37e   : > { %3846 = vmatpush1.bf16.msra.mxu1 %v6461_v35 }
 0x37f   : > { %3847 = vmatprep.subr.bf16.mxu1 %v6466_v39 }
 0x382   : > { %3848 = vmatpush1.bf16.msra.mxu1 %v6464_v60 }
 0x383   : > { %3849 = vmatprep.subr.bf16.mxu1 %v6469_v16  ;;  %v6530_v16 = vld [vmem:[#allocation20] ss:$8 sps:$4 sm:$0xff]  }
 0x386   : > { %3850 = vmatpush1.bf16.msra.mxu1 %v6467_v56  ;;  %v6532_v56 = vld [vmem:[#allocation20 + $0x4] ss:$8 sps:$4 sm:$0xff]  }
 0x387   : > { %3851 = vmatprep.subr.bf16.mxu1 %v6472_v51  ;;  %4497 = vmatprep.subr.bf16.mxu0 %v6532_v56 }
 0x388   : > { %4498 = vmatpush1.bf16.msra.mxu0 %v6530_v16 }
 0x38a   : > { %3852 = vmatpush1.bf16.msra.mxu1 %v6470_v41  ;;  %v6535_v41 = vld [vmem:[#allocation20 + $0x14] ss:$8 sps:$4 sm:$0xff]  }
 0x38b   : > { %3853 = vmatprep.subr.bf16.mxu1 %v6475_v54  ;;  %4499 = vmatprep.subr.bf16.mxu0 %v6535_v41 }
 0x38e   : > { %3854 = vmatpush1.bf16.msra.mxu1 %v6473_v17 }
 0x38f   : > { %3855 = vmatprep.subr.bf16.mxu1 %v6478_v5 }
 0x392   : > { %3856 = vmatpush1.bf16.msra.mxu1 %v6476_v58 }
 0x393   : > { %3857 = vmatprep.subr.bf16.mxu1 %v6481_v7 }
 0x396   : > { %3858 = vmatpush1.bf16.msra.mxu1 %v6479_v28  ;;  %v6533_v28 = vld [vmem:[#allocation20 + $0x10] ss:$8 sps:$4 sm:$0xff]  }
 0x397   : > { %4093 = vmatprep.subr.bf16.mxu1 %v6484_v62  ;;  %4500 = vmatpush1.bf16.msra.mxu0 %v6533_v28 }
 0x3ec   : > { %v3092_v30 = vpop.f32.mrb[44].mxu1 }
 0x3ed   : > { %v3215_v55 = vadd.f32 %v8268_v3, %v3092_v30  ;;  %v3094_v32 = vpop.f32.mrb[45].mxu1 }
 0x3ee   : > { %v3216_v13 = vadd.f32 %v8271_v9, %v3094_v32  ;;  %v3096_v59 = vpop.f32.mrb[46].mxu1 }
 0x3ef   : > { %v3247_v10 = vmul.f32 0.2, %v3215_v55  ;;  %v3217_v43 = vadd.f32 %v8268_v3, %v3096_v59  ;;  %v3098_v40 = vpop.f32.mrb[47].mxu1 }
 0x3f0   : > { %v3248_v46 = vmul.f32 0.2, %v3216_v13  ;;  %v3218_v12 = vadd.f32 %v8271_v9, %v3098_v40 }
 0x3f1   : > { %v3249_v45 = vmul.f32 0.2, %v3217_v43  ;;  %v3279_v24 = vmax.f32 %v3215_v55, %v3247_v10  ;;  %v6538_v55 = vld [vmem:[#allocation20 + $0x24] ss:$8 sps:$4 sm:$0xff]  }
 0x3f2   : > { %v3250_v23 = vmul.f32 0.2, %v3218_v12  ;;  %v3280_v48 = vmax.f32 %v3216_v13, %v3248_v46  ;;  %4501 = vmatprep.subr.bf16.mxu0 %v6538_v55 }
 0x3f3   : > { %v3281_v34 = vmax.f32 %v3217_v43, %v3249_v45  ;;  %v6536_v45 = vld [vmem:[#allocation20 + $0x20] ss:$8 sps:$4 sm:$0xff]  }
 0x3f4   : > { %v3282_v18 = vmax.f32 %v3218_v12, %v3250_v23  ;;  %v3102_v49 = vpop.f32.mrb[48].mxu1  ;;  %4502 = vmatpush1.bf16.msra.mxu0 %v6536_v45  ;;  %v6551_v45 = vld [vmem:[#allocation20 + $0x70] ss:$8 sps:$4 sm:$0xff]  }
 0x3f5   : > { %v8277_v4 = vpack.c.bf16 %v3281_v34, %v3279_v24  ;;  %v3219_v61 = vadd.f32 %v8268_v3, %v3102_v49  ;;  %v3104_v29 = vpop.f32.mrb[49].mxu1  ;;  %v6541_v24 = vld [vmem:[#allocation20 + $0x34] ss:$8 sps:$4 sm:$0xff]  }
 0x3f6   : > { %v3220_v63 = vadd.f32 %v8271_v9, %v3104_v29  ;;  %v3106_v25 = vpop.f32.mrb[50].mxu1  ;;  %v8281_v6 = vpack.c.bf16 %v3282_v18, %v3280_v48  ;;  %4503 = vmatprep.subr.bf16.mxu0 %v6541_v24 }
 0x3f7   : > { %v3251_v47 = vmul.f32 0.2, %v3219_v61  ;;  %v3221_v0 = vadd.f32 %v8268_v3, %v3106_v25  ;;  %v3108_v31 = vpop.f32.mrb[51].mxu1 }
 0x3f8   : > { %v3252_v1 = vmul.f32 0.2, %v3220_v63  ;;  %v3222_v15 = vadd.f32 %v8271_v9, %v3108_v31  ;;  %v6544_v31 = vld [vmem:[#allocation20 + $0x44] ss:$8 sps:$4 sm:$0xff]  }
 0x3f9   : > { %v3253_v36 = vmul.f32 0.2, %v3221_v0  ;;  %v3283_v50 = vmax.f32 %v3219_v61, %v3251_v47 }
 0x3fa   : > { %v3254_v20 = vmul.f32 0.2, %v3222_v15  ;;  %v3284_v8 = vmax.f32 %v3220_v63, %v3252_v1  ;;  %v6539_v63 = vld [vmem:[#allocation20 + $0x30] ss:$8 sps:$4 sm:$0xff]  }
 0x3fb   : > { %v3285_v44 = vmax.f32 %v3221_v0, %v3253_v36  ;;  %4504 = vmatpush1.bf16.msra.mxu0 %v6539_v63 }
 0x3fc   : > { %v3286_v52 = vmax.f32 %v3222_v15, %v3254_v20  ;;  %v3112_v2 = vpop.f32.mrb[52].mxu1  ;;  %4505 = vmatprep.subr.bf16.mxu0 %v6544_v31 }
 0x3fd   : > { %v3223_v53 = vadd.f32 %v8268_v3, %v3112_v2  ;;  %v3114_v19 = vpop.f32.mrb[53].mxu1  ;;  %v8286_v21 = vpack.c.bf16 %v3285_v44, %v3283_v50  ;;  %v6542_v2 = vld [vmem:[#allocation20 + $0x40] ss:$8 sps:$4 sm:$0xff]  }
 0x3fe   : > { %v3224_v37 = vadd.f32 %v8271_v9, %v3114_v19  ;;  %v3116_v14 = vpop.f32.mrb[54].mxu1  ;;  %v8289_v11 = vpack.c.bf16 %v3286_v52, %v3284_v8  ;;  %v6547_v19 = vld [vmem:[#allocation20 + $0x54] ss:$8 sps:$4 sm:$0xff]  }
 0x3ff   : > { %v3255_v22 = vmul.f32 0.2, %v3223_v53  ;;  %v3225_v27 = vadd.f32 %v8268_v3, %v3116_v14  ;;  %v3118_v26 = vpop.f32.mrb[55].mxu1  ;;  %4506 = vmatpush1.bf16.msra.mxu0 %v6542_v2 }
 0x400   : > { %v3256_v35 = vmul.f32 0.2, %v3224_v37  ;;  %v3226_v39 = vadd.f32 %v8271_v9, %v3118_v26  ;;  %3636 = vmatprep.mubr.bf16.mxu1 %v8289_v11  ;;  %4507 = vmatprep.subr.bf16.mxu0 %v6547_v19  ;;  %v6557_v19 = vld [vmem:[#allocation20 + $0x90] ss:$8 sps:$4 sm:$0xff]  }
 0x401   : > { %v3257_v60 = vmul.f32 0.2, %v3225_v27  ;;  %3637 = vmatmul.mubr.bf16.gmra.mrb[80].mxu1 %v8286_v21  ;;  %v3287_v54 = vmax.f32 %v3223_v53, %v3255_v22 }
 0x402   : > { %v3258_v51 = vmul.f32 0.2, %v3226_v39  ;;  %v3288_v5 = vmax.f32 %v3224_v37, %v3256_v35 }
 0x403   : > { %v3289_v17 = vmax.f32 %v3225_v27, %v3257_v60 }
 0x404   : > { %v3290_v58 = vmax.f32 %v3226_v39, %v3258_v51  ;;  %v3122_v7 = vpop.f32.mrb[56].mxu1  ;;  %v6545_v39 = vld [vmem:[#allocation20 + $0x50] ss:$8 sps:$4 sm:$0xff]   ;;  %v6550_v51 = vld [vmem:[#allocation20 + $0x64] ss:$8 sps:$4 sm:$0xff]  }
 0x405   : > { %v3227_v62 = vadd.f32 %v8268_v3, %v3122_v7  ;;  %v3124_v42 = vpop.f32.mrb[57].mxu1  ;;  %v8296_v30 = vpack.c.bf16 %v3289_v17, %v3287_v54  ;;  %4508 = vmatpush1.bf16.msra.mxu0 %v6545_v39 }
 0x406   : > { %v3228_v32 = vadd.f32 %v8271_v9, %v3124_v42  ;;  %v3126_v13 = vpop.f32.mrb[58].mxu1  ;;  %v8299_v59 = vpack.c.bf16 %v3290_v58, %v3288_v5  ;;  %v6548_v42 = vld [vmem:[#allocation20 + $0x60] ss:$8 sps:$4 sm:$0xff]   ;;  %4509 = vmatprep.subr.bf16.mxu0 %v6550_v51 }
 0x407   : > { %v3259_v10 = vmul.f32 0.2, %v3227_v62  ;;  %v3229_v43 = vadd.f32 %v8268_v3, %v3126_v13  ;;  %v3128_v40 = vpop.f32.mrb[59].mxu1 }
 0x408   : > { %v3260_v46 = vmul.f32 0.2, %v3228_v32  ;;  %v3230_v12 = vadd.f32 %v8271_v9, %v3128_v40 }
 0x409   : > { %v3261_v23 = vmul.f32 0.2, %v3229_v43  ;;  %v3291_v48 = vmax.f32 %v3227_v62, %v3259_v10  ;;  %4510 = vmatpush1.bf16.msra.mxu0 %v6548_v42 }
 0x40a   : > { %v3262_v34 = vmul.f32 0.2, %v3230_v12  ;;  %v3292_v49 = vmax.f32 %v3228_v32, %v3260_v46  ;;  %v6553_v32 = vld [vmem:[#allocation20 + $0x74] ss:$8 sps:$4 sm:$0xff]  }
 0x40b   : > { %v3293_v18 = vmax.f32 %v3229_v43, %v3261_v23  ;;  %4511 = vmatprep.subr.bf16.mxu0 %v6553_v32 }
 0x40c   : > { %v3294_v61 = vmax.f32 %v3230_v12, %v3262_v34  ;;  %v3132_v29 = vpop.f32.mrb[60].mxu1 }
 0x40d   : > { %v3231_v25 = vadd.f32 %v8268_v3, %v3132_v29  ;;  %v3134_v47 = vpop.f32.mrb[61].mxu1  ;;  %v8304_v0 = vpack.c.bf16 %v3293_v18, %v3291_v48  ;;  %v6556_v48 = vld [vmem:[#allocation20 + $0x84] ss:$8 sps:$4 sm:$0xff]   ;;  %4512 = vmatpush1.bf16.msra.mxu0 %v6551_v45  ;;  %v6571_v45 = vld [vmem:[#allocation20 + $0xd4] ss:$8 sps:$4 sm:$0xff]  }
 0x40e   : > { %v3232_v1 = vadd.f32 %v8271_v9, %v3134_v47  ;;  %v3136_v15 = vpop.f32.mrb[62].mxu1  ;;  %v8307_v36 = vpack.c.bf16 %v3294_v61, %v3292_v49  ;;  %4513 = vmatprep.subr.bf16.mxu0 %v6556_v48  ;;  %v6569_v48 = vld [vmem:[#allocation20 + $0xd0] ss:$8 sps:$4 sm:$0xff]  }
 0x40f   : > { %v3263_v20 = vmul.f32 0.2, %v3231_v25  ;;  %v3233_v50 = vadd.f32 %v8268_v3, %v3136_v15  ;;  %v3138_v44 = vpop.f32.mrb[63].mxu1 }
 0x410   : > { %v3264_v8 = vmul.f32 0.2, %v3232_v1  ;;  %v3234_v52 = vadd.f32 %v8271_v9, %v3138_v44  ;;  %3646 = vmatprep.mubr.bf16.mxu1 %v8307_v36 }
 0x411   : > { %v3265_v53 = vmul.f32 0.2, %v3233_v50  ;;  %3647 = vmatmul.mubr.bf16.gmra.mrb[84].mxu1 %v8304_v0  ;;  %v3295_v14 = vmax.f32 %v3231_v25, %v3263_v20  ;;  %v6559_v20 = vld [vmem:[#allocation20 + $0x94] ss:$8 sps:$4 sm:$0xff]  }
 0x412   : > { %v3266_v37 = vmul.f32 0.2, %v3234_v52  ;;  %v3296_v27 = vmax.f32 %v3232_v1, %v3264_v8  ;;  %v6554_v1 = vld [vmem:[#allocation20 + $0x80] ss:$8 sps:$4 sm:$0xff]  }
 0x413   : > { %v3297_v22 = vmax.f32 %v3233_v50, %v3265_v53  ;;  %4514 = vmatpush1.bf16.msra.mxu0 %v6554_v1  ;;  %v6505_v1 = vld [vmem:[%s8509_s5 + $0x274] ss:$8 sps:$4 sm:$0xff]  }
 0x414   : > { %v3298_v26 = vmax.f32 %v3234_v52, %v3266_v37  ;;  %v3142_v35 = vpop.f32.mrb[64].mxu1  ;;  %4515 = vmatprep.subr.bf16.mxu0 %v6559_v20  ;;  %v6583_v20 = vld [vmem:[#allocation20 + $0x114] ss:$8 sps:$4 sm:$0xff]  }
 0x415   : > { %v3235_v60 = vadd.f32 %v8268_v3, %v3142_v35  ;;  %v3144_v16 = vpop.f32.mrb[65].mxu1  ;;  %v8314_v56 = vpack.c.bf16 %v3297_v22, %v3295_v14 }
 0x416   : > { %v3236_v41 = vadd.f32 %v8271_v9, %v3144_v16  ;;  %v3146_v54 = vpop.f32.mrb[66].mxu1  ;;  %v8317_v17 = vpack.c.bf16 %v3298_v26, %v3296_v27  ;;  %v6562_v27 = vld [vmem:[#allocation20 + $0xa4] ss:$8 sps:$4 sm:$0xff]  }
 0x417   : > { %v3267_v5 = vmul.f32 0.2, %v3235_v60  ;;  %v3237_v58 = vadd.f32 %v8268_v3, %v3146_v54  ;;  %v3148_v7 = vpop.f32.mrb[67].mxu1  ;;  %4516 = vmatpush1.bf16.msra.mxu0 %v6557_v19  ;;  %v6589_v19 = vld [vmem:[#allocation20 + $0x134] ss:$8 sps:$4 sm:$0xff]  }
 0x418   : > { %v3268_v28 = vmul.f32 0.2, %v3236_v41  ;;  %v3238_v62 = vadd.f32 %v8271_v9, %v3148_v7  ;;  %4517 = vmatprep.subr.bf16.mxu0 %v6562_v27  ;;  %v6512_v27 = vld [vmem:[%s8509_s5 + $0x2a0] ss:$8 sps:$4 sm:$0xff]  }
 0x419   : > { %v3269_v55 = vmul.f32 0.2, %v3237_v58  ;;  %v3299_v10 = vmax.f32 %v3235_v60, %v3267_v5 }
 0x41a   : > { %v3270_v13 = vmul.f32 0.2, %v3238_v62  ;;  %v3300_v40 = vmax.f32 %v3236_v41, %v3268_v28  ;;  %v6487_v41 = vld [vmem:[%s8509_s5 + $0x214] ss:$8 sps:$4 sm:$0xff]   ;;  %v6565_v28 = vld [vmem:[#allocation20 + $0xb4] ss:$8 sps:$4 sm:$0xff]  }
 0x41b   : > { %v3301_v43 = vmax.f32 %v3237_v58, %v3269_v55  ;;  %v6560_v58 = vld [vmem:[#allocation20 + $0xa0] ss:$8 sps:$4 sm:$0xff]  }
 0x41c   : > { %v3302_v46 = vmax.f32 %v3238_v62, %v3270_v13  ;;  %v3152_v12 = vpop.f32.mrb[68].mxu1  ;;  %4518 = vmatpush1.bf16.msra.mxu0 %v6560_v58  ;;  %v6601_v58 = vld [vmem:[#allocation20 + $0x174] ss:$8 sps:$4 sm:$0xff]  }
 0x41d   : > { %v3239_v23 = vadd.f32 %v8268_v3, %v3152_v12  ;;  %v3154_v24 = vpop.f32.mrb[69].mxu1  ;;  %v8322_v34 = vpack.c.bf16 %v3301_v43, %v3299_v10  ;;  %4519 = vmatprep.subr.bf16.mxu0 %v6565_v28  ;;  %v6568_v43 = vld [vmem:[#allocation20 + $0xc4] ss:$8 sps:$4 sm:$0xff]   ;;  %v6566_v12 = vld [vmem:[#allocation20 + $0xc0] ss:$8 sps:$4 sm:$0xff]  }
 0x41e   : > { %v3240_v18 = vadd.f32 %v8271_v9, %v3154_v24  ;;  %v3156_v49 = vpop.f32.mrb[70].mxu1  ;;  %v8325_v61 = vpack.c.bf16 %v3302_v46, %v3300_v40  ;;  %v6493_v46 = vld [vmem:[%s8509_s5 + $0x234] ss:$8 sps:$4 sm:$0xff]   ;;  %v6496_v24 = vld [vmem:[%s8509_s5 + $0x244] ss:$8 sps:$4 sm:$0xff]  }
 0x41f   : > { %v3271_v29 = vmul.f32 0.2, %v3239_v23  ;;  %v3241_v63 = vadd.f32 %v8268_v3, %v3156_v49  ;;  %v3158_v25 = vpop.f32.mrb[71].mxu1  ;;  %v6572_v49 = vld [vmem:[#allocation20 + $0xe0] ss:$8 sps:$4 sm:$0xff]  }
 0x420   : > { %v3272_v47 = vmul.f32 0.2, %v3240_v18  ;;  %v3242_v31 = vadd.f32 %v8271_v9, %v3158_v25  ;;  %3656 = vmatprep.mubr.bf16.mxu1 %v8325_v61  ;;  %v6502_v25 = vld [vmem:[%s8509_s5 + $0x264] ss:$8 sps:$4 sm:$0xff]  }
 0x421   : > { %v3273_v15 = vmul.f32 0.2, %v3241_v63  ;;  %3657 = vmatmul.mubr.bf16.gmra.mrb[88].mxu1 %v8322_v34  ;;  %v3303_v44 = vmax.f32 %v3239_v23, %v3271_v29  ;;  %v6491_v23 = vld [vmem:[%s8509_s5 + $0x230] ss:$8 sps:$4 sm:$0xff]   ;;  %v6577_v29 = vld [vmem:[#allocation20 + $0xf4] ss:$8 sps:$4 sm:$0xff]  }
 0x422   : > { %v3274_v50 = vmul.f32 0.2, %v3242_v31  ;;  %3859 = vmatprep.mubr.bf16.mxu1 %v8281_v6  ;;  %v3304_v52 = vmax.f32 %v3240_v18, %v3272_v47  ;;  %v6482_v6 = vld [vmem:[%s8509_s5 + $0x200] ss:$8 sps:$4 sm:$0xff]   ;;  %v6574_v18 = vld [vmem:[#allocation20 + $0xe4] ss:$8 sps:$4 sm:$0xff]  }
 0x423   : > { %v3305_v8 = vmax.f32 %v3241_v63, %v3273_v15  ;;  %v6497_v63 = vld [vmem:[%s8509_s5 + $0x250] ss:$8 sps:$4 sm:$0xff]   ;;  %v6575_v47 = vld [vmem:[#allocation20 + $0xf0] ss:$8 sps:$4 sm:$0xff]  }
 0x424   : > { %v3306_v2 = vmax.f32 %v3242_v31, %v3274_v50  ;;  %v3162_v53 = vpop.f32.mrb[72].mxu1  ;;  %v6580_v31 = vld [vmem:[#allocation20 + $0x104] ss:$8 sps:$4 sm:$0xff]   ;;  %v6578_v15 = vld [vmem:[#allocation20 + $0x100] ss:$8 sps:$4 sm:$0xff]  }
 0x425   : > { %v3243_v37 = vadd.f32 %v8268_v3, %v3162_v53  ;;  %v3164_v14 = vpop.f32.mrb[73].mxu1  ;;  %v8333_v22 = vpack.c.bf16 %v3305_v8, %v3303_v44  ;;  %v6503_v50 = vld [vmem:[%s8509_s5 + $0x270] ss:$8 sps:$4 sm:$0xff]   ;;  %v6508_v44 = vld [vmem:[%s8509_s5 + $0x284] ss:$8 sps:$4 sm:$0xff]  }
 0x426   : > { %v3244_v26 = vadd.f32 %v8271_v9, %v3164_v14  ;;  %v3166_v35 = vpop.f32.mrb[74].mxu1  ;;  %v3324_v39 = vpack.c.bf16 %v3306_v2, %v3304_v52  ;;  %v6581_v8 = vld [vmem:[#allocation20 + $0x110] ss:$8 sps:$4 sm:$0xff]   ;;  %v6586_v52 = vld [vmem:[#allocation20 + $0x124] ss:$8 sps:$4 sm:$0xff]  }
 0x427   : > { %v3275_v60 = vmul.f32 0.2, %v3243_v37  ;;  %v3245_v16 = vadd.f32 %v8268_v3, %v3166_v35  ;;  %v3168_v51 = vpop.f32.mrb[75].mxu1  ;;  %v6485_v3 = vld [vmem:[%s8509_s5 + $0x210] ss:$8 sps:$4 sm:$0xff]  }
 0x428   : > { %v3276_v54 = vmul.f32 0.2, %v3244_v26  ;;  %v3246_v5 = vadd.f32 %v8271_v9, %v3168_v51  ;;  %v6490_v9 = vld [vmem:[%s8509_s5 + $0x224] ss:$8 sps:$4 sm:$0xff]   ;;  %v6511_v2 = vld [vmem:[%s8509_s5 + $0x294] ss:$8 sps:$4 sm:$0xff]  }
 0x429   : > { %v3277_v7 = vmul.f32 0.2, %v3245_v16  ;;  %3860 = vmatmul.mubr.bf16.vlgmr.msra.gmra.mrb[76].mxu1 %v8277_v4  ;;  %v3307_v42 = vmax.f32 %v3243_v37, %v3275_v60  ;;  %v6563_v4 = vld [vmem:[#allocation20 + $0xb0] ss:$8 sps:$4 sm:$0xff]   ;;  %v6584_v53 = vld [vmem:[#allocation20 + $0x120] ss:$8 sps:$4 sm:$0xff]  }
 0x42a   : > { %v3278_v62 = vmul.f32 0.2, %v3246_v5  ;;  %4094 = vmatpush1.bf16.msra.mxu1 %v6482_v6  ;;  %3869 = vmatprep.mubr.bf16.mxu1 %v8299_v59  ;;  %v3308_v32 = vmax.f32 %v3244_v26, %v3276_v54  ;;  %v6488_v59 = vld [vmem:[%s8509_s5 + $0x220] ss:$8 sps:$4 sm:$0xff]   ;;  %v6514_v37 = vld [vmem:[%s8509_s5 + $0x2a4] ss:$8 sps:$4 sm:$0xff]  }
 0x42b   : > { %v3309_v55 = vmax.f32 %v3245_v16, %v3277_v7  ;;  %4095 = vmatprep.subr.bf16.mxu1 %v6487_v41  ;;  %4520 = vmatpush1.bf16.msra.mxu0 %v6563_v4  ;;  %v6587_v14 = vld [vmem:[#allocation20 + $0x130] ss:$8 sps:$4 sm:$0xff]   ;;  %v6590_v35 = vld [vmem:[#allocation20 + $0x140] ss:$8 sps:$4 sm:$0xff]   ;;  %v6595_v6 = vld [vmem:[#allocation20 + $0x154] ss:$8 sps:$4 sm:$0xff]  }
 0x42c   : > { %v3310_v13 = vmax.f32 %v3246_v5, %v3278_v62  ;;  %4521 = vmatprep.subr.bf16.mxu0 %v6568_v43  ;;  %v6517_v26 = vld [vmem:[%s8509_s5 + $0x2b4] ss:$8 sps:$4 sm:$0xff]   ;;  %v6520_v60 = vld [vmem:[%s8509_s5 + $0x2c4] ss:$8 sps:$4 sm:$0xff]   ;;  %v6518_v41 = vld [vmem:[%s8509_s5 + $0x2c0] ss:$8 sps:$4 sm:$0xff]  }
 0x42d   : > { %v8352_v10 = vpack.c.bf16 %v3309_v55, %v3307_v42  ;;  %v6593_v16 = vld [vmem:[#allocation20 + $0x150] ss:$8 sps:$4 sm:$0xff]   ;;  %v6598_v51 = vld [vmem:[#allocation20 + $0x164] ss:$8 sps:$4 sm:$0xff]   ;;  %v6596_v5 = vld [vmem:[#allocation20 + $0x160] ss:$8 sps:$4 sm:$0xff]  }
 0x42e   : > { %4096 = vmatpush1.bf16.msra.mxu1 %v6485_v3  ;;  %v8357_v40 = vpack.c.bf16 %v3310_v13, %v3308_v32  ;;  %v6523_v54 = vld [vmem:[%s8509_s5 + $0x2d4] ss:$8 sps:$4 sm:$0xff]   ;;  %v6521_v7 = vld [vmem:[%s8509_s5 + $0x2d0] ss:$8 sps:$4 sm:$0xff]   ;;  %v6526_v28 = vld [vmem:[%s8509_s5 + $0x2e4] ss:$8 sps:$4 sm:$0xff]  }
 0x42f   : > { %4097 = vmatprep.subr.bf16.mxu1 %v6490_v9  ;;  %4522 = vmatpush1.bf16.msra.mxu0 %v6566_v12  ;;  %v6599_v62 = vld [vmem:[#allocation20 + $0x170] ss:$8 sps:$4 sm:$0xff]   ;;  %v6604_v3 = vld [vmem:[#allocation20 + $0x184] ss:$8 sps:$4 sm:$0xff]   ;;  %v6602_v9 = vld [vmem:[#allocation20 + $0x180] ss:$8 sps:$4 sm:$0xff]  }
 0x430   : > { %4523 = vmatprep.subr.bf16.mxu0 %v6571_v45  ;;  %v6524_v42 = vld [vmem:[%s8509_s5 + $0x2e0] ss:$8 sps:$4 sm:$0xff]   ;;  %v6529_v55 = vld [vmem:[%s8509_s5 + $0x2f4] ss:$8 sps:$4 sm:$0xff]   ;;  %v6527_v32 = vld [vmem:[%s8509_s5 + $0x2f0] ss:$8 sps:$4 sm:$0xff]  }
 0x431   : > { %3870 = vmatmul.mubr.bf16.gmra.mrb[80].mxu1 %v8296_v30  ;;  %v6494_v30 = vld [vmem:[%s8509_s5 + $0x240] ss:$8 sps:$4 sm:$0xff]   ;;  %v6610_v43 = vld [vmem:[#allocation20 + $0x1a4] ss:$8 sps:$4 sm:$0xff]  }
 0x432   : > { %4098 = vmatpush1.bf16.msra.mxu1 %v6488_v59  ;;  %3879 = vmatprep.mubr.bf16.mxu1 %v8317_v17  ;;  %v6499_v17 = vld [vmem:[%s8509_s5 + $0x254] ss:$8 sps:$4 sm:$0xff]   ;;  %v6607_v13 = vld [vmem:[#allocation20 + $0x194] ss:$8 sps:$4 sm:$0xff]  }
 0x433   : > { %4099 = vmatprep.subr.bf16.mxu1 %v6493_v46  ;;  %4524 = vmatpush1.bf16.msra.mxu0 %v6569_v48  ;;  %v6605_v4 = vld [vmem:[#allocation20 + $0x190] ss:$8 sps:$4 sm:$0xff]   ;;  %v6608_v59 = vld [vmem:[#allocation20 + $0x1a0] ss:$8 sps:$4 sm:$0xff]   ;;  %v6625_v12 = vld [vmem:[#allocation20 + $0x1f4] ss:$8 sps:$4 sm:$0xff]  }
 0x434   : > { %4525 = vmatprep.subr.bf16.mxu0 %v6574_v18  ;;  %v6620_v46 = vld [vmem:[#allocation20 + $0x1e0] ss:$8 sps:$4 sm:$0xff]   ;;  %v6623_v45 = vld [vmem:[#allocation20 + $0x1f0] ss:$8 sps:$4 sm:$0xff]  }
 0x436   : > { %4100 = vmatpush1.bf16.msra.mxu1 %v6491_v23  ;;  %v6628_v23 = vld [vmem:[#allocation20 + $0x204] ss:$8 sps:$4 sm:$0xff]  }
 0x437   : > { %4101 = vmatprep.subr.bf16.mxu1 %v6496_v24  ;;  %4526 = vmatpush1.bf16.msra.mxu0 %v6572_v49  ;;  %v4182_v24 = vld [vmem:[#allocation18] sm:$0x3] }
 0x438   : > { %4527 = vmatprep.subr.bf16.mxu0 %v6577_v29  ;;  %v8451_v48 = vrot.slane %v4182_v24, %v8577_v57  ;;  %v8454_v18 = vrot.slane %v4182_v24, %v8578_v33 }
 0x439   : > { %3880 = vmatmul.mubr.bf16.gmra.mrb[84].mxu1 %v8314_v56  ;;  %v6500_v56 = vld [vmem:[%s8509_s5 + $0x260] ss:$8 sps:$4 sm:$0xff]  }
 0x43a   : > { %4102 = vmatpush1.bf16.msra.mxu1 %v6494_v30  ;;  %3889 = vmatprep.mubr.bf16.mxu1 %v3324_v39  ;;  %v6515_v39 = vld [vmem:[%s8509_s5 + $0x2b0] ss:$8 sps:$4 sm:$0xff]  }
 0x43b   : > { %4103 = vmatprep.subr.bf16.mxu1 %v6499_v17  ;;  %4528 = vmatpush1.bf16.msra.mxu0 %v6575_v47 }
 0x43c   : > { %4710 = vmatprep.subr.bf16.mxu0 %v6580_v31 }
 0x43e   : > { %4104 = vmatpush1.bf16.msra.mxu1 %v6497_v63  ;;  %4530 = vmatmul.mubr.bf16.vlgmr.msra.gmra.mrb[64].mxu0 %v8576_v38  ;;  %v6509_v38 = vld [vmem:[%s8509_s5 + $0x290] ss:$8 sps:$4 sm:$0xff]  }
 0x43f   : > { %4105 = vmatprep.subr.bf16.mxu1 %v6502_v25  ;;  %4711 = vmatpush1.bf16.msra.mxu0 %v6578_v15 }
 0x440   : > { %4712 = vmatprep.subr.bf16.mxu0 %v6583_v20 }
 0x441   : > { %3890 = vmatmul.mubr.bf16.gmra.mrb[88].mxu1 %v8333_v22  ;;  %v6592_v22 = vld [vmem:[#allocation20 + $0x144] ss:$8 sps:$4 sm:$0xff]  }
 0x442   : > { %4106 = vmatpush1.bf16.msra.mxu1 %v6500_v56  ;;  %4125 = vmatprep.mubr.bf16.mxu1 %v8289_v11  ;;  %v6506_v11 = vld [vmem:[%s8509_s5 + $0x280] ss:$8 sps:$4 sm:$0xff]  }
 0x443   : > { %4107 = vmatprep.subr.bf16.mxu1 %v6505_v1  ;;  %4713 = vmatpush1.bf16.msra.mxu0 %v6581_v8 }
 0x444   : > { %4714 = vmatprep.subr.bf16.mxu0 %v6586_v52 }
 0x446   : > { %4108 = vmatpush1.bf16.msra.mxu1 %v6503_v50 }
 0x447   : > { %4109 = vmatprep.subr.bf16.mxu1 %v6508_v44  ;;  %4715 = vmatpush1.bf16.msra.mxu0 %v6584_v53 }
 0x448   : > { %4716 = vmatprep.subr.bf16.mxu0 %v6589_v19 }
 0x44a   : > { %4110 = vmatpush1.bf16.msra.mxu1 %v6506_v11 }
 0x44b   : > { %4111 = vmatprep.subr.bf16.mxu1 %v6511_v2  ;;  %4717 = vmatpush1.bf16.msra.mxu0 %v6587_v14 }
 0x44c   : > { %4718 = vmatprep.subr.bf16.mxu0 %v6592_v22 }
 0x44e   : > { %4112 = vmatpush1.bf16.msra.mxu1 %v6509_v38 }
 0x44f   : > { %4113 = vmatprep.subr.bf16.mxu1 %v6514_v37  ;;  %4719 = vmatpush1.bf16.msra.mxu0 %v6590_v35 }
 0x450   : > { %4720 = vmatprep.subr.bf16.mxu0 %v6595_v6 }
 0x452   : > { %4114 = vmatpush1.bf16.msra.mxu1 %v6512_v27 }
 0x453   : > { %4115 = vmatprep.subr.bf16.mxu1 %v6517_v26  ;;  %4721 = vmatpush1.bf16.msra.mxu0 %v6593_v16 }
 0x454   : > { %4722 = vmatprep.subr.bf16.mxu0 %v6598_v51 }
 0x456   : > { %4116 = vmatpush1.bf16.msra.mxu1 %v6515_v39 }
 0x457   : > { %4117 = vmatprep.subr.bf16.mxu1 %v6520_v60  ;;  %4723 = vmatpush1.bf16.msra.mxu0 %v6596_v5 }
 0x458   : > { %4724 = vmatprep.subr.bf16.mxu0 %v6601_v58 }
 0x45a   : > { %4118 = vmatpush1.bf16.msra.mxu1 %v6518_v41 }
 0x45b   : > { %4119 = vmatprep.subr.bf16.mxu1 %v6523_v54  ;;  %4725 = vmatpush1.bf16.msra.mxu0 %v6599_v62 }
 0x45c   : > { %4726 = vmatprep.subr.bf16.mxu0 %v6604_v3 }
 0x45e   : > { %4120 = vmatpush1.bf16.msra.mxu1 %v6521_v7 }
 0x45f   : > { %4121 = vmatprep.subr.bf16.mxu1 %v6526_v28  ;;  %4727 = vmatpush1.bf16.msra.mxu0 %v6602_v9 }
 0x460   : > { %4728 = vmatprep.subr.bf16.mxu0 %v6607_v13 }
 0x462   : > { %4122 = vmatpush1.bf16.msra.mxu1 %v6524_v42 }
 0x463   : > { %4123 = vmatprep.subr.bf16.mxu1 %v6529_v55  ;;  %4729 = vmatpush1.bf16.msra.mxu0 %v6605_v4 }
 0x464   : > { %4730 = vmatprep.subr.bf16.mxu0 %v6610_v43 }
 0x466   : > { %4124 = vmatpush1.bf16.msra.mxu1 %v6527_v32 }
 0x467   : > { %4731 = vmatpush1.bf16.msra.mxu0 %v6608_v59 }
 0x469   : > { %4126 = vmatmul.mubr.bf16.vlgmr.msra.gmra.mrb[76].mxu1 %v8286_v21  ;;  %v6613_v21 = vld [vmem:[#allocation20 + $0x1b4] ss:$8 sps:$4 sm:$0xff]  }
 0x46a   : > { %4135 = vmatprep.mubr.bf16.mxu1 %v8307_v36  ;;  %v6611_v36 = vld [vmem:[#allocation20 + $0x1b0] ss:$8 sps:$4 sm:$0xff]   ;;  %4732 = vmatprep.subr.bf16.mxu0 %v6613_v21 }
 0x46b   : > { %4733 = vmatpush1.bf16.msra.mxu0 %v6611_v36 }
 0x471   : > { %4136 = vmatmul.mubr.bf16.gmra.mrb[80].mxu1 %v8304_v0  ;;  %v6616_v0 = vld [vmem:[#allocation20 + $0x1c4] ss:$8 sps:$4 sm:$0xff]  }
 0x472   : > { %4145 = vmatprep.mubr.bf16.mxu1 %v8325_v61  ;;  %v6614_v61 = vld [vmem:[#allocation20 + $0x1c0] ss:$8 sps:$4 sm:$0xff]   ;;  %4734 = vmatprep.subr.bf16.mxu0 %v6616_v0 }
 0x473   : > { %4735 = vmatpush1.bf16.msra.mxu0 %v6614_v61 }
 0x479   : > { %4146 = vmatmul.mubr.bf16.gmra.mrb[84].mxu1 %v8322_v34  ;;  %v6619_v34 = vld [vmem:[#allocation20 + $0x1d4] ss:$8 sps:$4 sm:$0xff]  }
 0x47a   : > { %4155 = vmatprep.mubr.bf16.mxu1 %v8357_v40  ;;  %v6617_v40 = vld [vmem:[#allocation20 + $0x1d0] ss:$8 sps:$4 sm:$0xff]   ;;  %4736 = vmatprep.subr.bf16.mxu0 %v6619_v34 }
 0x47b   : > { %4737 = vmatpush1.bf16.msra.mxu0 %v6617_v40 }
 0x481   : > { %4156 = vmatmul.mubr.bf16.gmra.mrb[88].mxu1 %v8352_v10  ;;  %v6622_v10 = vld [vmem:[#allocation20 + $0x1e4] ss:$8 sps:$4 sm:$0xff]  }
 0x482   : > { %4738 = vmatprep.subr.bf16.mxu0 %v6622_v10 }
 0x483   : > { %4739 = vmatpush1.bf16.msra.mxu0 %v6620_v46 }
 0x484   : > { %4740 = vmatprep.subr.bf16.mxu0 %v6625_v12 }
 0x487   : > { %4741 = vmatpush1.bf16.msra.mxu0 %v6623_v45 }
 0x488   : > { %4956 = vmatprep.subr.bf16.mxu0 %v6628_v23  ;;  %v6626_v23 = vld [vmem:[#allocation20 + $0x200] ss:$8 sps:$4 sm:$0xff]  }
 0x53c   : > { %v4127_v30 = vpop.f32.mrb[76].mxu1 }
 0x53d   : > { %v4194_v17 = vadd.f32 %v8451_v48, %v4127_v30  ;;  %v4129_v49 = vpop.f32.mrb[77].mxu1 }
 0x53e   : > { %v4195_v29 = vadd.f32 %v8454_v18, %v4129_v49  ;;  %v4131_v63 = vpop.f32.mrb[78].mxu1 }
 0x53f   : > { %v4210_v25 = vmul.f32 0.2, %v4194_v17  ;;  %v4196_v47 = vadd.f32 %v8451_v48, %v4131_v63  ;;  %v4133_v31 = vpop.f32.mrb[79].mxu1 }
 0x540   : > { %v4211_v56 = vmul.f32 0.2, %v4195_v29  ;;  %v4197_v1 = vadd.f32 %v8454_v18, %v4133_v31 }
 0x541   : > { %v4212_v15 = vmul.f32 0.2, %v4196_v47  ;;  %v4226_v50 = vmax.f32 %v4194_v17, %v4210_v25 }
 0x542   : > { %v4213_v20 = vmul.f32 0.2, %v4197_v1  ;;  %v4227_v8 = vmax.f32 %v4195_v29, %v4211_v56  ;;  %v6631_v29 = vld [vmem:[#allocation20 + $0x214] ss:$8 sps:$4 sm:$0xff]   ;;  %v6629_v56 = vld [vmem:[#allocation20 + $0x210] ss:$8 sps:$4 sm:$0xff]  }
 0x543   : > { %v4228_v44 = vmax.f32 %v4196_v47, %v4212_v15 }
 0x544   : > { %v4229_v52 = vmax.f32 %v4197_v1, %v4213_v20  ;;  %v4137_v11 = vpop.f32.mrb[80].mxu1  ;;  %v6634_v20 = vld [vmem:[#allocation20 + $0x224] ss:$8 sps:$4 sm:$0xff]  }
 0x545   : > { %v4242_v2 = vpack.c.bf16 %v4228_v44, %v4226_v50  ;;  %v4198_v53 = vadd.f32 %v8451_v48, %v4137_v11  ;;  %v4139_v19 = vpop.f32.mrb[81].mxu1  ;;  %v6637_v11 = vld [vmem:[#allocation20 + $0x234] ss:$8 sps:$4 sm:$0xff]  }
 0x546   : > { %v4199_v38 = vadd.f32 %v8454_v18, %v4139_v19  ;;  %v4141_v37 = vpop.f32.mrb[82].mxu1  ;;  %v4243_v14 = vpack.c.bf16 %v4229_v52, %v4227_v8  ;;  %v6643_v19 = vld [vmem:[#allocation20 + $0x254] ss:$8 sps:$4 sm:$0xff]  }
 0x547   : > { %v4214_v22 = vmul.f32 0.2, %v4198_v53  ;;  %v4200_v27 = vadd.f32 %v8451_v48, %v4141_v37  ;;  %v4143_v26 = vpop.f32.mrb[83].mxu1  ;;  %v6646_v37 = vld [vmem:[#allocation20 + $0x264] ss:$8 sps:$4 sm:$0xff]  }
 0x548   : > { %v4215_v35 = vmul.f32 0.2, %v4199_v38  ;;  %v4201_v6 = vadd.f32 %v8454_v18, %v4143_v26  ;;  %v6652_v26 = vld [vmem:[#allocation20 + $0x284] ss:$8 sps:$4 sm:$0xff]  }
 0x549   : > { %v4216_v39 = vmul.f32 0.2, %v4200_v27  ;;  %v4230_v16 = vmax.f32 %v4198_v53, %v4214_v22  ;;  %v6638_v53 = vld [vmem:[#allocation20 + $0x240] ss:$8 sps:$4 sm:$0xff]   ;;  %v6649_v22 = vld [vmem:[#allocation20 + $0x274] ss:$8 sps:$4 sm:$0xff]  }
 0x54a   : > { %v4217_v60 = vmul.f32 0.2, %v4201_v6  ;;  %v4231_v41 = vmax.f32 %v4199_v38, %v4215_v35  ;;  %v6641_v38 = vld [vmem:[#allocation20 + $0x250] ss:$8 sps:$4 sm:$0xff]   ;;  %v6650_v35 = vld [vmem:[#allocation20 + $0x280] ss:$8 sps:$4 sm:$0xff]  }
 0x54b   : > { %v4232_v51 = vmax.f32 %v4200_v27, %v4216_v39  ;;  %v6647_v27 = vld [vmem:[#allocation20 + $0x270] ss:$8 sps:$4 sm:$0xff]  }
 0x54c   : > { %v4233_v54 = vmax.f32 %v4201_v6, %v4217_v60  ;;  %v4147_v5 = vpop.f32.mrb[84].mxu1  ;;  %v6655_v6 = vld [vmem:[#allocation20 + $0x294] ss:$8 sps:$4 sm:$0xff]   ;;  %v6653_v39 = vld [vmem:[#allocation20 + $0x290] ss:$8 sps:$4 sm:$0xff]  }
 0x54d   : > { %v4202_v58 = vadd.f32 %v8451_v48, %v4147_v5  ;;  %v4149_v7 = vpop.f32.mrb[85].mxu1  ;;  %v8465_v28 = vpack.c.bf16 %v4232_v51, %v4230_v16  ;;  %v6658_v60 = vld [vmem:[#allocation20 + $0x2a4] ss:$8 sps:$4 sm:$0xff]   ;;  %v6656_v16 = vld [vmem:[#allocation20 + $0x2a0] ss:$8 sps:$4 sm:$0xff]  }
 0x54e   : > { %v4203_v62 = vadd.f32 %v8454_v18, %v4149_v7  ;;  %v4151_v3 = vpop.f32.mrb[86].mxu1  ;;  %v4245_v42 = vpack.c.bf16 %v4233_v54, %v4231_v41  ;;  %v6661_v51 = vld [vmem:[#allocation20 + $0x2b4] ss:$8 sps:$4 sm:$0xff]   ;;  %v6659_v41 = vld [vmem:[#allocation20 + $0x2b0] ss:$8 sps:$4 sm:$0xff]  }
 0x54f   : > { %v4218_v55 = vmul.f32 0.2, %v4202_v58  ;;  %v4204_v9 = vadd.f32 %v8451_v48, %v4151_v3  ;;  %v4153_v32 = vpop.f32.mrb[87].mxu1  ;;  %v6664_v54 = vld [vmem:[#allocation20 + $0x2c4] ss:$8 sps:$4 sm:$0xff]  }
 0x550   : > { %v4219_v13 = vmul.f32 0.2, %v4203_v62  ;;  %v4205_v4 = vadd.f32 %v8454_v18, %v4153_v32  ;;  %4539 = vmatprep.mubr.bf16.mxu0 %v4245_v42  ;;  %v6662_v5 = vld [vmem:[#allocation20 + $0x2c0] ss:$8 sps:$4 sm:$0xff]   ;;  %v6665_v7 = vld [vmem:[#allocation20 + $0x2d0] ss:$8 sps:$4 sm:$0xff]  }
 0x551   : > { %v4220_v43 = vmul.f32 0.2, %v4204_v9  ;;  %4540 = vmatmul.mubr.bf16.gmra.mrb[68].mxu0 %v8465_v28  ;;  %v4234_v21 = vmax.f32 %v4202_v58, %v4218_v55  ;;  %v6667_v58 = vld [vmem:[#allocation20 + $0x2d4] ss:$8 sps:$4 sm:$0xff]   ;;  %v6668_v3 = vld [vmem:[#allocation20 + $0x2e0] ss:$8 sps:$4 sm:$0xff]  }
 0x552   : > { %v4221_v59 = vmul.f32 0.2, %v4205_v4  ;;  %4742 = vmatprep.mubr.bf16.mxu0 %v4243_v14  ;;  %v4235_v0 = vmax.f32 %v4203_v62, %v4219_v13  ;;  %v6644_v14 = vld [vmem:[#allocation20 + $0x260] ss:$8 sps:$4 sm:$0xff]   ;;  %v6670_v62 = vld [vmem:[#allocation20 + $0x2e4] ss:$8 sps:$4 sm:$0xff]  }
 0x553   : > { %v4236_v36 = vmax.f32 %v4204_v9, %v4220_v43  ;;  %v6671_v55 = vld [vmem:[#allocation20 + $0x2f0] ss:$8 sps:$4 sm:$0xff]   ;;  %v5017_v9 = vld [vmem:[#allocation21] sm:$0x3] }
 0x554   : > { %v4237_v61 = vmax.f32 %v4205_v4, %v4221_v59  ;;  %v4157_v34 = vpop.f32.mrb[88].mxu1  ;;  %v5022_v32 = vrot.slane %v5017_v9, %v8577_v57  ;;  %v5026_v13 = vrot.slane %v5017_v9, %v8578_v33 }
 0x555   : > { %v4206_v40 = vadd.f32 %v8451_v48, %v4157_v34  ;;  %v4159_v10 = vpop.f32.mrb[89].mxu1  ;;  %v4246_v46 = vpack.c.bf16 %v4236_v36, %v4234_v21 }
 0x556   : > { %v4207_v12 = vadd.f32 %v8454_v18, %v4159_v10  ;;  %v4161_v45 = vpop.f32.mrb[90].mxu1  ;;  %v4247_v24 = vpack.c.bf16 %v4237_v61, %v4235_v0 }
 0x557   : > { %v4222_v30 = vmul.f32 0.2, %v4206_v40  ;;  %v4208_v17 = vadd.f32 %v8451_v48, %v4161_v45  ;;  %v4163_v49 = vpop.f32.mrb[91].mxu1  ;;  %v6632_v48 = vld [vmem:[#allocation20 + $0x220] ss:$8 sps:$4 sm:$0xff]  }
 0x558   : > { %v4223_v63 = vmul.f32 0.2, %v4207_v12  ;;  %v4209_v25 = vadd.f32 %v8454_v18, %v4163_v49  ;;  %v6635_v18 = vld [vmem:[#allocation20 + $0x230] ss:$8 sps:$4 sm:$0xff]  }
 0x559   : > { %v4224_v47 = vmul.f32 0.2, %v4208_v17  ;;  %4743 = vmatmul.mubr.bf16.vlgmr.msra.gmra.mrb[64].mxu0 %v4242_v2  ;;  %v4238_v1 = vmax.f32 %v4206_v40, %v4222_v30  ;;  %v6640_v2 = vld [vmem:[#allocation20 + $0x244] ss:$8 sps:$4 sm:$0xff]  }
 0x55a   : > { %v4225_v31 = vmul.f32 0.2, %v4209_v25  ;;  %4957 = vmatpush1.bf16.msra.mxu0 %v6626_v23  ;;  %4752 = vmatprep.mubr.bf16.mxu0 %v4247_v24  ;;  %v4239_v50 = vmax.f32 %v4207_v12, %v4223_v63 }
 0x55b   : > { %v4240_v15 = vmax.f32 %v4208_v17, %v4224_v47  ;;  %4958 = vmatprep.subr.bf16.mxu0 %v6631_v29  ;;  %v8579_v17 = vld [vmem:[#allocation30_spill] sm:$0xff] }
 0x55c   : > { %v4241_v44 = vmax.f32 %v4209_v25, %v4225_v31  ;;  %v5075_v49 = vsub.s32 2, %v8579_v17  ;;  %v5061_v47 = vld [vmem:[%s8580_s12] sm:$0xf] }
 0x55d   : > { %v4248_v8 = vpack.c.bf16 %v4240_v15, %v4238_v1  ;;  %v5103_v15 = vsub.s32 3, %v8579_v17 }
 0x55e   : > { %4959 = vmatpush1.bf16.msra.mxu0 %v6629_v56  ;;  %v4249_v52 = vpack.c.bf16 %v4241_v44, %v4239_v50 }
 0x55f   : > { %4960 = vmatprep.subr.bf16.mxu0 %v6634_v20 }
 0x561   : > { %4753 = vmatmul.mubr.bf16.gmra.mrb[68].mxu0 %v4246_v46 }
 0x562   : > { %4961 = vmatpush1.bf16.msra.mxu0 %v6632_v48  ;;  %4988 = vmatprep.mubr.bf16.mxu0 %v4245_v42  ;;  %v6673_v42 = vld [vmem:[#allocation20 + $0x2f4] ss:$8 sps:$4 sm:$0xff]  }
 0x563   : > { %4962 = vmatprep.subr.bf16.mxu0 %v6637_v11  ;;  %v5076_v11 = vrot.slane %v5061_v47, %v5075_v49 }
 0x566   : > { %4963 = vmatpush1.bf16.msra.mxu0 %v6635_v18 }
 0x567   : > { %4964 = vmatprep.subr.bf16.mxu0 %v6640_v2  ;;  %v5100_v2 = vrot.slane %v5061_v47, %v8578_v33 }
 0x56a   : > { %4965 = vmatpush1.bf16.msra.mxu0 %v6638_v53 }
 0x56b   : > { %4966 = vmatprep.subr.bf16.mxu0 %v6643_v19  ;;  %v5104_v19 = vrot.slane %v5061_v47, %v5103_v15 }
 0x56e   : > { %4967 = vmatpush1.bf16.msra.mxu0 %v6641_v38 }
 0x56f   : > { %4968 = vmatprep.subr.bf16.mxu0 %v6646_v37 }
 0x572   : > { %4969 = vmatpush1.bf16.msra.mxu0 %v6644_v14 }
 0x573   : > { %4970 = vmatprep.subr.bf16.mxu0 %v6649_v22 }
 0x576   : > { %4971 = vmatpush1.bf16.msra.mxu0 %v6647_v27 }
 0x577   : > { %4972 = vmatprep.subr.bf16.mxu0 %v6652_v26  ;;  %v5086_v26 = vrot.slane %v5076_v11, %v8577_v57 }
 0x57a   : > { %4973 = vmatpush1.bf16.msra.mxu0 %v6650_v35 }
 0x57b   : > { %4974 = vmatprep.subr.bf16.mxu0 %v6655_v6 }
 0x57e   : > { %4975 = vmatpush1.bf16.msra.mxu0 %v6653_v39 }
 0x57f   : > { %4976 = vmatprep.subr.bf16.mxu0 %v6658_v60  ;;  %v5110_v60 = vrot.slane %v5100_v2, %v8578_v33 }
 0x582   : > { %4977 = vmatpush1.bf16.msra.mxu0 %v6656_v16 }
 0x583   : > { %4978 = vmatprep.subr.bf16.mxu0 %v6661_v51 }
 0x586   : > { %4979 = vmatpush1.bf16.msra.mxu0 %v6659_v41 }
 0x587   : > { %4980 = vmatprep.subr.bf16.mxu0 %v6664_v54  ;;  %v5114_v54 = vrot.slane %v5104_v19, %v8578_v33  ;;  %v5856_v33 = vld [vmem:[#allocation11] ss:$0 sm:$0xff] }
 0x58a   : > { %4981 = vmatpush1.bf16.msra.mxu0 %v6662_v5 }
 0x58b   : > { %4982 = vmatprep.subr.bf16.mxu0 %v6667_v58 }
 0x58e   : > { %4983 = vmatpush1.bf16.msra.mxu0 %v6665_v7 }
 0x58f   : > { %4984 = vmatprep.subr.bf16.mxu0 %v6670_v62 }
 0x592   : > { %4985 = vmatpush1.bf16.msra.mxu0 %v6668_v3 }
 0x593   : > { %4986 = vmatprep.subr.bf16.mxu0 %v6673_v42 }
 0x596   : > { %4987 = vmatpush1.bf16.msra.mxu0 %v6671_v55 }
 0x599   : > { %4989 = vmatmul.mubr.bf16.vlgmr.msra.gmra.mrb[64].mxu0 %v8465_v28 }
 0x59a   : > { %4998 = vmatprep.mubr.bf16.mxu0 %v4249_v52  ;;  %v5072_v52 = vrot.slane %v5061_v47, %v8577_v57 }
 0x59c   : > { %v5082_v27 = vrot.slane %v5072_v52, %v8577_v57 }
 0x5a1   : > { %4999 = vmatmul.mubr.bf16.gmra.mrb[68].mxu0 %v4248_v8 }
 0x66c   : > { %v4990_v4 = vpop.f32.mrb[64].mxu0 }
 0x66d   : > { %v5029_v43 = vadd.f32 %v5022_v32, %v4990_v4  ;;  %v4992_v59 = vpop.f32.mrb[65].mxu0 }
 0x66e   : > { %v5030_v21 = vadd.f32 %v5026_v13, %v4992_v59  ;;  %v4994_v36 = vpop.f32.mrb[66].mxu0 }
 0x66f   : > { %v5037_v0 = vmul.f32 0.2, %v5029_v43  ;;  %v5031_v61 = vadd.f32 %v5022_v32, %v4994_v36  ;;  %v4996_v34 = vpop.f32.mrb[67].mxu0 }
 0x670   : > { %v5038_v40 = vmul.f32 0.2, %v5030_v21  ;;  %v5032_v10 = vadd.f32 %v5026_v13, %v4996_v34 }
 0x671   : > { %v5039_v46 = vmul.f32 0.2, %v5031_v61  ;;  %v5045_v28 = vmax.f32 %v5029_v43, %v5037_v0 }
 0x672   : > { %v5040_v12 = vmul.f32 0.2, %v5032_v10  ;;  %v5046_v23 = vmax.f32 %v5030_v21, %v5038_v40 }
 0x673   : > { %v5047_v45 = vmax.f32 %v5031_v61, %v5039_v46 }
 0x674   : > { %v5048_v24 = vmax.f32 %v5032_v10, %v5040_v12  ;;  %v5000_v30 = vpop.f32.mrb[68].mxu0 }
 0x675   : > { %v5053_v29 = vpack.c.bf16 %v5047_v45, %v5045_v28  ;;  %v5033_v63 = vadd.f32 %v5022_v32, %v5000_v30  ;;  %v5002_v25 = vpop.f32.mrb[69].mxu0 }
 0x676   : > { %v5054_v31 = vpack.c.bf16 %v5048_v24, %v5046_v23  ;;  %v5034_v56 = vadd.f32 %v5026_v13, %v5002_v25  ;;  %v5004_v1 = vpop.f32.mrb[70].mxu0 }
 0x677   : > { %v5041_v20 = vmul.f32 0.2, %v5033_v63  ;;  %v5035_v50 = vadd.f32 %v5022_v32, %v5004_v1  ;;  %v5006_v44 = vpop.f32.mrb[71].mxu0  ;;  %v5066_v35 = vunpack.c.h.bf16 %v5053_v29  ;;  %v5064_v39 = vunpack.c.l.bf16 %v5053_v29 }
 0x678   : > { %v5042_v8 = vmul.f32 0.2, %v5034_v56  ;;  %v5036_v48 = vadd.f32 %v5026_v13, %v5006_v44  ;;  %v5067_v16 = vunpack.c.h.bf16 %v5054_v31  ;;  %v5065_v41 = vunpack.c.l.bf16 %v5054_v31 }
 0x679   : > { %v5043_v18 = vmul.f32 0.2, %v5035_v50  ;;  %v5049_v38 = vmax.f32 %v5033_v63, %v5041_v20  ;;  %v5087_v3 = vmul.f32 %v5082_v27, %v5064_v39  ;;  %v5089_v55 = vmul.f32 %v5082_v27, %v5066_v35 }
 0x67a   : > { %v5044_v53 = vmul.f32 0.2, %v5036_v48  ;;  %v5050_v14 = vmax.f32 %v5034_v56, %v5042_v8  ;;  %v5088_v57 = vmul.f32 %v5086_v26, %v5065_v41  ;;  %v5090_v13 = vmul.f32 %v5086_v26, %v5067_v16 }
 0x67b   : > { %v5051_v37 = vmax.f32 %v5035_v50, %v5043_v18 }
 0x67c   : > { %v5052_v22 = vmax.f32 %v5036_v48, %v5044_v53 }
 0x67d   : > { %v5055_v6 = vpack.c.bf16 %v5051_v37, %v5049_v38 }
 0x67e   : > { %v5056_v51 = vpack.c.bf16 %v5052_v22, %v5050_v14 }
 0x67f   : > { %v5095_v5 = vunpack.c.h.bf16 %v5055_v6  ;;  %v5093_v58 = vunpack.c.l.bf16 %v5055_v6 }
 0x680   : > { %v5096_v7 = vunpack.c.h.bf16 %v5056_v51  ;;  %v5094_v62 = vunpack.c.l.bf16 %v5056_v51 }
 0x681   : > { %v5115_v42 = vmul.f32 %v5110_v60, %v5093_v58  ;;  %v5117_v9 = vmul.f32 %v5110_v60, %v5095_v5 }
 0x682   : > { %v5116_v32 = vmul.f32 %v5114_v54, %v5094_v62  ;;  %v5118_v4 = vmul.f32 %v5114_v54, %v5096_v7 }
 0x683   : > { %v5119_v43 = vadd.f32 %v5115_v42, %v5087_v3  ;;  %v5121_v59 = vadd.f32 %v5117_v9, %v5089_v55 }
 0x684   : > { %v5120_v21 = vadd.f32 %v5116_v32, %v5088_v57  ;;  %v5122_v36 = vadd.f32 %v5118_v4, %v5090_v13 }
 0x686   : > { %v5123_v0 = vadd.f32 %v5120_v21, %v5119_v43  ;;  %v5126_v61 = vadd.f32 %v5122_v36, %v5121_v59 }
 0x688   : > { %5124 = vadd.xlane.f32.xlu0 %v5123_v0 }
 0x68c   : > { %5127 = vadd.xlane.f32.xlu0 %v5126_v61 }
 0x715   : > { %v5125_v34 = vpop.xlane.xlu0 %5124 }
 0x716   : > { %v5136_v40 = vadd.f32 %v5856_v33, %v5125_v34 }
 0x718   : > { %5139 = vst.msk [vmem:[%s763_s14] sm:$0xff] %vm5138_vm1, %v5136_v40 }
 0x719   : > { %v5128_v10 = vpop.xlane.xlu0 %5127 }
 0x71a   : > { %v5137_v46 = vadd.f32 %v5856_v33, %v5128_v10 }
 0x71c   : > { %5140 = vst.msk [vmem:[%s763_s14 + $0x8] sm:$0xff] %vm5138_vm1, %v5137_v46 }
 0x71d PF: > { %s8583_s21 = sld [smem:[#allocation27_spill]]  ;;  %s8584_s2 = sld [smem:[#allocation28_spill]] }
 0x71e   : > { %s8585_s19 = smov %s6876_s20 }
 0x723   : > { %p24_p4 = scmp.ge.s32.totalorder %s8583_s21, 4   ;;  %s8586_s20 = smov %s8584_s2 }
 0x725   :  { %26 = sbr.rel (!%p24_p4) target bundleno = 10 (0xa), region = 204 }
 0x72c   :  { %5163 = vsyncpa [#allocation14], 1 }
 0x72d   :  { %5165 = vsyncpa [#allocation14 + $0x1], 1 }
 0x72e   :  { %5166 = vsyncpa [#allocation16], 1 }
 0x72f   :  { %5167 = vsyncpa [#allocation19], 1 }
 0x730   :  { %5168 = vsyncpa [#allocation22], 1 }

</bundles_post_ra>
